<compile_context>
chip_gen: v7x
topology: tpu7x:2x2x1
jax: 0.10.0
libtpu: 0.0.40
codegen_flags: <defaults>
</compile_context>

<pallas_src>
import functools

import jax
import jax.numpy as jnp
from jax.experimental import pallas as pl
from jax.experimental.pallas import tpu as pltpu


# ------------------------------ fused kernel ---------------------------------
def _fused_kernel(T, B, x_ref, wih0_ref, whh0_ref, bias_ref, wcat_ref,
                  aw_ref, ab_ref, fw_ref, fb_ref, out_ref):
    """Whole forward pass for one batch block.

    x_ref    : (1, T*B, D)   time-major flattened inputs for this batch block (f32)
    wih0_ref : (D, 4H)       layer-0 input->gates weights, transposed, [i,f,o,g] (bf16)
    whh0_ref : (H, 4H)       layer-0 hidden->gates weights, transposed (bf16)
    bias_ref : (L, 1, 4H)    combined bias b_ih + b_hh per layer (f32)
    wcat_ref : (max(L-1,1), 2H, 4H) layers>=1: concat(W_ih_l.T ; W_hh_l.T) (bf16)
    aw_ref   : (1, H)        attention scoring vector (f32)
    ab_ref   : (1, 1)        attention scoring bias (f32)
    fw_ref   : (H, Opad)     final Linear weight, transposed + lane-padded (bf16)
    fb_ref   : (1, Opad)     final Linear bias, lane-padded (f32)
    out_ref  : (1, B, Opad)
    """
    H = whh0_ref.shape[0]
    L = bias_ref.shape[0]
    f32 = jnp.float32
    cdt = wih0_ref.dtype                       # MXU operand dtype (bf16)

    # Hoisted layer-0 input projection: ONE MXU matmul covering every timestep.
    # Kept as a register value (~8 vregs at T*B=16, 4H=512) -> static slices below,
    # no unaligned sublane loads on the per-step path.
    gx0 = jnp.dot(x_ref[0].astype(cdt), wih0_ref[...],
                  preferred_element_type=f32) + bias_ref[0]          # (T*B, 4H) f32

    def cell(gates, c_prev):
        # gate order [ i | f | o | g ]; sigmoid via one EUP tanh: 0.5*tanh(0.5x)+0.5
        ifo = 0.5 * jnp.tanh(0.5 * gates[:, :3 * H]) + 0.5            # (B, 3H)
        g = jnp.tanh(gates[:, 3 * H:])                                # (B, H)
        c_new = ifo[:, H:2 * H] * c_prev + ifo[:, :H] * g
        h_new = ifo[:, 2 * H:3 * H] * jnp.tanh(c_new)
        return h_new, c_new

    zeros = jnp.zeros((B, H), f32)
    h = [zeros] * L
    c = [zeros] * L
    top = []                                    # top-layer hidden states, time order

    # Wavefront over layers: iteration s advances layer l at timestep t = s - l.
    # Every matmul in one iteration only reads *previous*-iteration state, so the
    # (up to L) matmuls per iteration are independent and overlap in the MXU
    # pipeline; serial chain = T + L - 1 iterations instead of L*T.
    for s in range(T + L - 1):                  # fully unrolled (T, L are small)
        h_prev = list(h)
        for l in range(L):
            t = s - l
            if t < 0 or t >= T:
                continue
            if l == 0:
                gates = gx0[t * B:(t + 1) * B, :] + jnp.dot(
                    h_prev[0].astype(cdt), whh0_ref[...],
                    preferred_element_type=f32)
            else:
                # fused input+recurrent projection: [h_{l-1,t} | h_{l,t-1}] @ Wcat_l
                lhs = jnp.concatenate([h_prev[l - 1], h_prev[l]],
                                      axis=1).astype(cdt)            # (B, 2H)
                gates = jnp.dot(lhs, wcat_ref[l - 1],
                                preferred_element_type=f32) + bias_ref[l]
            h[l], c[l] = cell(gates, c[l])
            if l == L - 1:
                top.append(h[l])

    # -------- attention pooling over time (softmax along T, per batch row) --------
    aw = aw_ref[...]                                                  # (1, H)
    ab = ab_ref[0, 0]
    scores = [jnp.sum(ht * aw, axis=1, keepdims=True) + ab for ht in top]  # T x (B,1)
    m = scores[0]
    for sc in scores[1:]:
        m = jnp.maximum(m, sc)
    exps = [jnp.exp(sc - m) for sc in scores]
    denom = exps[0]
    acc = exps[0] * top[0]
    for e, ht in zip(exps[1:], top[1:]):
        denom = denom + e
        acc = acc + e * ht                                            # lane broadcast
    attended = acc * pl.reciprocal(denom, approx=True)                # (B, H)

    # ------------------------------- final Linear ---------------------------------
    out = jnp.dot(attended.astype(cdt), fw_ref[...],
                  preferred_element_type=f32) + fb_ref[...]
    out_ref[0] = out.astype(out_ref.dtype)                            # lane-dense store


# ------------------------- one-time parameter preparation ---------------------
def prepare_params(params, *, weight_dtype=jnp.bfloat16, lane=128):
    """Permute / transpose / pad / cast weights ONCE (outside the jitted forward)."""
    H = params["lstm"][0]["w_hh"].shape[1]
    L = len(params["lstm"])
    O = params["fc_w"].shape[0]

    def perm(m):
        # PyTorch gate order [i,f,g,o] -> [i,f,o,g]
        return jnp.concatenate([m[:2 * H], m[3 * H:4 * H], m[2 * H:3 * H]], axis=0)

    l0 = params["lstm"][0]
    wih0 = perm(l0["w_ih"]).T.astype(weight_dtype)                    # (D, 4H)
    whh0 = perm(l0["w_hh"]).T.astype(weight_dtype)                    # (H, 4H)
    bias = jnp.stack([perm(lp["b_ih"] + lp["b_hh"]).reshape(1, 4 * H)
                      for lp in params["lstm"]]).astype(jnp.float32)  # (L, 1, 4H)
    if L > 1:
        wcat = jnp.stack(
            [jnp.concatenate([perm(lp["w_ih"]).T, perm(lp["w_hh"]).T], axis=0)
             for lp in params["lstm"][1:]]).astype(weight_dtype)      # (L-1, 2H, 4H)
    else:
        wcat = jnp.zeros((1, 2 * H, 4 * H), weight_dtype)             # unused dummy

    O_pad = ((O + lane - 1) // lane) * lane                           # 218 -> 256
    fw = jnp.zeros((H, O_pad), jnp.float32).at[:, :O].set(
        params["fc_w"].T).astype(weight_dtype)                        # (H, Opad)
    fb = jnp.zeros((1, O_pad), jnp.float32).at[:, :O].set(
        params["fc_b"].reshape(1, O))                                 # (1, Opad)
    aw = params["attn_w"].reshape(1, H).astype(jnp.float32)
    ab = params["attn_b"].reshape(1, 1).astype(jnp.float32)
    return {"wih0": wih0, "whh0": whh0, "bias": bias, "wcat": wcat,
            "aw": aw, "ab": ab, "fw": fw, "fb": fb}


# ---------------------------------- wrapper ------------------------------------
def stacked_lstm_with_attention(prep, x, *, out_size=None, batch_block=None):
    """x: (B, T, D) float32 dense batch. Returns (B, out_size) (or padded if None)."""
    B, T, D = x.shape
    H = prep["whh0"].shape[0]
    L = prep["bias"].shape[0]
    O_pad = prep["fw"].shape[1]
    assert D == prep["wih0"].shape[0]
    assert D == H, ("module stacks identically-declared nn.LSTM layers; "
                    "needs input_size == hidden_size")

    # NOTE (v7x): only split the batch across TensorCores when each block is at
    # least one sublane tile (>= 8 rows); for tiny B the split just duplicates the
    # weight DMA.  Default: single block.
    bb = B if batch_block is None else batch_block
    assert B % bb == 0
    nb = B // bb

    # (B,T,D) -> (nb, T*bb, D): time-major flattened so the hoisted input projection
    # is one contiguous matmul and each timestep is a contiguous group of bb rows.
    x_blocks = (x.reshape(nb, bb, T, D).transpose(0, 2, 1, 3).reshape(nb, T * bb, D))

    kernel = functools.partial(_fused_kernel, T, bb)

    out = pl.pallas_call(
        kernel,
        out_shape=jax.ShapeDtypeStruct((nb, bb, O_pad), jnp.float32),
        grid_spec=pltpu.PrefetchScalarGridSpec(
            num_scalar_prefetch=0,
            grid=(nb,),
            in_specs=[
                pl.BlockSpec((1, T * bb, D), lambda i: (i, 0, 0)),
                pl.BlockSpec((D, 4 * H), lambda i: (0, 0)),
                pl.BlockSpec((H, 4 * H), lambda i: (0, 0)),
                pl.BlockSpec((L, 1, 4 * H), lambda i: (0, 0, 0)),
                pl.BlockSpec(prep["wcat"].shape, lambda i: (0, 0, 0)),
                pl.BlockSpec((1, H), lambda i: (0, 0)),
                pl.BlockSpec((1, 1), lambda i: (0, 0)),
                pl.BlockSpec((H, O_pad), lambda i: (0, 0)),
                pl.BlockSpec((1, O_pad), lambda i: (0, 0)),
            ],
            out_specs=pl.BlockSpec((1, bb, O_pad), lambda i: (i, 0, 0)),
        ),
        compiler_params=pltpu.CompilerParams(
            dimension_semantics=("parallel",),        # batch blocks are independent
        ),
    )(x_blocks, prep["wih0"], prep["whh0"], prep["bias"], prep["wcat"],
      prep["aw"], prep["ab"], prep["fw"], prep["fb"])

    out = out.reshape(B, O_pad)
    if out_size is None:
        return out
    return out[:, :out_size]


# ------------------------------ params / reference ----------------------------
def init_params(key, input_size, hidden_size, output_size, num_layers):
    assert num_layers == 1 or input_size == hidden_size
    scale = 1.0 / float(jnp.sqrt(hidden_size))
    params = {"lstm": []}
    k = key
    for _ in range(num_layers):
        k, k1, k2, k3, k4 = jax.random.split(k, 5)
        params["lstm"].append({
            "w_ih": jax.random.uniform(k1, (4 * hidden_size, input_size), jnp.float32, -scale, scale),
            "w_hh": jax.random.uniform(k2, (4 * hidden_size, hidden_size), jnp.float32, -scale, scale),
            "b_ih": jax.random.uniform(k3, (4 * hidden_size,), jnp.float32, -scale, scale),
            "b_hh": jax.random.uniform(k4, (4 * hidden_size,), jnp.float32, -scale, scale),
        })
    k, ka1, ka2, kf1, kf2 = jax.random.split(k, 5)
    params["attn_w"] = jax.random.uniform(ka1, (1, hidden_size), jnp.float32, -scale, scale)
    params["attn_b"] = jax.random.uniform(ka2, (1,), jnp.float32, -scale, scale)
    params["fc_w"] = jax.random.uniform(kf1, (output_size, hidden_size), jnp.float32, -scale, scale)
    params["fc_b"] = jax.random.uniform(kf2, (output_size,), jnp.float32, -scale, scale)
    return params


def _reference(params, x):
    """Pure-JAX f32 reference with PyTorch nn.LSTM / attention / Linear semantics."""
    B, T, _ = x.shape
    H = params["lstm"][0]["w_hh"].shape[1]
    seq = x
    for lp in params["lstm"]:
        w_ih, w_hh = lp["w_ih"], lp["w_hh"]
        bias = lp["b_ih"] + lp["b_hh"]
        h = jnp.zeros((B, H), jnp.float32)
        c = jnp.zeros((B, H), jnp.float32)
        outs = []
        for t in range(T):
            gates = seq[:, t, :] @ w_ih.T + h @ w_hh.T + bias
            i = jax.nn.sigmoid(gates[:, :H])
            f = jax.nn.sigmoid(gates[:, H:2 * H])
            g = jnp.tanh(gates[:, 2 * H:3 * H])
            o = jax.nn.sigmoid(gates[:, 3 * H:])
            c = f * c + i * g
            h = o * jnp.tanh(c)
            outs.append(h)
        seq = jnp.stack(outs, axis=1)                    # (B, T, H)
    scores = jnp.einsum("bth,h->bt", seq, params["attn_w"][0]) + params["attn_b"][0]
    w = jax.nn.softmax(scores, axis=1)
    attended = jnp.einsum("bt,bth->bh", w, seq)
    return attended @ params["fc_w"].T + params["fc_b"]


# ----------------------------------- main -------------------------------------
if __name__ == "__main__":
    B, T = 2, 8
    INPUT_SIZE = 128      # == HIDDEN_SIZE, required by the stacked identical layers
    HIDDEN_SIZE = 128
    NUM_LAYERS = 2
    OUTPUT_SIZE = 218

    key = jax.random.PRNGKey(0)
    kx, kp = jax.random.split(key)
    x = jax.random.normal(kx, (B, T, INPUT_SIZE), jnp.float32)
    params = init_params(kp, INPUT_SIZE, HIDDEN_SIZE, OUTPUT_SIZE, NUM_LAYERS)

    prep = prepare_params(params)     # one-time weight prep, outside the forward
    fwd = jax.jit(stacked_lstm_with_attention,
                  static_argnames=("out_size", "batch_block"))
    out = fwd(prep, x, out_size=OUTPUT_SIZE)
    out = jax.block_until_ready(out)
    assert out.shape == (B, OUTPUT_SIZE), out.shape
    assert bool(jnp.all(jnp.isfinite(out)))

    ref = _reference(params, x)
    assert bool(jnp.allclose(out, ref, rtol=5e-2, atol=5e-2)), \
        float(jnp.max(jnp.abs(out - ref)))

    print("KERNEL_OK")
</pallas_src>

<mosaic_0001>
module attributes {stable_mosaic.version = 11 : i64} {
  func.func @_fused_kernel(%arg0: i32, %arg1: memref<1x16x128xf32, #tpu.memory_space<vmem>>, %arg2: memref<128x512xbf16, #tpu.memory_space<vmem>>, %arg3: memref<128x512xbf16, #tpu.memory_space<vmem>>, %arg4: memref<2x1x512xf32, #tpu.memory_space<vmem>>, %arg5: memref<1x256x512xbf16, #tpu.memory_space<vmem>>, %arg6: memref<1x128xf32, #tpu.memory_space<vmem>>, %arg7: memref<1x1xf32, #tpu.memory_space<vmem>>, %arg8: memref<128x256xbf16, #tpu.memory_space<vmem>>, %arg9: memref<1x256xf32, #tpu.memory_space<vmem>>, %arg10: memref<1x2x256xf32, #tpu.memory_space<vmem>>) attributes {dimension_semantics = [#tpu.dimension_semantics<parallel>], iteration_bounds = array<i64: 1>, scalar_prefetch = 0 : i64, scratch_operands = 0 : i64, tpu.core_type = #tpu.core_type<tc>, window_params = [{transform_indices = @transform_0, window_bounds = array<i64: 1, 16, 128>}, {pipeline_mode = #tpu.pipeline_mode<synchronous>, transform_indices = @transform_1, window_bounds = array<i64: 128, 512>}, {pipeline_mode = #tpu.pipeline_mode<synchronous>, transform_indices = @transform_2, window_bounds = array<i64: 128, 512>}, {pipeline_mode = #tpu.pipeline_mode<synchronous>, transform_indices = @transform_3, window_bounds = array<i64: 2, 1, 512>}, {pipeline_mode = #tpu.pipeline_mode<synchronous>, transform_indices = @transform_4, window_bounds = array<i64: 1, 256, 512>}, {pipeline_mode = #tpu.pipeline_mode<synchronous>, transform_indices = @transform_5, window_bounds = array<i64: 1, 128>}, {pipeline_mode = #tpu.pipeline_mode<synchronous>, transform_indices = @transform_6, window_bounds = array<i64: 1, 1>}, {pipeline_mode = #tpu.pipeline_mode<synchronous>, transform_indices = @transform_7, window_bounds = array<i64: 128, 256>}, {pipeline_mode = #tpu.pipeline_mode<synchronous>, transform_indices = @transform_8, window_bounds = array<i64: 1, 256>}, {transform_indices = @transform_9, window_bounds = array<i64: 1, 2, 256>}]} {
    %c0 = arith.constant 0 : index
    %c0_0 = arith.constant 0 : index
    %c0_1 = arith.constant 0 : index
    %0 = vector.load %arg1[%c0, %c0_0, %c0_1] : memref<1x16x128xf32, #tpu.memory_space<vmem>>, vector<1x16x128xf32>
    %1 = vector.shape_cast %0 : vector<1x16x128xf32> to vector<16x128xf32>
    %2 = arith.truncf %1 : vector<16x128xf32> to vector<16x128xbf16>
    %c0_2 = arith.constant 0 : index
    %c0_3 = arith.constant 0 : index
    %3 = vector.load %arg2[%c0_2, %c0_3] : memref<128x512xbf16, #tpu.memory_space<vmem>>, vector<128x512xbf16>
    %cst = arith.constant dense<0.000000e+00> : vector<16x512xf32>
    %4 = tpu.matmul %2, %3, %cst {dimension_numbers = #tpu.dot_dimension_numbers<[1], [0], [0], [1], [0, 0, 1, 1], [], []>} : vector<16x128xbf16>, vector<128x512xbf16>, vector<16x512xf32> -> vector<16x512xf32>
    %c0_4 = arith.constant 0 : index
    %c0_5 = arith.constant 0 : index
    %c0_6 = arith.constant 0 : index
    %5 = vector.load %arg4[%c0_4, %c0_5, %c0_6] : memref<2x1x512xf32, #tpu.memory_space<vmem>>, vector<1x1x512xf32>
    %6 = vector.shape_cast %5 : vector<1x1x512xf32> to vector<1x512xf32>
    %7 = vector.broadcast %6 : vector<1x512xf32> to vector<16x512xf32>
    %8 = arith.addf %4, %7 : vector<16x512xf32>
    %cst_7 = arith.constant 0.000000e+00 : f32
    %9 = vector.broadcast %cst_7 : f32 to vector<2x128xf32>
    %10 = vector.extract_strided_slice %8 {offsets = [0, 0], sizes = [2, 512], strides = [1, 1]} : vector<16x512xf32> to vector<2x512xf32>
    %11 = arith.truncf %9 : vector<2x128xf32> to vector<2x128xbf16>
    %c0_8 = arith.constant 0 : index
    %c0_9 = arith.constant 0 : index
    %12 = vector.load %arg3[%c0_8, %c0_9] : memref<128x512xbf16, #tpu.memory_space<vmem>>, vector<128x512xbf16>
    %cst_10 = arith.constant dense<0.000000e+00> : vector<2x512xf32>
    %13 = tpu.matmul %11, %12, %cst_10 {dimension_numbers = #tpu.dot_dimension_numbers<[1], [0], [0], [1], [0, 0, 1, 1], [], []>} : vector<2x128xbf16>, vector<128x512xbf16>, vector<2x512xf32> -> vector<2x512xf32>
    %14 = arith.addf %10, %13 : vector<2x512xf32>
    %15 = vector.extract_strided_slice %14 {offsets = [0, 0], sizes = [2, 384], strides = [1, 1]} : vector<2x512xf32> to vector<2x384xf32>
    %cst_11 = arith.constant 5.000000e-01 : f32
    %16 = vector.broadcast %cst_11 : f32 to vector<2x384xf32>
    %17 = arith.mulf %16, %15 : vector<2x384xf32>
    %18 = math.tanh %17 : vector<2x384xf32>
    %cst_12 = arith.constant 5.000000e-01 : f32
    %19 = vector.broadcast %cst_12 : f32 to vector<2x384xf32>
    %20 = arith.mulf %19, %18 : vector<2x384xf32>
    %cst_13 = arith.constant 5.000000e-01 : f32
    %21 = vector.broadcast %cst_13 : f32 to vector<2x384xf32>
    %22 = arith.addf %20, %21 : vector<2x384xf32>
    %23 = vector.extract_strided_slice %14 {offsets = [0, 384], sizes = [2, 128], strides = [1, 1]} : vector<2x512xf32> to vector<2x128xf32>
    %24 = math.tanh %23 : vector<2x128xf32>
    %25 = vector.extract_strided_slice %22 {offsets = [0, 128], sizes = [2, 128], strides = [1, 1]} : vector<2x384xf32> to vector<2x128xf32>
    %26 = arith.mulf %25, %9 : vector<2x128xf32>
    %27 = vector.extract_strided_slice %22 {offsets = [0, 0], sizes = [2, 128], strides = [1, 1]} : vector<2x384xf32> to vector<2x128xf32>
    %28 = arith.mulf %27, %24 : vector<2x128xf32>
    %29 = arith.addf %26, %28 : vector<2x128xf32>
    %30 = vector.extract_strided_slice %22 {offsets = [0, 256], sizes = [2, 128], strides = [1, 1]} : vector<2x384xf32> to vector<2x128xf32>
    %31 = math.tanh %29 : vector<2x128xf32>
    %32 = arith.mulf %30, %31 : vector<2x128xf32>
    %33 = vector.extract_strided_slice %8 {offsets = [2, 0], sizes = [2, 512], strides = [1, 1]} : vector<16x512xf32> to vector<2x512xf32>
    %34 = arith.truncf %32 : vector<2x128xf32> to vector<2x128xbf16>
    %c0_14 = arith.constant 0 : index
    %c0_15 = arith.constant 0 : index
    %35 = vector.load %arg3[%c0_14, %c0_15] : memref<128x512xbf16, #tpu.memory_space<vmem>>, vector<128x512xbf16>
    %cst_16 = arith.constant dense<0.000000e+00> : vector<2x512xf32>
    %36 = tpu.matmul %34, %35, %cst_16 {dimension_numbers = #tpu.dot_dimension_numbers<[1], [0], [0], [1], [0, 0, 1, 1], [], []>} : vector<2x128xbf16>, vector<128x512xbf16>, vector<2x512xf32> -> vector<2x512xf32>
    %37 = arith.addf %33, %36 : vector<2x512xf32>
    %38 = vector.extract_strided_slice %37 {offsets = [0, 0], sizes = [2, 384], strides = [1, 1]} : vector<2x512xf32> to vector<2x384xf32>
    %cst_17 = arith.constant 5.000000e-01 : f32
    %39 = vector.broadcast %cst_17 : f32 to vector<2x384xf32>
    %40 = arith.mulf %39, %38 : vector<2x384xf32>
    %41 = math.tanh %40 : vector<2x384xf32>
    %cst_18 = arith.constant 5.000000e-01 : f32
    %42 = vector.broadcast %cst_18 : f32 to vector<2x384xf32>
    %43 = arith.mulf %42, %41 : vector<2x384xf32>
    %cst_19 = arith.constant 5.000000e-01 : f32
    %44 = vector.broadcast %cst_19 : f32 to vector<2x384xf32>
    %45 = arith.addf %43, %44 : vector<2x384xf32>
    %46 = vector.extract_strided_slice %37 {offsets = [0, 384], sizes = [2, 128], strides = [1, 1]} : vector<2x512xf32> to vector<2x128xf32>
    %47 = math.tanh %46 : vector<2x128xf32>
    %48 = vector.extract_strided_slice %45 {offsets = [0, 128], sizes = [2, 128], strides = [1, 1]} : vector<2x384xf32> to vector<2x128xf32>
    %49 = arith.mulf %48, %29 : vector<2x128xf32>
    %50 = vector.extract_strided_slice %45 {offsets = [0, 0], sizes = [2, 128], strides = [1, 1]} : vector<2x384xf32> to vector<2x128xf32>
    %51 = arith.mulf %50, %47 : vector<2x128xf32>
    %52 = arith.addf %49, %51 : vector<2x128xf32>
    %53 = vector.extract_strided_slice %45 {offsets = [0, 256], sizes = [2, 128], strides = [1, 1]} : vector<2x384xf32> to vector<2x128xf32>
    %54 = math.tanh %52 : vector<2x128xf32>
    %55 = arith.mulf %53, %54 : vector<2x128xf32>
    %56 = tpu.concatenate %32, %9 in 1 : vector<2x128xf32>, vector<2x128xf32> -> vector<2x256xf32>
    %57 = arith.truncf %56 : vector<2x256xf32> to vector<2x256xbf16>
    %c0_20 = arith.constant 0 : index
    %c0_21 = arith.constant 0 : index
    %c0_22 = arith.constant 0 : index
    %58 = vector.load %arg5[%c0_20, %c0_21, %c0_22] : memref<1x256x512xbf16, #tpu.memory_space<vmem>>, vector<1x256x512xbf16>
    %59 = vector.shape_cast %58 : vector<1x256x512xbf16> to vector<256x512xbf16>
    %cst_23 = arith.constant dense<0.000000e+00> : vector<2x512xf32>
    %60 = tpu.matmul %57, %59, %cst_23 {dimension_numbers = #tpu.dot_dimension_numbers<[1], [0], [0], [1], [0, 0, 1, 1], [], []>} : vector<2x256xbf16>, vector<256x512xbf16>, vector<2x512xf32> -> vector<2x512xf32>
    %c1 = arith.constant 1 : index
    %c0_24 = arith.constant 0 : index
    %c0_25 = arith.constant 0 : index
    %61 = vector.load %arg4[%c1, %c0_24, %c0_25] : memref<2x1x512xf32, #tpu.memory_space<vmem>>, vector<1x1x512xf32>
    %62 = vector.shape_cast %61 : vector<1x1x512xf32> to vector<1x512xf32>
    %63 = vector.broadcast %62 : vector<1x512xf32> to vector<2x512xf32>
    %64 = arith.addf %60, %63 : vector<2x512xf32>
    %65 = vector.extract_strided_slice %64 {offsets = [0, 0], sizes = [2, 384], strides = [1, 1]} : vector<2x512xf32> to vector<2x384xf32>
    %cst_26 = arith.constant 5.000000e-01 : f32
    %66 = vector.broadcast %cst_26 : f32 to vector<2x384xf32>
    %67 = arith.mulf %66, %65 : vector<2x384xf32>
    %68 = math.tanh %67 : vector<2x384xf32>
    %cst_27 = arith.constant 5.000000e-01 : f32
    %69 = vector.broadcast %cst_27 : f32 to vector<2x384xf32>
    %70 = arith.mulf %69, %68 : vector<2x384xf32>
    %cst_28 = arith.constant 5.000000e-01 : f32
    %71 = vector.broadcast %cst_28 : f32 to vector<2x384xf32>
    %72 = arith.addf %70, %71 : vector<2x384xf32>
    %73 = vector.extract_strided_slice %64 {offsets = [0, 384], sizes = [2, 128], strides = [1, 1]} : vector<2x512xf32> to vector<2x128xf32>
    %74 = math.tanh %73 : vector<2x128xf32>
    %75 = vector.extract_strided_slice %72 {offsets = [0, 128], sizes = [2, 128], strides = [1, 1]} : vector<2x384xf32> to vector<2x128xf32>
    %76 = arith.mulf %75, %9 : vector<2x128xf32>
    %77 = vector.extract_strided_slice %72 {offsets = [0, 0], sizes = [2, 128], strides = [1, 1]} : vector<2x384xf32> to vector<2x128xf32>
    %78 = arith.mulf %77, %74 : vector<2x128xf32>
    %79 = arith.addf %76, %78 : vector<2x128xf32>
    %80 = vector.extract_strided_slice %72 {offsets = [0, 256], sizes = [2, 128], strides = [1, 1]} : vector<2x384xf32> to vector<2x128xf32>
    %81 = math.tanh %79 : vector<2x128xf32>
    %82 = arith.mulf %80, %81 : vector<2x128xf32>
    %83 = vector.extract_strided_slice %8 {offsets = [4, 0], sizes = [2, 512], strides = [1, 1]} : vector<16x512xf32> to vector<2x512xf32>
    %84 = arith.truncf %55 : vector<2x128xf32> to vector<2x128xbf16>
    %c0_29 = arith.constant 0 : index
    %c0_30 = arith.constant 0 : index
    %85 = vector.load %arg3[%c0_29, %c0_30] : memref<128x512xbf16, #tpu.memory_space<vmem>>, vector<128x512xbf16>
    %cst_31 = arith.constant dense<0.000000e+00> : vector<2x512xf32>
    %86 = tpu.matmul %84, %85, %cst_31 {dimension_numbers = #tpu.dot_dimension_numbers<[1], [0], [0], [1], [0, 0, 1, 1], [], []>} : vector<2x128xbf16>, vector<128x512xbf16>, vector<2x512xf32> -> vector<2x512xf32>
    %87 = arith.addf %83, %86 : vector<2x512xf32>
    %88 = vector.extract_strided_slice %87 {offsets = [0, 0], sizes = [2, 384], strides = [1, 1]} : vector<2x512xf32> to vector<2x384xf32>
    %cst_32 = arith.constant 5.000000e-01 : f32
    %89 = vector.broadcast %cst_32 : f32 to vector<2x384xf32>
    %90 = arith.mulf %89, %88 : vector<2x384xf32>
    %91 = math.tanh %90 : vector<2x384xf32>
    %cst_33 = arith.constant 5.000000e-01 : f32
    %92 = vector.broadcast %cst_33 : f32 to vector<2x384xf32>
    %93 = arith.mulf %92, %91 : vector<2x384xf32>
    %cst_34 = arith.constant 5.000000e-01 : f32
    %94 = vector.broadcast %cst_34 : f32 to vector<2x384xf32>
    %95 = arith.addf %93, %94 : vector<2x384xf32>
    %96 = vector.extract_strided_slice %87 {offsets = [0, 384], sizes = [2, 128], strides = [1, 1]} : vector<2x512xf32> to vector<2x128xf32>
    %97 = math.tanh %96 : vector<2x128xf32>
    %98 = vector.extract_strided_slice %95 {offsets = [0, 128], sizes = [2, 128], strides = [1, 1]} : vector<2x384xf32> to vector<2x128xf32>
    %99 = arith.mulf %98, %52 : vector<2x128xf32>
    %100 = vector.extract_strided_slice %95 {offsets = [0, 0], sizes = [2, 128], strides = [1, 1]} : vector<2x384xf32> to vector<2x128xf32>
    %101 = arith.mulf %100, %97 : vector<2x128xf32>
    %102 = arith.addf %99, %101 : vector<2x128xf32>
    %103 = vector.extract_strided_slice %95 {offsets = [0, 256], sizes = [2, 128], strides = [1, 1]} : vector<2x384xf32> to vector<2x128xf32>
    %104 = math.tanh %102 : vector<2x128xf32>
    %105 = arith.mulf %103, %104 : vector<2x128xf32>
    %106 = tpu.concatenate %55, %82 in 1 : vector<2x128xf32>, vector<2x128xf32> -> vector<2x256xf32>
    %107 = arith.truncf %106 : vector<2x256xf32> to vector<2x256xbf16>
    %c0_35 = arith.constant 0 : index
    %c0_36 = arith.constant 0 : index
    %c0_37 = arith.constant 0 : index
    %108 = vector.load %arg5[%c0_35, %c0_36, %c0_37] : memref<1x256x512xbf16, #tpu.memory_space<vmem>>, vector<1x256x512xbf16>
    %109 = vector.shape_cast %108 : vector<1x256x512xbf16> to vector<256x512xbf16>
    %cst_38 = arith.constant dense<0.000000e+00> : vector<2x512xf32>
    %110 = tpu.matmul %107, %109, %cst_38 {dimension_numbers = #tpu.dot_dimension_numbers<[1], [0], [0], [1], [0, 0, 1, 1], [], []>} : vector<2x256xbf16>, vector<256x512xbf16>, vector<2x512xf32> -> vector<2x512xf32>
    %c1_39 = arith.constant 1 : index
    %c0_40 = arith.constant 0 : index
    %c0_41 = arith.constant 0 : index
    %111 = vector.load %arg4[%c1_39, %c0_40, %c0_41] : memref<2x1x512xf32, #tpu.memory_space<vmem>>, vector<1x1x512xf32>
    %112 = vector.shape_cast %111 : vector<1x1x512xf32> to vector<1x512xf32>
    %113 = vector.broadcast %112 : vector<1x512xf32> to vector<2x512xf32>
    %114 = arith.addf %110, %113 : vector<2x512xf32>
    %115 = vector.extract_strided_slice %114 {offsets = [0, 0], sizes = [2, 384], strides = [1, 1]} : vector<2x512xf32> to vector<2x384xf32>
    %cst_42 = arith.constant 5.000000e-01 : f32
    %116 = vector.broadcast %cst_42 : f32 to vector<2x384xf32>
    %117 = arith.mulf %116, %115 : vector<2x384xf32>
    %118 = math.tanh %117 : vector<2x384xf32>
    %cst_43 = arith.constant 5.000000e-01 : f32
    %119 = vector.broadcast %cst_43 : f32 to vector<2x384xf32>
    %120 = arith.mulf %119, %118 : vector<2x384xf32>
    %cst_44 = arith.constant 5.000000e-01 : f32
    %121 = vector.broadcast %cst_44 : f32 to vector<2x384xf32>
    %122 = arith.addf %120, %121 : vector<2x384xf32>
    %123 = vector.extract_strided_slice %114 {offsets = [0, 384], sizes = [2, 128], strides = [1, 1]} : vector<2x512xf32> to vector<2x128xf32>
    %124 = math.tanh %123 : vector<2x128xf32>
    %125 = vector.extract_strided_slice %122 {offsets = [0, 128], sizes = [2, 128], strides = [1, 1]} : vector<2x384xf32> to vector<2x128xf32>
    %126 = arith.mulf %125, %79 : vector<2x128xf32>
    %127 = vector.extract_strided_slice %122 {offsets = [0, 0], sizes = [2, 128], strides = [1, 1]} : vector<2x384xf32> to vector<2x128xf32>
    %128 = arith.mulf %127, %124 : vector<2x128xf32>
    %129 = arith.addf %126, %128 : vector<2x128xf32>
    %130 = vector.extract_strided_slice %122 {offsets = [0, 256], sizes = [2, 128], strides = [1, 1]} : vector<2x384xf32> to vector<2x128xf32>
    %131 = math.tanh %129 : vector<2x128xf32>
    %132 = arith.mulf %130, %131 : vector<2x128xf32>
    %133 = vector.extract_strided_slice %8 {offsets = [6, 0], sizes = [2, 512], strides = [1, 1]} : vector<16x512xf32> to vector<2x512xf32>
    %134 = arith.truncf %105 : vector<2x128xf32> to vector<2x128xbf16>
    %c0_45 = arith.constant 0 : index
    %c0_46 = arith.constant 0 : index
    %135 = vector.load %arg3[%c0_45, %c0_46] : memref<128x512xbf16, #tpu.memory_space<vmem>>, vector<128x512xbf16>
    %cst_47 = arith.constant dense<0.000000e+00> : vector<2x512xf32>
    %136 = tpu.matmul %134, %135, %cst_47 {dimension_numbers = #tpu.dot_dimension_numbers<[1], [0], [0], [1], [0, 0, 1, 1], [], []>} : vector<2x128xbf16>, vector<128x512xbf16>, vector<2x512xf32> -> vector<2x512xf32>
    %137 = arith.addf %133, %136 : vector<2x512xf32>
    %138 = vector.extract_strided_slice %137 {offsets = [0, 0], sizes = [2, 384], strides = [1, 1]} : vector<2x512xf32> to vector<2x384xf32>
    %cst_48 = arith.constant 5.000000e-01 : f32
    %139 = vector.broadcast %cst_48 : f32 to vector<2x384xf32>
    %140 = arith.mulf %139, %138 : vector<2x384xf32>
    %141 = math.tanh %140 : vector<2x384xf32>
    %cst_49 = arith.constant 5.000000e-01 : f32
    %142 = vector.broadcast %cst_49 : f32 to vector<2x384xf32>
    %143 = arith.mulf %142, %141 : vector<2x384xf32>
    %cst_50 = arith.constant 5.000000e-01 : f32
    %144 = vector.broadcast %cst_50 : f32 to vector<2x384xf32>
    %145 = arith.addf %143, %144 : vector<2x384xf32>
    %146 = vector.extract_strided_slice %137 {offsets = [0, 384], sizes = [2, 128], strides = [1, 1]} : vector<2x512xf32> to vector<2x128xf32>
    %147 = math.tanh %146 : vector<2x128xf32>
    %148 = vector.extract_strided_slice %145 {offsets = [0, 128], sizes = [2, 128], strides = [1, 1]} : vector<2x384xf32> to vector<2x128xf32>
    %149 = arith.mulf %148, %102 : vector<2x128xf32>
    %150 = vector.extract_strided_slice %145 {offsets = [0, 0], sizes = [2, 128], strides = [1, 1]} : vector<2x384xf32> to vector<2x128xf32>
    %151 = arith.mulf %150, %147 : vector<2x128xf32>
    %152 = arith.addf %149, %151 : vector<2x128xf32>
    %153 = vector.extract_strided_slice %145 {offsets = [0, 256], sizes = [2, 128], strides = [1, 1]} : vector<2x384xf32> to vector<2x128xf32>
    %154 = math.tanh %152 : vector<2x128xf32>
    %155 = arith.mulf %153, %154 : vector<2x128xf32>
    %156 = tpu.concatenate %105, %132 in 1 : vector<2x128xf32>, vector<2x128xf32> -> vector<2x256xf32>
    %157 = arith.truncf %156 : vector<2x256xf32> to vector<2x256xbf16>
    %c0_51 = arith.constant 0 : index
    %c0_52 = arith.constant 0 : index
    %c0_53 = arith.constant 0 : index
    %158 = vector.load %arg5[%c0_51, %c0_52, %c0_53] : memref<1x256x512xbf16, #tpu.memory_space<vmem>>, vector<1x256x512xbf16>
    %159 = vector.shape_cast %158 : vector<1x256x512xbf16> to vector<256x512xbf16>
    %cst_54 = arith.constant dense<0.000000e+00> : vector<2x512xf32>
    %160 = tpu.matmul %157, %159, %cst_54 {dimension_numbers = #tpu.dot_dimension_numbers<[1], [0], [0], [1], [0, 0, 1, 1], [], []>} : vector<2x256xbf16>, vector<256x512xbf16>, vector<2x512xf32> -> vector<2x512xf32>
    %c1_55 = arith.constant 1 : index
    %c0_56 = arith.constant 0 : index
    %c0_57 = arith.constant 0 : index
    %161 = vector.load %arg4[%c1_55, %c0_56, %c0_57] : memref<2x1x512xf32, #tpu.memory_space<vmem>>, vector<1x1x512xf32>
    %162 = vector.shape_cast %161 : vector<1x1x512xf32> to vector<1x512xf32>
    %163 = vector.broadcast %162 : vector<1x512xf32> to vector<2x512xf32>
    %164 = arith.addf %160, %163 : vector<2x512xf32>
    %165 = vector.extract_strided_slice %164 {offsets = [0, 0], sizes = [2, 384], strides = [1, 1]} : vector<2x512xf32> to vector<2x384xf32>
    %cst_58 = arith.constant 5.000000e-01 : f32
    %166 = vector.broadcast %cst_58 : f32 to vector<2x384xf32>
    %167 = arith.mulf %166, %165 : vector<2x384xf32>
    %168 = math.tanh %167 : vector<2x384xf32>
    %cst_59 = arith.constant 5.000000e-01 : f32
    %169 = vector.broadcast %cst_59 : f32 to vector<2x384xf32>
    %170 = arith.mulf %169, %168 : vector<2x384xf32>
    %cst_60 = arith.constant 5.000000e-01 : f32
    %171 = vector.broadcast %cst_60 : f32 to vector<2x384xf32>
    %172 = arith.addf %170, %171 : vector<2x384xf32>
    %173 = vector.extract_strided_slice %164 {offsets = [0, 384], sizes = [2, 128], strides = [1, 1]} : vector<2x512xf32> to vector<2x128xf32>
    %174 = math.tanh %173 : vector<2x128xf32>
    %175 = vector.extract_strided_slice %172 {offsets = [0, 128], sizes = [2, 128], strides = [1, 1]} : vector<2x384xf32> to vector<2x128xf32>
    %176 = arith.mulf %175, %129 : vector<2x128xf32>
    %177 = vector.extract_strided_slice %172 {offsets = [0, 0], sizes = [2, 128], strides = [1, 1]} : vector<2x384xf32> to vector<2x128xf32>
    %178 = arith.mulf %177, %174 : vector<2x128xf32>
    %179 = arith.addf %176, %178 : vector<2x128xf32>
    %180 = vector.extract_strided_slice %172 {offsets = [0, 256], sizes = [2, 128], strides = [1, 1]} : vector<2x384xf32> to vector<2x128xf32>
    %181 = math.tanh %179 : vector<2x128xf32>
    %182 = arith.mulf %180, %181 : vector<2x128xf32>
    %183 = vector.extract_strided_slice %8 {offsets = [8, 0], sizes = [2, 512], strides = [1, 1]} : vector<16x512xf32> to vector<2x512xf32>
    %184 = arith.truncf %155 : vector<2x128xf32> to vector<2x128xbf16>
    %c0_61 = arith.constant 0 : index
    %c0_62 = arith.constant 0 : index
    %185 = vector.load %arg3[%c0_61, %c0_62] : memref<128x512xbf16, #tpu.memory_space<vmem>>, vector<128x512xbf16>
    %cst_63 = arith.constant dense<0.000000e+00> : vector<2x512xf32>
    %186 = tpu.matmul %184, %185, %cst_63 {dimension_numbers = #tpu.dot_dimension_numbers<[1], [0], [0], [1], [0, 0, 1, 1], [], []>} : vector<2x128xbf16>, vector<128x512xbf16>, vector<2x512xf32> -> vector<2x512xf32>
    %187 = arith.addf %183, %186 : vector<2x512xf32>
    %188 = vector.extract_strided_slice %187 {offsets = [0, 0], sizes = [2, 384], strides = [1, 1]} : vector<2x512xf32> to vector<2x384xf32>
    %cst_64 = arith.constant 5.000000e-01 : f32
    %189 = vector.broadcast %cst_64 : f32 to vector<2x384xf32>
    %190 = arith.mulf %189, %188 : vector<2x384xf32>
    %191 = math.tanh %190 : vector<2x384xf32>
    %cst_65 = arith.constant 5.000000e-01 : f32
    %192 = vector.broadcast %cst_65 : f32 to vector<2x384xf32>
    %193 = arith.mulf %192, %191 : vector<2x384xf32>
    %cst_66 = arith.constant 5.000000e-01 : f32
    %194 = vector.broadcast %cst_66 : f32 to vector<2x384xf32>
    %195 = arith.addf %193, %194 : vector<2x384xf32>
    %196 = vector.extract_strided_slice %187 {offsets = [0, 384], sizes = [2, 128], strides = [1, 1]} : vector<2x512xf32> to vector<2x128xf32>
    %197 = math.tanh %196 : vector<2x128xf32>
    %198 = vector.extract_strided_slice %195 {offsets = [0, 128], sizes = [2, 128], strides = [1, 1]} : vector<2x384xf32> to vector<2x128xf32>
    %199 = arith.mulf %198, %152 : vector<2x128xf32>
    %200 = vector.extract_strided_slice %195 {offsets = [0, 0], sizes = [2, 128], strides = [1, 1]} : vector<2x384xf32> to vector<2x128xf32>
    %201 = arith.mulf %200, %197 : vector<2x128xf32>
    %202 = arith.addf %199, %201 : vector<2x128xf32>
    %203 = vector.extract_strided_slice %195 {offsets = [0, 256], sizes = [2, 128], strides = [1, 1]} : vector<2x384xf32> to vector<2x128xf32>
    %204 = math.tanh %202 : vector<2x128xf32>
    %205 = arith.mulf %203, %204 : vector<2x128xf32>
    %206 = tpu.concatenate %155, %182 in 1 : vector<2x128xf32>, vector<2x128xf32> -> vector<2x256xf32>
    %207 = arith.truncf %206 : vector<2x256xf32> to vector<2x256xbf16>
    %c0_67 = arith.constant 0 : index
    %c0_68 = arith.constant 0 : index
    %c0_69 = arith.constant 0 : index
    %208 = vector.load %arg5[%c0_67, %c0_68, %c0_69] : memref<1x256x512xbf16, #tpu.memory_space<vmem>>, vector<1x256x512xbf16>
    %209 = vector.shape_cast %208 : vector<1x256x512xbf16> to vector<256x512xbf16>
    %cst_70 = arith.constant dense<0.000000e+00> : vector<2x512xf32>
    %210 = tpu.matmul %207, %209, %cst_70 {dimension_numbers = #tpu.dot_dimension_numbers<[1], [0], [0], [1], [0, 0, 1, 1], [], []>} : vector<2x256xbf16>, vector<256x512xbf16>, vector<2x512xf32> -> vector<2x512xf32>
    %c1_71 = arith.constant 1 : index
    %c0_72 = arith.constant 0 : index
    %c0_73 = arith.constant 0 : index
    %211 = vector.load %arg4[%c1_71, %c0_72, %c0_73] : memref<2x1x512xf32, #tpu.memory_space<vmem>>, vector<1x1x512xf32>
    %212 = vector.shape_cast %211 : vector<1x1x512xf32> to vector<1x512xf32>
    %213 = vector.broadcast %212 : vector<1x512xf32> to vector<2x512xf32>
    %214 = arith.addf %210, %213 : vector<2x512xf32>
    %215 = vector.extract_strided_slice %214 {offsets = [0, 0], sizes = [2, 384], strides = [1, 1]} : vector<2x512xf32> to vector<2x384xf32>
    %cst_74 = arith.constant 5.000000e-01 : f32
    %216 = vector.broadcast %cst_74 : f32 to vector<2x384xf32>
    %217 = arith.mulf %216, %215 : vector<2x384xf32>
    %218 = math.tanh %217 : vector<2x384xf32>
    %cst_75 = arith.constant 5.000000e-01 : f32
    %219 = vector.broadcast %cst_75 : f32 to vector<2x384xf32>
    %220 = arith.mulf %219, %218 : vector<2x384xf32>
    %cst_76 = arith.constant 5.000000e-01 : f32
    %221 = vector.broadcast %cst_76 : f32 to vector<2x384xf32>
    %222 = arith.addf %220, %221 : vector<2x384xf32>
    %223 = vector.extract_strided_slice %214 {offsets = [0, 384], sizes = [2, 128], strides = [1, 1]} : vector<2x512xf32> to vector<2x128xf32>
    %224 = math.tanh %223 : vector<2x128xf32>
    %225 = vector.extract_strided_slice %222 {offsets = [0, 128], sizes = [2, 128], strides = [1, 1]} : vector<2x384xf32> to vector<2x128xf32>
    %226 = arith.mulf %225, %179 : vector<2x128xf32>
    %227 = vector.extract_strided_slice %222 {offsets = [0, 0], sizes = [2, 128], strides = [1, 1]} : vector<2x384xf32> to vector<2x128xf32>
    %228 = arith.mulf %227, %224 : vector<2x128xf32>
    %229 = arith.addf %226, %228 : vector<2x128xf32>
    %230 = vector.extract_strided_slice %222 {offsets = [0, 256], sizes = [2, 128], strides = [1, 1]} : vector<2x384xf32> to vector<2x128xf32>
    %231 = math.tanh %229 : vector<2x128xf32>
    %232 = arith.mulf %230, %231 : vector<2x128xf32>
    %233 = vector.extract_strided_slice %8 {offsets = [10, 0], sizes = [2, 512], strides = [1, 1]} : vector<16x512xf32> to vector<2x512xf32>
    %234 = arith.truncf %205 : vector<2x128xf32> to vector<2x128xbf16>
    %c0_77 = arith.constant 0 : index
    %c0_78 = arith.constant 0 : index
    %235 = vector.load %arg3[%c0_77, %c0_78] : memref<128x512xbf16, #tpu.memory_space<vmem>>, vector<128x512xbf16>
    %cst_79 = arith.constant dense<0.000000e+00> : vector<2x512xf32>
    %236 = tpu.matmul %234, %235, %cst_79 {dimension_numbers = #tpu.dot_dimension_numbers<[1], [0], [0], [1], [0, 0, 1, 1], [], []>} : vector<2x128xbf16>, vector<128x512xbf16>, vector<2x512xf32> -> vector<2x512xf32>
    %237 = arith.addf %233, %236 : vector<2x512xf32>
    %238 = vector.extract_strided_slice %237 {offsets = [0, 0], sizes = [2, 384], strides = [1, 1]} : vector<2x512xf32> to vector<2x384xf32>
    %cst_80 = arith.constant 5.000000e-01 : f32
    %239 = vector.broadcast %cst_80 : f32 to vector<2x384xf32>
    %240 = arith.mulf %239, %238 : vector<2x384xf32>
    %241 = math.tanh %240 : vector<2x384xf32>
    %cst_81 = arith.constant 5.000000e-01 : f32
    %242 = vector.broadcast %cst_81 : f32 to vector<2x384xf32>
    %243 = arith.mulf %242, %241 : vector<2x384xf32>
    %cst_82 = arith.constant 5.000000e-01 : f32
    %244 = vector.broadcast %cst_82 : f32 to vector<2x384xf32>
    %245 = arith.addf %243, %244 : vector<2x384xf32>
    %246 = vector.extract_strided_slice %237 {offsets = [0, 384], sizes = [2, 128], strides = [1, 1]} : vector<2x512xf32> to vector<2x128xf32>
    %247 = math.tanh %246 : vector<2x128xf32>
    %248 = vector.extract_strided_slice %245 {offsets = [0, 128], sizes = [2, 128], strides = [1, 1]} : vector<2x384xf32> to vector<2x128xf32>
    %249 = arith.mulf %248, %202 : vector<2x128xf32>
    %250 = vector.extract_strided_slice %245 {offsets = [0, 0], sizes = [2, 128], strides = [1, 1]} : vector<2x384xf32> to vector<2x128xf32>
    %251 = arith.mulf %250, %247 : vector<2x128xf32>
    %252 = arith.addf %249, %251 : vector<2x128xf32>
    %253 = vector.extract_strided_slice %245 {offsets = [0, 256], sizes = [2, 128], strides = [1, 1]} : vector<2x384xf32> to vector<2x128xf32>
    %254 = math.tanh %252 : vector<2x128xf32>
    %255 = arith.mulf %253, %254 : vector<2x128xf32>
    %256 = tpu.concatenate %205, %232 in 1 : vector<2x128xf32>, vector<2x128xf32> -> vector<2x256xf32>
    %257 = arith.truncf %256 : vector<2x256xf32> to vector<2x256xbf16>
    %c0_83 = arith.constant 0 : index
    %c0_84 = arith.constant 0 : index
    %c0_85 = arith.constant 0 : index
    %258 = vector.load %arg5[%c0_83, %c0_84, %c0_85] : memref<1x256x512xbf16, #tpu.memory_space<vmem>>, vector<1x256x512xbf16>
    %259 = vector.shape_cast %258 : vector<1x256x512xbf16> to vector<256x512xbf16>
    %cst_86 = arith.constant dense<0.000000e+00> : vector<2x512xf32>
    %260 = tpu.matmul %257, %259, %cst_86 {dimension_numbers = #tpu.dot_dimension_numbers<[1], [0], [0], [1], [0, 0, 1, 1], [], []>} : vector<2x256xbf16>, vector<256x512xbf16>, vector<2x512xf32> -> vector<2x512xf32>
    %c1_87 = arith.constant 1 : index
    %c0_88 = arith.constant 0 : index
    %c0_89 = arith.constant 0 : index
    %261 = vector.load %arg4[%c1_87, %c0_88, %c0_89] : memref<2x1x512xf32, #tpu.memory_space<vmem>>, vector<1x1x512xf32>
    %262 = vector.shape_cast %261 : vector<1x1x512xf32> to vector<1x512xf32>
    %263 = vector.broadcast %262 : vector<1x512xf32> to vector<2x512xf32>
    %264 = arith.addf %260, %263 : vector<2x512xf32>
    %265 = vector.extract_strided_slice %264 {offsets = [0, 0], sizes = [2, 384], strides = [1, 1]} : vector<2x512xf32> to vector<2x384xf32>
    %cst_90 = arith.constant 5.000000e-01 : f32
    %266 = vector.broadcast %cst_90 : f32 to vector<2x384xf32>
    %267 = arith.mulf %266, %265 : vector<2x384xf32>
    %268 = math.tanh %267 : vector<2x384xf32>
    %cst_91 = arith.constant 5.000000e-01 : f32
    %269 = vector.broadcast %cst_91 : f32 to vector<2x384xf32>
    %270 = arith.mulf %269, %268 : vector<2x384xf32>
    %cst_92 = arith.constant 5.000000e-01 : f32
    %271 = vector.broadcast %cst_92 : f32 to vector<2x384xf32>
    %272 = arith.addf %270, %271 : vector<2x384xf32>
    %273 = vector.extract_strided_slice %264 {offsets = [0, 384], sizes = [2, 128], strides = [1, 1]} : vector<2x512xf32> to vector<2x128xf32>
    %274 = math.tanh %273 : vector<2x128xf32>
    %275 = vector.extract_strided_slice %272 {offsets = [0, 128], sizes = [2, 128], strides = [1, 1]} : vector<2x384xf32> to vector<2x128xf32>
    %276 = arith.mulf %275, %229 : vector<2x128xf32>
    %277 = vector.extract_strided_slice %272 {offsets = [0, 0], sizes = [2, 128], strides = [1, 1]} : vector<2x384xf32> to vector<2x128xf32>
    %278 = arith.mulf %277, %274 : vector<2x128xf32>
    %279 = arith.addf %276, %278 : vector<2x128xf32>
    %280 = vector.extract_strided_slice %272 {offsets = [0, 256], sizes = [2, 128], strides = [1, 1]} : vector<2x384xf32> to vector<2x128xf32>
    %281 = math.tanh %279 : vector<2x128xf32>
    %282 = arith.mulf %280, %281 : vector<2x128xf32>
    %283 = vector.extract_strided_slice %8 {offsets = [12, 0], sizes = [2, 512], strides = [1, 1]} : vector<16x512xf32> to vector<2x512xf32>
    %284 = arith.truncf %255 : vector<2x128xf32> to vector<2x128xbf16>
    %c0_93 = arith.constant 0 : index
    %c0_94 = arith.constant 0 : index
    %285 = vector.load %arg3[%c0_93, %c0_94] : memref<128x512xbf16, #tpu.memory_space<vmem>>, vector<128x512xbf16>
    %cst_95 = arith.constant dense<0.000000e+00> : vector<2x512xf32>
    %286 = tpu.matmul %284, %285, %cst_95 {dimension_numbers = #tpu.dot_dimension_numbers<[1], [0], [0], [1], [0, 0, 1, 1], [], []>} : vector<2x128xbf16>, vector<128x512xbf16>, vector<2x512xf32> -> vector<2x512xf32>
    %287 = arith.addf %283, %286 : vector<2x512xf32>
    %288 = vector.extract_strided_slice %287 {offsets = [0, 0], sizes = [2, 384], strides = [1, 1]} : vector<2x512xf32> to vector<2x384xf32>
    %cst_96 = arith.constant 5.000000e-01 : f32
    %289 = vector.broadcast %cst_96 : f32 to vector<2x384xf32>
    %290 = arith.mulf %289, %288 : vector<2x384xf32>
    %291 = math.tanh %290 : vector<2x384xf32>
    %cst_97 = arith.constant 5.000000e-01 : f32
    %292 = vector.broadcast %cst_97 : f32 to vector<2x384xf32>
    %293 = arith.mulf %292, %291 : vector<2x384xf32>
    %cst_98 = arith.constant 5.000000e-01 : f32
    %294 = vector.broadcast %cst_98 : f32 to vector<2x384xf32>
    %295 = arith.addf %293, %294 : vector<2x384xf32>
    %296 = vector.extract_strided_slice %287 {offsets = [0, 384], sizes = [2, 128], strides = [1, 1]} : vector<2x512xf32> to vector<2x128xf32>
    %297 = math.tanh %296 : vector<2x128xf32>
    %298 = vector.extract_strided_slice %295 {offsets = [0, 128], sizes = [2, 128], strides = [1, 1]} : vector<2x384xf32> to vector<2x128xf32>
    %299 = arith.mulf %298, %252 : vector<2x128xf32>
    %300 = vector.extract_strided_slice %295 {offsets = [0, 0], sizes = [2, 128], strides = [1, 1]} : vector<2x384xf32> to vector<2x128xf32>
    %301 = arith.mulf %300, %297 : vector<2x128xf32>
    %302 = arith.addf %299, %301 : vector<2x128xf32>
    %303 = vector.extract_strided_slice %295 {offsets = [0, 256], sizes = [2, 128], strides = [1, 1]} : vector<2x384xf32> to vector<2x128xf32>
    %304 = math.tanh %302 : vector<2x128xf32>
    %305 = arith.mulf %303, %304 : vector<2x128xf32>
    %306 = tpu.concatenate %255, %282 in 1 : vector<2x128xf32>, vector<2x128xf32> -> vector<2x256xf32>
    %307 = arith.truncf %306 : vector<2x256xf32> to vector<2x256xbf16>
    %c0_99 = arith.constant 0 : index
    %c0_100 = arith.constant 0 : index
    %c0_101 = arith.constant 0 : index
    %308 = vector.load %arg5[%c0_99, %c0_100, %c0_101] : memref<1x256x512xbf16, #tpu.memory_space<vmem>>, vector<1x256x512xbf16>
    %309 = vector.shape_cast %308 : vector<1x256x512xbf16> to vector<256x512xbf16>
    %cst_102 = arith.constant dense<0.000000e+00> : vector<2x512xf32>
    %310 = tpu.matmul %307, %309, %cst_102 {dimension_numbers = #tpu.dot_dimension_numbers<[1], [0], [0], [1], [0, 0, 1, 1], [], []>} : vector<2x256xbf16>, vector<256x512xbf16>, vector<2x512xf32> -> vector<2x512xf32>
    %c1_103 = arith.constant 1 : index
    %c0_104 = arith.constant 0 : index
    %c0_105 = arith.constant 0 : index
    %311 = vector.load %arg4[%c1_103, %c0_104, %c0_105] : memref<2x1x512xf32, #tpu.memory_space<vmem>>, vector<1x1x512xf32>
    %312 = vector.shape_cast %311 : vector<1x1x512xf32> to vector<1x512xf32>
    %313 = vector.broadcast %312 : vector<1x512xf32> to vector<2x512xf32>
    %314 = arith.addf %310, %313 : vector<2x512xf32>
    %315 = vector.extract_strided_slice %314 {offsets = [0, 0], sizes = [2, 384], strides = [1, 1]} : vector<2x512xf32> to vector<2x384xf32>
    %cst_106 = arith.constant 5.000000e-01 : f32
    %316 = vector.broadcast %cst_106 : f32 to vector<2x384xf32>
    %317 = arith.mulf %316, %315 : vector<2x384xf32>
    %318 = math.tanh %317 : vector<2x384xf32>
    %cst_107 = arith.constant 5.000000e-01 : f32
    %319 = vector.broadcast %cst_107 : f32 to vector<2x384xf32>
    %320 = arith.mulf %319, %318 : vector<2x384xf32>
    %cst_108 = arith.constant 5.000000e-01 : f32
    %321 = vector.broadcast %cst_108 : f32 to vector<2x384xf32>
    %322 = arith.addf %320, %321 : vector<2x384xf32>
    %323 = vector.extract_strided_slice %314 {offsets = [0, 384], sizes = [2, 128], strides = [1, 1]} : vector<2x512xf32> to vector<2x128xf32>
    %324 = math.tanh %323 : vector<2x128xf32>
    %325 = vector.extract_strided_slice %322 {offsets = [0, 128], sizes = [2, 128], strides = [1, 1]} : vector<2x384xf32> to vector<2x128xf32>
    %326 = arith.mulf %325, %279 : vector<2x128xf32>
    %327 = vector.extract_strided_slice %322 {offsets = [0, 0], sizes = [2, 128], strides = [1, 1]} : vector<2x384xf32> to vector<2x128xf32>
    %328 = arith.mulf %327, %324 : vector<2x128xf32>
    %329 = arith.addf %326, %328 : vector<2x128xf32>
    %330 = vector.extract_strided_slice %322 {offsets = [0, 256], sizes = [2, 128], strides = [1, 1]} : vector<2x384xf32> to vector<2x128xf32>
    %331 = math.tanh %329 : vector<2x128xf32>
    %332 = arith.mulf %330, %331 : vector<2x128xf32>
    %333 = vector.extract_strided_slice %8 {offsets = [14, 0], sizes = [2, 512], strides = [1, 1]} : vector<16x512xf32> to vector<2x512xf32>
    %334 = arith.truncf %305 : vector<2x128xf32> to vector<2x128xbf16>
    %c0_109 = arith.constant 0 : index
    %c0_110 = arith.constant 0 : index
    %335 = vector.load %arg3[%c0_109, %c0_110] : memref<128x512xbf16, #tpu.memory_space<vmem>>, vector<128x512xbf16>
    %cst_111 = arith.constant dense<0.000000e+00> : vector<2x512xf32>
    %336 = tpu.matmul %334, %335, %cst_111 {dimension_numbers = #tpu.dot_dimension_numbers<[1], [0], [0], [1], [0, 0, 1, 1], [], []>} : vector<2x128xbf16>, vector<128x512xbf16>, vector<2x512xf32> -> vector<2x512xf32>
    %337 = arith.addf %333, %336 : vector<2x512xf32>
    %338 = vector.extract_strided_slice %337 {offsets = [0, 0], sizes = [2, 384], strides = [1, 1]} : vector<2x512xf32> to vector<2x384xf32>
    %cst_112 = arith.constant 5.000000e-01 : f32
    %339 = vector.broadcast %cst_112 : f32 to vector<2x384xf32>
    %340 = arith.mulf %339, %338 : vector<2x384xf32>
    %341 = math.tanh %340 : vector<2x384xf32>
    %cst_113 = arith.constant 5.000000e-01 : f32
    %342 = vector.broadcast %cst_113 : f32 to vector<2x384xf32>
    %343 = arith.mulf %342, %341 : vector<2x384xf32>
    %cst_114 = arith.constant 5.000000e-01 : f32
    %344 = vector.broadcast %cst_114 : f32 to vector<2x384xf32>
    %345 = arith.addf %343, %344 : vector<2x384xf32>
    %346 = vector.extract_strided_slice %337 {offsets = [0, 384], sizes = [2, 128], strides = [1, 1]} : vector<2x512xf32> to vector<2x128xf32>
    %347 = math.tanh %346 : vector<2x128xf32>
    %348 = vector.extract_strided_slice %345 {offsets = [0, 128], sizes = [2, 128], strides = [1, 1]} : vector<2x384xf32> to vector<2x128xf32>
    %349 = arith.mulf %348, %302 : vector<2x128xf32>
    %350 = vector.extract_strided_slice %345 {offsets = [0, 0], sizes = [2, 128], strides = [1, 1]} : vector<2x384xf32> to vector<2x128xf32>
    %351 = arith.mulf %350, %347 : vector<2x128xf32>
    %352 = arith.addf %349, %351 : vector<2x128xf32>
    %353 = vector.extract_strided_slice %345 {offsets = [0, 256], sizes = [2, 128], strides = [1, 1]} : vector<2x384xf32> to vector<2x128xf32>
    %354 = math.tanh %352 : vector<2x128xf32>
    %355 = arith.mulf %353, %354 : vector<2x128xf32>
    %356 = tpu.concatenate %305, %332 in 1 : vector<2x128xf32>, vector<2x128xf32> -> vector<2x256xf32>
    %357 = arith.truncf %356 : vector<2x256xf32> to vector<2x256xbf16>
    %c0_115 = arith.constant 0 : index
    %c0_116 = arith.constant 0 : index
    %c0_117 = arith.constant 0 : index
    %358 = vector.load %arg5[%c0_115, %c0_116, %c0_117] : memref<1x256x512xbf16, #tpu.memory_space<vmem>>, vector<1x256x512xbf16>
    %359 = vector.shape_cast %358 : vector<1x256x512xbf16> to vector<256x512xbf16>
    %cst_118 = arith.constant dense<0.000000e+00> : vector<2x512xf32>
    %360 = tpu.matmul %357, %359, %cst_118 {dimension_numbers = #tpu.dot_dimension_numbers<[1], [0], [0], [1], [0, 0, 1, 1], [], []>} : vector<2x256xbf16>, vector<256x512xbf16>, vector<2x512xf32> -> vector<2x512xf32>
    %c1_119 = arith.constant 1 : index
    %c0_120 = arith.constant 0 : index
    %c0_121 = arith.constant 0 : index
    %361 = vector.load %arg4[%c1_119, %c0_120, %c0_121] : memref<2x1x512xf32, #tpu.memory_space<vmem>>, vector<1x1x512xf32>
    %362 = vector.shape_cast %361 : vector<1x1x512xf32> to vector<1x512xf32>
    %363 = vector.broadcast %362 : vector<1x512xf32> to vector<2x512xf32>
    %364 = arith.addf %360, %363 : vector<2x512xf32>
    %365 = vector.extract_strided_slice %364 {offsets = [0, 0], sizes = [2, 384], strides = [1, 1]} : vector<2x512xf32> to vector<2x384xf32>
    %cst_122 = arith.constant 5.000000e-01 : f32
    %366 = vector.broadcast %cst_122 : f32 to vector<2x384xf32>
    %367 = arith.mulf %366, %365 : vector<2x384xf32>
    %368 = math.tanh %367 : vector<2x384xf32>
    %cst_123 = arith.constant 5.000000e-01 : f32
    %369 = vector.broadcast %cst_123 : f32 to vector<2x384xf32>
    %370 = arith.mulf %369, %368 : vector<2x384xf32>
    %cst_124 = arith.constant 5.000000e-01 : f32
    %371 = vector.broadcast %cst_124 : f32 to vector<2x384xf32>
    %372 = arith.addf %370, %371 : vector<2x384xf32>
    %373 = vector.extract_strided_slice %364 {offsets = [0, 384], sizes = [2, 128], strides = [1, 1]} : vector<2x512xf32> to vector<2x128xf32>
    %374 = math.tanh %373 : vector<2x128xf32>
    %375 = vector.extract_strided_slice %372 {offsets = [0, 128], sizes = [2, 128], strides = [1, 1]} : vector<2x384xf32> to vector<2x128xf32>
    %376 = arith.mulf %375, %329 : vector<2x128xf32>
    %377 = vector.extract_strided_slice %372 {offsets = [0, 0], sizes = [2, 128], strides = [1, 1]} : vector<2x384xf32> to vector<2x128xf32>
    %378 = arith.mulf %377, %374 : vector<2x128xf32>
    %379 = arith.addf %376, %378 : vector<2x128xf32>
    %380 = vector.extract_strided_slice %372 {offsets = [0, 256], sizes = [2, 128], strides = [1, 1]} : vector<2x384xf32> to vector<2x128xf32>
    %381 = math.tanh %379 : vector<2x128xf32>
    %382 = arith.mulf %380, %381 : vector<2x128xf32>
    %383 = tpu.concatenate %355, %382 in 1 : vector<2x128xf32>, vector<2x128xf32> -> vector<2x256xf32>
    %384 = arith.truncf %383 : vector<2x256xf32> to vector<2x256xbf16>
    %c0_125 = arith.constant 0 : index
    %c0_126 = arith.constant 0 : index
    %c0_127 = arith.constant 0 : index
    %385 = vector.load %arg5[%c0_125, %c0_126, %c0_127] : memref<1x256x512xbf16, #tpu.memory_space<vmem>>, vector<1x256x512xbf16>
    %386 = vector.shape_cast %385 : vector<1x256x512xbf16> to vector<256x512xbf16>
    %cst_128 = arith.constant dense<0.000000e+00> : vector<2x512xf32>
    %387 = tpu.matmul %384, %386, %cst_128 {dimension_numbers = #tpu.dot_dimension_numbers<[1], [0], [0], [1], [0, 0, 1, 1], [], []>} : vector<2x256xbf16>, vector<256x512xbf16>, vector<2x512xf32> -> vector<2x512xf32>
    %c1_129 = arith.constant 1 : index
    %c0_130 = arith.constant 0 : index
    %c0_131 = arith.constant 0 : index
    %388 = vector.load %arg4[%c1_129, %c0_130, %c0_131] : memref<2x1x512xf32, #tpu.memory_space<vmem>>, vector<1x1x512xf32>
    %389 = vector.shape_cast %388 : vector<1x1x512xf32> to vector<1x512xf32>
    %390 = vector.broadcast %389 : vector<1x512xf32> to vector<2x512xf32>
    %391 = arith.addf %387, %390 : vector<2x512xf32>
    %392 = vector.extract_strided_slice %391 {offsets = [0, 0], sizes = [2, 384], strides = [1, 1]} : vector<2x512xf32> to vector<2x384xf32>
    %cst_132 = arith.constant 5.000000e-01 : f32
    %393 = vector.broadcast %cst_132 : f32 to vector<2x384xf32>
    %394 = arith.mulf %393, %392 : vector<2x384xf32>
    %395 = math.tanh %394 : vector<2x384xf32>
    %cst_133 = arith.constant 5.000000e-01 : f32
    %396 = vector.broadcast %cst_133 : f32 to vector<2x384xf32>
    %397 = arith.mulf %396, %395 : vector<2x384xf32>
    %cst_134 = arith.constant 5.000000e-01 : f32
    %398 = vector.broadcast %cst_134 : f32 to vector<2x384xf32>
    %399 = arith.addf %397, %398 : vector<2x384xf32>
    %400 = vector.extract_strided_slice %391 {offsets = [0, 384], sizes = [2, 128], strides = [1, 1]} : vector<2x512xf32> to vector<2x128xf32>
    %401 = math.tanh %400 : vector<2x128xf32>
    %402 = vector.extract_strided_slice %399 {offsets = [0, 128], sizes = [2, 128], strides = [1, 1]} : vector<2x384xf32> to vector<2x128xf32>
    %403 = arith.mulf %402, %379 : vector<2x128xf32>
    %404 = vector.extract_strided_slice %399 {offsets = [0, 0], sizes = [2, 128], strides = [1, 1]} : vector<2x384xf32> to vector<2x128xf32>
    %405 = arith.mulf %404, %401 : vector<2x128xf32>
    %406 = arith.addf %403, %405 : vector<2x128xf32>
    %407 = vector.extract_strided_slice %399 {offsets = [0, 256], sizes = [2, 128], strides = [1, 1]} : vector<2x384xf32> to vector<2x128xf32>
    %408 = math.tanh %406 : vector<2x128xf32>
    %409 = arith.mulf %407, %408 : vector<2x128xf32>
    %c0_135 = arith.constant 0 : index
    %c0_136 = arith.constant 0 : index
    %410 = vector.load %arg6[%c0_135, %c0_136] : memref<1x128xf32, #tpu.memory_space<vmem>>, vector<1x128xf32>
    %c0_137 = arith.constant 0 : index
    %c0_138 = arith.constant 0 : index
    %411 = vector.load %arg7[%c0_137, %c0_138] : memref<1x1xf32, #tpu.memory_space<vmem>>, vector<1x1xf32>
    %412 = vector.extract %411[0, 0] : f32 from vector<1x1xf32>
    %413 = vector.broadcast %410 : vector<1x128xf32> to vector<2x128xf32>
    %414 = arith.mulf %82, %413 : vector<2x128xf32>
    %cst_139 = arith.constant dense<0.000000e+00> : vector<2xf32>
    %415 = vector.multi_reduction <add>, %414, %cst_139 [1] : vector<2x128xf32> to vector<2xf32>
    %416 = vector.shape_cast %415 : vector<2xf32> to vector<2x1xf32>
    %417 = vector.broadcast %412 : f32 to vector<2x1xf32>
    %418 = arith.addf %416, %417 : vector<2x1xf32>
    %419 = vector.broadcast %410 : vector<1x128xf32> to vector<2x128xf32>
    %420 = arith.mulf %132, %419 : vector<2x128xf32>
    %cst_140 = arith.constant dense<0.000000e+00> : vector<2xf32>
    %421 = vector.multi_reduction <add>, %420, %cst_140 [1] : vector<2x128xf32> to vector<2xf32>
    %422 = vector.shape_cast %421 : vector<2xf32> to vector<2x1xf32>
    %423 = vector.broadcast %412 : f32 to vector<2x1xf32>
    %424 = arith.addf %422, %423 : vector<2x1xf32>
    %425 = vector.broadcast %410 : vector<1x128xf32> to vector<2x128xf32>
    %426 = arith.mulf %182, %425 : vector<2x128xf32>
    %cst_141 = arith.constant dense<0.000000e+00> : vector<2xf32>
    %427 = vector.multi_reduction <add>, %426, %cst_141 [1] : vector<2x128xf32> to vector<2xf32>
    %428 = vector.shape_cast %427 : vector<2xf32> to vector<2x1xf32>
    %429 = vector.broadcast %412 : f32 to vector<2x1xf32>
    %430 = arith.addf %428, %429 : vector<2x1xf32>
    %431 = vector.broadcast %410 : vector<1x128xf32> to vector<2x128xf32>
    %432 = arith.mulf %232, %431 : vector<2x128xf32>
    %cst_142 = arith.constant dense<0.000000e+00> : vector<2xf32>
    %433 = vector.multi_reduction <add>, %432, %cst_142 [1] : vector<2x128xf32> to vector<2xf32>
    %434 = vector.shape_cast %433 : vector<2xf32> to vector<2x1xf32>
    %435 = vector.broadcast %412 : f32 to vector<2x1xf32>
    %436 = arith.addf %434, %435 : vector<2x1xf32>
    %437 = vector.broadcast %410 : vector<1x128xf32> to vector<2x128xf32>
    %438 = arith.mulf %282, %437 : vector<2x128xf32>
    %cst_143 = arith.constant dense<0.000000e+00> : vector<2xf32>
    %439 = vector.multi_reduction <add>, %438, %cst_143 [1] : vector<2x128xf32> to vector<2xf32>
    %440 = vector.shape_cast %439 : vector<2xf32> to vector<2x1xf32>
    %441 = vector.broadcast %412 : f32 to vector<2x1xf32>
    %442 = arith.addf %440, %441 : vector<2x1xf32>
    %443 = vector.broadcast %410 : vector<1x128xf32> to vector<2x128xf32>
    %444 = arith.mulf %332, %443 : vector<2x128xf32>
    %cst_144 = arith.constant dense<0.000000e+00> : vector<2xf32>
    %445 = vector.multi_reduction <add>, %444, %cst_144 [1] : vector<2x128xf32> to vector<2xf32>
    %446 = vector.shape_cast %445 : vector<2xf32> to vector<2x1xf32>
    %447 = vector.broadcast %412 : f32 to vector<2x1xf32>
    %448 = arith.addf %446, %447 : vector<2x1xf32>
    %449 = vector.broadcast %410 : vector<1x128xf32> to vector<2x128xf32>
    %450 = arith.mulf %382, %449 : vector<2x128xf32>
    %cst_145 = arith.constant dense<0.000000e+00> : vector<2xf32>
    %451 = vector.multi_reduction <add>, %450, %cst_145 [1] : vector<2x128xf32> to vector<2xf32>
    %452 = vector.shape_cast %451 : vector<2xf32> to vector<2x1xf32>
    %453 = vector.broadcast %412 : f32 to vector<2x1xf32>
    %454 = arith.addf %452, %453 : vector<2x1xf32>
    %455 = vector.broadcast %410 : vector<1x128xf32> to vector<2x128xf32>
    %456 = arith.mulf %409, %455 : vector<2x128xf32>
    %cst_146 = arith.constant dense<0.000000e+00> : vector<2xf32>
    %457 = vector.multi_reduction <add>, %456, %cst_146 [1] : vector<2x128xf32> to vector<2xf32>
    %458 = vector.shape_cast %457 : vector<2xf32> to vector<2x1xf32>
    %459 = vector.broadcast %412 : f32 to vector<2x1xf32>
    %460 = arith.addf %458, %459 : vector<2x1xf32>
    %461 = arith.maximumf %418, %424 : vector<2x1xf32>
    %462 = arith.maximumf %461, %430 : vector<2x1xf32>
    %463 = arith.maximumf %462, %436 : vector<2x1xf32>
    %464 = arith.maximumf %463, %442 : vector<2x1xf32>
    %465 = arith.maximumf %464, %448 : vector<2x1xf32>
    %466 = arith.maximumf %465, %454 : vector<2x1xf32>
    %467 = arith.maximumf %466, %460 : vector<2x1xf32>
    %468 = arith.subf %418, %467 : vector<2x1xf32>
    %469 = math.exp %468 : vector<2x1xf32>
    %470 = arith.subf %424, %467 : vector<2x1xf32>
    %471 = math.exp %470 : vector<2x1xf32>
    %472 = arith.subf %430, %467 : vector<2x1xf32>
    %473 = math.exp %472 : vector<2x1xf32>
    %474 = arith.subf %436, %467 : vector<2x1xf32>
    %475 = math.exp %474 : vector<2x1xf32>
    %476 = arith.subf %442, %467 : vector<2x1xf32>
    %477 = math.exp %476 : vector<2x1xf32>
    %478 = arith.subf %448, %467 : vector<2x1xf32>
    %479 = math.exp %478 : vector<2x1xf32>
    %480 = arith.subf %454, %467 : vector<2x1xf32>
    %481 = math.exp %480 : vector<2x1xf32>
    %482 = arith.subf %460, %467 : vector<2x1xf32>
    %483 = math.exp %482 : vector<2x1xf32>
    %484 = vector.broadcast %469 : vector<2x1xf32> to vector<2x128xf32>
    %485 = arith.mulf %484, %82 : vector<2x128xf32>
    %486 = arith.addf %469, %471 : vector<2x1xf32>
    %487 = vector.broadcast %471 : vector<2x1xf32> to vector<2x128xf32>
    %488 = arith.mulf %487, %132 : vector<2x128xf32>
    %489 = arith.addf %485, %488 : vector<2x128xf32>
    %490 = arith.addf %486, %473 : vector<2x1xf32>
    %491 = vector.broadcast %473 : vector<2x1xf32> to vector<2x128xf32>
    %492 = arith.mulf %491, %182 : vector<2x128xf32>
    %493 = arith.addf %489, %492 : vector<2x128xf32>
    %494 = arith.addf %490, %475 : vector<2x1xf32>
    %495 = vector.broadcast %475 : vector<2x1xf32> to vector<2x128xf32>
    %496 = arith.mulf %495, %232 : vector<2x128xf32>
    %497 = arith.addf %493, %496 : vector<2x128xf32>
    %498 = arith.addf %494, %477 : vector<2x1xf32>
    %499 = vector.broadcast %477 : vector<2x1xf32> to vector<2x128xf32>
    %500 = arith.mulf %499, %282 : vector<2x128xf32>
    %501 = arith.addf %497, %500 : vector<2x128xf32>
    %502 = arith.addf %498, %479 : vector<2x1xf32>
    %503 = vector.broadcast %479 : vector<2x1xf32> to vector<2x128xf32>
    %504 = arith.mulf %503, %332 : vector<2x128xf32>
    %505 = arith.addf %501, %504 : vector<2x128xf32>
    %506 = arith.addf %502, %481 : vector<2x1xf32>
    %507 = vector.broadcast %481 : vector<2x1xf32> to vector<2x128xf32>
    %508 = arith.mulf %507, %382 : vector<2x128xf32>
    %509 = arith.addf %505, %508 : vector<2x128xf32>
    %510 = arith.addf %506, %483 : vector<2x1xf32>
    %511 = vector.broadcast %483 : vector<2x1xf32> to vector<2x128xf32>
    %512 = arith.mulf %511, %409 : vector<2x128xf32>
    %513 = arith.addf %509, %512 : vector<2x128xf32>
    %514 = tpu.reciprocal %510 {approx = true} : vector<2x1xf32> -> vector<2x1xf32>
    %515 = vector.broadcast %514 : vector<2x1xf32> to vector<2x128xf32>
    %516 = arith.mulf %513, %515 : vector<2x128xf32>
    %517 = arith.truncf %516 : vector<2x128xf32> to vector<2x128xbf16>
    %c0_147 = arith.constant 0 : index
    %c0_148 = arith.constant 0 : index
    %518 = vector.load %arg8[%c0_147, %c0_148] : memref<128x256xbf16, #tpu.memory_space<vmem>>, vector<128x256xbf16>
    %cst_149 = arith.constant dense<0.000000e+00> : vector<2x256xf32>
    %519 = tpu.matmul %517, %518, %cst_149 {dimension_numbers = #tpu.dot_dimension_numbers<[1], [0], [0], [1], [0, 0, 1, 1], [], []>} : vector<2x128xbf16>, vector<128x256xbf16>, vector<2x256xf32> -> vector<2x256xf32>
    %c0_150 = arith.constant 0 : index
    %c0_151 = arith.constant 0 : index
    %520 = vector.load %arg9[%c0_150, %c0_151] : memref<1x256xf32, #tpu.memory_space<vmem>>, vector<1x256xf32>
    %521 = vector.broadcast %520 : vector<1x256xf32> to vector<2x256xf32>
    %522 = arith.addf %519, %521 : vector<2x256xf32>
    %c0_152 = arith.constant 0 : index
    %c0_153 = arith.constant 0 : index
    %c0_154 = arith.constant 0 : index
    %523 = vector.load %arg10[%c0_152, %c0_153, %c0_154] : memref<1x2x256xf32, #tpu.memory_space<vmem>>, vector<1x2x256xf32>
    %524 = vector.shape_cast %523 : vector<1x2x256xf32> to vector<2x256xf32>
    %525 = vector.shape_cast %522 : vector<2x256xf32> to vector<1x2x256xf32>
    tpu.vector_store %arg10[%c0_152, %c0_153, %c0_154], %525 {strides = array<i32>} : memref<1x2x256xf32, #tpu.memory_space<vmem>>, vector<1x2x256xf32>,
    return
  }
  func.func @transform_0(%arg0: i32) -> (i32, i32, i32) {
    %c0_i32 = arith.constant 0 : i32
    %c0_i32_0 = arith.constant 0 : i32
    %c0_i32_1 = arith.constant 0 : i32
    return %arg0, %c0_i32, %c0_i32_0 : i32, i32, i32
  }
  func.func @transform_1(%arg0: i32) -> (i32, i32) {
    %c0_i32 = arith.constant 0 : i32
    %c0_i32_0 = arith.constant 0 : i32
    %c0_i32_1 = arith.constant 0 : i32
    return %c0_i32, %c0_i32_0 : i32, i32
  }
  func.func @transform_2(%arg0: i32) -> (i32, i32) {
    %c0_i32 = arith.constant 0 : i32
    %c0_i32_0 = arith.constant 0 : i32
    %c0_i32_1 = arith.constant 0 : i32
    return %c0_i32, %c0_i32_0 : i32, i32
  }
  func.func @transform_3(%arg0: i32) -> (i32, i32, i32) {
    %c0_i32 = arith.constant 0 : i32
    %c0_i32_0 = arith.constant 0 : i32
    %c0_i32_1 = arith.constant 0 : i32
    %c0_i32_2 = arith.constant 0 : i32
    return %c0_i32, %c0_i32_0, %c0_i32_1 : i32, i32, i32
  }
  func.func @transform_4(%arg0: i32) -> (i32, i32, i32) {
    %c0_i32 = arith.constant 0 : i32
    %c0_i32_0 = arith.constant 0 : i32
    %c0_i32_1 = arith.constant 0 : i32
    %c0_i32_2 = arith.constant 0 : i32
    return %c0_i32, %c0_i32_0, %c0_i32_1 : i32, i32, i32
  }
  func.func @transform_5(%arg0: i32) -> (i32, i32) {
    %c0_i32 = arith.constant 0 : i32
    %c0_i32_0 = arith.constant 0 : i32
    %c0_i32_1 = arith.constant 0 : i32
    return %c0_i32, %c0_i32_0 : i32, i32
  }
  func.func @transform_6(%arg0: i32) -> (i32, i32) {
    %c0_i32 = arith.constant 0 : i32
    %c0_i32_0 = arith.constant 0 : i32
    %c0_i32_1 = arith.constant 0 : i32
    return %c0_i32, %c0_i32_0 : i32, i32
  }
  func.func @transform_7(%arg0: i32) -> (i32, i32) {
    %c0_i32 = arith.constant 0 : i32
    %c0_i32_0 = arith.constant 0 : i32
    %c0_i32_1 = arith.constant 0 : i32
    return %c0_i32, %c0_i32_0 : i32, i32
  }
  func.func @transform_8(%arg0: i32) -> (i32, i32) {
    %c0_i32 = arith.constant 0 : i32
    %c0_i32_0 = arith.constant 0 : i32
    %c0_i32_1 = arith.constant 0 : i32
    return %c0_i32, %c0_i32_0 : i32, i32
  }
  func.func @transform_9(%arg0: i32) -> (i32, i32, i32) {
    %c0_i32 = arith.constant 0 : i32
    %c0_i32_0 = arith.constant 0 : i32
    %c0_i32_1 = arith.constant 0 : i32
    return %arg0, %c0_i32, %c0_i32_0 : i32, i32, i32
  }
}

</mosaic_0001>

<bundles_post_ra>
// kernel: stacked_lstm_with_attention.1
= control target key start
LH: loop header
LB: loop body
LE: loop exit
PB: predicated region body
PF: predicated region fallthrough
CT: control target
= control target key end

     0   :  { %s5733_s0 = inlined_call_operand.vmem [shape: f32[1,16,128], index: 0, kind: input, shape index: {}]   ;;  %s5734_s1 = inlined_call_operand.hbm [shape: bf16[128,512], index: 1, kind: input, shape index: {}]   ;;  %s5735_s2 = inlined_call_operand.hbm [shape: bf16[128,512], index: 2, kind: input, shape index: {}]   ;;  %s5736_s3 = inlined_call_operand.vmem [shape: f32[2,1,512], index: 3, kind: input, shape index: {}]   ;;  %s5737_s4 = inlined_call_operand.hbm [shape: bf16[1,256,512], index: 4, kind: input, shape index: {}]   ;;  %s5738_s5 = inlined_call_operand.vmem [shape: f32[1,128], index: 5, kind: input, shape index: {}]   ;;  %s5739_s6 = inlined_call_operand.<no memory space> [shape: f32[1,1], index: 6, kind: input, shape index: {}]   ;;  %s5740_s7 = inlined_call_operand.hbm [shape: bf16[128,256], index: 7, kind: input, shape index: {}]   ;;  %s5741_s8 = inlined_call_operand.vmem [shape: f32[1,256], index: 8, kind: input, shape index: {}]   ;;  %s5742_s9 = inlined_call_operand.hbm [shape: f32[1,2,256], index: 9, kind: output, shape index: {}]  }
   0x1   :  { %v14_v0 = vstv %s5739_s6 }
   0x2   :  { %15 = vst [vmem:[#allocation2] sm:$0x1] %v14_v0 }
   0x3   :  { %16 = vsyncpa [#allocation4], 0 }
   0x4   :  { %17 = vsyncpa [#allocation7], 0 }
   0x5   :  { %18 = vsyncpa [#allocation10], 0 }
   0x6   :  { %19 = vsyncpa [#allocation5], 0  ;;  %s3939_s11 = smov [#allocation6]   ;;  %s3940_s13 = smov [#allocation3]  }
   0x7   :  { %s39_s12 = sshll.u32 %s3939_s11, 4  ;;  %s27_s14 = sshll.u32 %s3940_s13, 4  ;;  %s40_s12 = int_to_ptr.vmem [resolvable:$true] %s39_s12  ;;  %s4003_s14 = int_to_ptr.vmem [resolvable:$true] %s27_s14 }
   0x8   :  { %s3821_s17 = scalar_lea.hbm %s5735_s2, 4096 }
   0x9   :  { %p3822_p0 = scmp.ne.s32.totalorder %s5735_s2, %s3821_s17  ;;  %p3825_p1 = scmp.lt.u32.totalorder %s3821_s17, %s5735_s2 }
   0xb   :  { %p3827_p2 = pnand %p3825_p1, %p3822_p0 }
   0xd   :  { %3830 = shalt.err (!%p3827_p2)
}
   0xe   :  { %s3831_s21 = scalar_lea.vmem %s40_s12, 4096  ;;  %p3836_p4 = scmp.lt.s32.totalorder %s40_s12, %s40_s12 }
   0xf   :  { %p3832_p3 = scmp.ne.s32.totalorder %s40_s12, %s3831_s21  ;;  %p3837_p5 = scmp.lt.s32.totalorder %s3831_s21, %s3831_s21 }
  0x11   :  { %p3838_p6 = por %p3837_p5, %p3836_p4 }
  0x13   :  { %p3839_p7 = pnand %p3838_p6, %p3832_p3 }
  0x15   :  { %3842 = shalt.err (!%p3839_p7)
}
  0x16   :  { %s3941_s22 = smov 256   ;;  %s3942_s23 = smov 16  }
  0x17   :  { %45 = dma.hbm_to_vmem [thread:$0]  %s5735_s2, 4096, %s40_s12, [#allocation7], %s3941_s22, %s3941_s22, %s3942_s23  }
  0x18   :  { %s3843_s28 = scalar_lea.hbm %s5734_s1, 4096 }
  0x19   :  { %p3844_p8 = scmp.ne.s32.totalorder %s5734_s1, %s3843_s28  ;;  %p3847_p9 = scmp.lt.u32.totalorder %s3843_s28, %s5734_s1 }
  0x1b   :  { %p3849_p10 = pnand %p3847_p9, %p3844_p8 }
  0x1d   :  { %3852 = shalt.err (!%p3849_p10)
}
  0x1e   :  { %s3853_s13 = scalar_lea.vmem %s4003_s14, 4096  ;;  %p3858_p12 = scmp.lt.s32.totalorder %s4003_s14, %s4003_s14 }
  0x1f   :  { %p3854_p11 = scmp.ne.s32.totalorder %s4003_s14, %s3853_s13  ;;  %p3859_p13 = scmp.lt.s32.totalorder %s3853_s13, %s3853_s13 }
  0x21   :  { %p3860_p0 = por %p3859_p13, %p3858_p12 }
  0x23   :  { %p3861_p1 = pnand %p3860_p0, %p3854_p11 }
  0x25   :  { %3864 = shalt.err (!%p3861_p1)
}
  0x26   :  { %33 = dma.hbm_to_vmem [thread:$0]  %s5734_s1, 4096, %s4003_s14, [#allocation4], %s3941_s22, %s3941_s22, %s3942_s23  }
  0x27   :  { %s3943_s15 = smov [#allocation8]   ;;  %s3944_s17 = smov [#allocation9]  }
  0x28   :  { %s53_s16 = sshll.u32 %s3943_s15, 4  ;;  %s69_s18 = sshll.u32 %s3944_s17, 4  ;;  %s54_s16 = int_to_ptr.vmem [resolvable:$true] %s53_s16  ;;  %s4040_s18 = int_to_ptr.vmem [resolvable:$true] %s69_s18 }
  0x29   :  { %s3865_s20 = scalar_lea.hbm %s5737_s4, 8192 }
  0x2a   :  { %p3866_p2 = scmp.ne.s32.totalorder %s5737_s4, %s3865_s20  ;;  %p3869_p3 = scmp.lt.u32.totalorder %s3865_s20, %s5737_s4 }
  0x2c   :  { %p3871_p4 = pnand %p3869_p3, %p3866_p2 }
  0x2e   :  { %3874 = shalt.err (!%p3871_p4)
}
  0x2f   :  { %s3875_s1 = scalar_lea.vmem %s54_s16, 8192  ;;  %p3880_p6 = scmp.lt.s32.totalorder %s54_s16, %s54_s16 }
  0x30   :  { %p3876_p5 = scmp.ne.s32.totalorder %s54_s16, %s3875_s1  ;;  %p3881_p7 = scmp.lt.s32.totalorder %s3875_s1, %s3875_s1 }
  0x32   :  { %p3882_p8 = por %p3881_p7, %p3880_p6 }
  0x34   :  { %p3883_p9 = pnand %p3882_p8, %p3876_p5 }
  0x36   :  { %3886 = shalt.err (!%p3883_p9)
}
  0x37   :  { %59 = dma.hbm_to_vmem [thread:$0]  %s5737_s4, 8192, %s54_s16, [#allocation7], %s3941_s22, %s3941_s22, %s3942_s23  }
  0x38   :  { %s3887_s30 = scalar_lea.hbm %s5740_s7, 2048 }
  0x39   :  { %p3888_p10 = scmp.ne.s32.totalorder %s5740_s7, %s3887_s30  ;;  %p3891_p11 = scmp.lt.u32.totalorder %s3887_s30, %s5740_s7 }
  0x3b   :  { %p3893_p12 = pnand %p3891_p11, %p3888_p10 }
  0x3d   :  { %3896 = shalt.err (!%p3893_p12)
}
  0x3e   :  { %s3897_s12 = scalar_lea.vmem %s4040_s18, 2048  ;;  %p3902_p0 = scmp.lt.s32.totalorder %s4040_s18, %s4040_s18 }
  0x3f   :  { %p3898_p13 = scmp.ne.s32.totalorder %s4040_s18, %s3897_s12  ;;  %p3903_p1 = scmp.lt.s32.totalorder %s3897_s12, %s3897_s12 }
  0x41   :  { %p3904_p2 = por %p3903_p1, %p3902_p0 }
  0x43   :  { %p3905_p3 = pnand %p3904_p2, %p3898_p13 }
  0x45   :  { %3908 = shalt.err (!%p3905_p3)
}
  0x46   :  { %s3945_s4 = smov 128   ;;  %s3946_s22 = smov 8  }
  0x47   :  { %75 = dma.hbm_to_vmem [thread:$0]  %s5740_s7, 2048, %s4040_s18, [#allocation10], %s3945_s4, %s3945_s4, %s3946_s22  }
  0x48   :  { %3931 = dma.done.wait [#allocation4], 4096  }
  0x49   :  { %3932 = vsyncadd [#allocation4], 4294963200 }
  0x4a   :  { %3933 = dma.done.wait [#allocation7], 12288  }
  0x4b   :  { %3934 = vsyncadd [#allocation7], 4294955008 }
  0x4c   :  { %3935 = dma.done.wait [#allocation10], 2048  }
  0x4d   :  { %3936 = vsyncadd [#allocation10], 4294965248  ;;  %v5745_v1 = vmov 0   ;;  %v3233_v2 = vld [vmem:[#allocation3 + $0x4] ss:$16 sps:$4 sm:$0xff]   ;;  %vm2798_vm0 = vcmask 1041408  }
  0x4e   :  { %340 = vmatprep.mubr.bf16.mxu0 %v5745_v1  ;;  %383 = vmatprep.mubr.bf16.mxu1 %v5745_v1  ;;  %v3235_v3 = vld [vmem:[#allocation3 + $0xc] ss:$16 sps:$4 sm:$0xff]   ;;  %v3237_v4 = vld [vmem:[#allocation3] ss:$16 sps:$4 sm:$0xff]   ;;  %v3238_v5 = vld [vmem:[#allocation3 + $0x8] ss:$16 sps:$4 sm:$0xff]  }
  0x4f   :  { %308 = vmatprep.subr.bf16.mxu0 %v3233_v2  ;;  %351 = vmatprep.subr.bf16.mxu1 %v3235_v3  ;;  %v3239_v6 = vld [vmem:[#allocation3 + $0x24] ss:$16 sps:$4 sm:$0xff]   ;;  %v3241_v7 = vld [vmem:[#allocation3 + $0x2c] ss:$16 sps:$4 sm:$0xff]   ;;  %v3243_v8 = vld [vmem:[#allocation3 + $0x20] ss:$16 sps:$4 sm:$0xff]  }
  0x50   :  { %309 = vmatpush1.bf16.msra.mxu0 %v3237_v4  ;;  %352 = vmatpush1.bf16.msra.mxu1 %v3238_v5  ;;  %v3244_v9 = vld [vmem:[#allocation3 + $0x28] ss:$16 sps:$4 sm:$0xff]   ;;  %v3245_v10 = vld [vmem:[#allocation3 + $0x44] ss:$16 sps:$4 sm:$0xff]   ;;  %v3247_v11 = vld [vmem:[#allocation3 + $0x4c] ss:$16 sps:$4 sm:$0xff]  }
  0x51   :  { %310 = vmatprep.subr.bf16.mxu0 %v3239_v6  ;;  %353 = vmatprep.subr.bf16.mxu1 %v3241_v7  ;;  %v3249_v12 = vld [vmem:[#allocation3 + $0x40] ss:$16 sps:$4 sm:$0xff]   ;;  %v3250_v13 = vld [vmem:[#allocation3 + $0x48] ss:$16 sps:$4 sm:$0xff]   ;;  %v3251_v14 = vld [vmem:[#allocation3 + $0x64] ss:$16 sps:$4 sm:$0xff]  }
  0x52   :  { %v3253_v15 = vld [vmem:[#allocation3 + $0x6c] ss:$16 sps:$4 sm:$0xff]   ;;  %v3255_v16 = vld [vmem:[#allocation3 + $0x60] ss:$16 sps:$4 sm:$0xff]   ;;  %v3256_v17 = vld [vmem:[#allocation3 + $0x68] ss:$16 sps:$4 sm:$0xff]  }
  0x53   :  { %v3257_v18 = vld [vmem:[#allocation3 + $0x84] ss:$16 sps:$4 sm:$0xff]   ;;  %v3259_v19 = vld [vmem:[#allocation3 + $0x8c] ss:$16 sps:$4 sm:$0xff]   ;;  %v3261_v20 = vld [vmem:[#allocation3 + $0x80] ss:$16 sps:$4 sm:$0xff]  }
  0x54   :  { %311 = vmatpush1.bf16.msra.mxu0 %v3243_v8  ;;  %354 = vmatpush1.bf16.msra.mxu1 %v3244_v9  ;;  %v3262_v21 = vld [vmem:[#allocation3 + $0x88] ss:$16 sps:$4 sm:$0xff]   ;;  %v3263_v22 = vld [vmem:[#allocation3 + $0xa4] ss:$16 sps:$4 sm:$0xff]   ;;  %v3265_v23 = vld [vmem:[#allocation3 + $0xac] ss:$16 sps:$4 sm:$0xff]   ;;  %v128_v8 = vlaneseq }
  0x55   :  { %312 = vmatprep.subr.bf16.mxu0 %v3245_v10  ;;  %355 = vmatprep.subr.bf16.mxu1 %v3247_v11  ;;  %v3267_v24 = vld [vmem:[#allocation3 + $0xa0] ss:$16 sps:$4 sm:$0xff]   ;;  %v3268_v25 = vld [vmem:[#allocation3 + $0xa8] ss:$16 sps:$4 sm:$0xff]   ;;  %v3269_v26 = vld [vmem:[#allocation3 + $0xc4] ss:$16 sps:$4 sm:$0xff]  }
  0x56   :  { %v3271_v27 = vld [vmem:[#allocation3 + $0xcc] ss:$16 sps:$4 sm:$0xff]   ;;  %v3273_v28 = vld [vmem:[#allocation3 + $0xc0] ss:$16 sps:$4 sm:$0xff]   ;;  %v3274_v29 = vld [vmem:[#allocation3 + $0xc8] ss:$16 sps:$4 sm:$0xff]  }
  0x57   :  { %v3275_v30 = vld [vmem:[#allocation3 + $0xe4] ss:$16 sps:$4 sm:$0xff]   ;;  %v3277_v31 = vld [vmem:[#allocation3 + $0xec] ss:$16 sps:$4 sm:$0xff]   ;;  %v3279_v32 = vld [vmem:[#allocation3 + $0xe0] ss:$16 sps:$4 sm:$0xff]  }
  0x58   :  { %313 = vmatpush1.bf16.msra.mxu0 %v3249_v12  ;;  %356 = vmatpush1.bf16.msra.mxu1 %v3250_v13  ;;  %v3280_v33 = vld [vmem:[#allocation3 + $0xe8] ss:$16 sps:$4 sm:$0xff]   ;;  %v91_v34 = vld [vmem:[%s5733_s0] sm:$0xff]  ;;  %v4222_v9 = vshrl.u32 %v128_v8, 7  ;;  %s3949_s28 = smov [#allocation11]  }
  0x59   :  { %314 = vmatprep.subr.bf16.mxu0 %v3251_v14  ;;  %357 = vmatprep.subr.bf16.mxu1 %v3253_v15  ;;  %v92_v35 = vld [vmem:[%s5733_s0 + $0x8] sm:$0xff]  ;;  %v4086_v39 = vld [vmem:[#allocation6] ss:$16 sps:$4 sm:$0xff]   ;;  %s3062_s29 = sshll.u32 %s3949_s28, 4  ;;  %s3063_s29 = int_to_ptr.vmem [resolvable:$true] %s3062_s29 }
  0x5a   :  { %v4082_v36 = vld [vmem:[#allocation6 + $0x4] ss:$16 sps:$4 sm:$0xff]   ;;  %v4084_v37 = vld [vmem:[#allocation6 + $0xc] ss:$16 sps:$4 sm:$0xff]   ;;  %v93_v38 = vpack.c.bf16 %v92_v35, %v91_v34  ;;  %v4088_v40 = vld [vmem:[#allocation6 + $0x8] ss:$16 sps:$4 sm:$0xff]   ;;  %p3914_p5 = scmp.lt.s32.totalorder %s3063_s29, %s3063_s29 }
  0x5b   :  { %v4090_v41 = vld [vmem:[#allocation6 + $0x24] ss:$16 sps:$4 sm:$0xff]   ;;  %v4094_v42 = vld [vmem:[#allocation6 + $0x2c] ss:$16 sps:$4 sm:$0xff]   ;;  %v4096_v43 = vld [vmem:[#allocation6 + $0x20] ss:$16 sps:$4 sm:$0xff]  }
  0x5c   :  { %315 = vmatpush1.bf16.msra.mxu0 %v3255_v16  ;;  %358 = vmatpush1.bf16.msra.mxu1 %v3256_v17  ;;  %v4100_v44 = vld [vmem:[#allocation6 + $0x28] ss:$16 sps:$4 sm:$0xff]   ;;  %v4104_v45 = vld [vmem:[#allocation6 + $0x44] ss:$16 sps:$4 sm:$0xff]   ;;  %v4106_v46 = vld [vmem:[#allocation6 + $0x4c] ss:$16 sps:$4 sm:$0xff]  }
  0x5d   :  { %316 = vmatprep.subr.bf16.mxu0 %v3257_v18  ;;  %359 = vmatprep.subr.bf16.mxu1 %v3259_v19  ;;  %v4110_v47 = vld [vmem:[#allocation6 + $0x40] ss:$16 sps:$4 sm:$0xff]   ;;  %v4114_v48 = vld [vmem:[#allocation6 + $0x48] ss:$16 sps:$4 sm:$0xff]   ;;  %v4116_v49 = vld [vmem:[#allocation6 + $0x64] ss:$16 sps:$4 sm:$0xff]  }
  0x5e   :  { %v4120_v50 = vld [vmem:[#allocation6 + $0x6c] ss:$16 sps:$4 sm:$0xff]   ;;  %v4122_v51 = vld [vmem:[#allocation6 + $0x60] ss:$16 sps:$4 sm:$0xff]   ;;  %v4124_v52 = vld [vmem:[#allocation6 + $0x68] ss:$16 sps:$4 sm:$0xff]  }
  0x5f   :  { %v4126_v53 = vld [vmem:[#allocation6 + $0x84] ss:$16 sps:$4 sm:$0xff]   ;;  %v4128_v54 = vld [vmem:[#allocation6 + $0x8c] ss:$16 sps:$4 sm:$0xff]   ;;  %v4134_v55 = vld [vmem:[#allocation6 + $0x80] ss:$16 sps:$4 sm:$0xff]  }
  0x60   :  { %317 = vmatpush1.bf16.msra.mxu0 %v3261_v20  ;;  %360 = vmatpush1.bf16.msra.mxu1 %v3262_v21  ;;  %v4136_v56 = vld [vmem:[#allocation6 + $0x88] ss:$16 sps:$4 sm:$0xff]   ;;  %v4138_v57 = vld [vmem:[#allocation6 + $0xa4] ss:$16 sps:$4 sm:$0xff]   ;;  %v4140_v58 = vld [vmem:[#allocation6 + $0xac] ss:$16 sps:$4 sm:$0xff]  }
  0x61   :  { %318 = vmatprep.subr.bf16.mxu0 %v3263_v22  ;;  %361 = vmatprep.subr.bf16.mxu1 %v3265_v23  ;;  %v4146_v59 = vld [vmem:[#allocation6 + $0xa0] ss:$16 sps:$4 sm:$0xff]   ;;  %v4148_v60 = vld [vmem:[#allocation6 + $0xa8] ss:$16 sps:$4 sm:$0xff]   ;;  %v4150_v61 = vld [vmem:[#allocation6 + $0xc4] ss:$16 sps:$4 sm:$0xff]  }
  0x62   :  { %v4152_v62 = vld [vmem:[#allocation6 + $0xcc] ss:$16 sps:$4 sm:$0xff]   ;;  %v4158_v63 = vld [vmem:[#allocation6 + $0xc0] ss:$16 sps:$4 sm:$0xff]   ;;  %v4160_v0 = vld [vmem:[#allocation6 + $0xc8] ss:$16 sps:$4 sm:$0xff]  }
  0x63   :  { %v4162_v2 = vld [vmem:[#allocation6 + $0xe4] ss:$16 sps:$4 sm:$0xff]   ;;  %v4164_v3 = vld [vmem:[#allocation6 + $0xec] ss:$16 sps:$4 sm:$0xff]   ;;  %v4170_v4 = vld [vmem:[#allocation6 + $0xe0] ss:$16 sps:$4 sm:$0xff]  }
  0x64   :  { %319 = vmatpush1.bf16.msra.mxu0 %v3267_v24  ;;  %362 = vmatpush1.bf16.msra.mxu1 %v3268_v25  ;;  %v4172_v5 = vld [vmem:[#allocation6 + $0xe8] ss:$16 sps:$4 sm:$0xff]   ;;  %v4216_v6 = vld [vmem:[#allocation8 + $0x4] ss:$16 sps:$4 sm:$0xff]   ;;  %v4218_v7 = vld [vmem:[#allocation8 + $0xc] ss:$16 sps:$4 sm:$0xff]  }
  0x65   :  { %320 = vmatprep.subr.bf16.mxu0 %v3269_v26  ;;  %363 = vmatprep.subr.bf16.mxu1 %v3271_v27  ;;  %6067 = vst [vmem:[#allocation16_spill] sm:$0xff] %v4222_v9  ;;  %v4225_v10 = vsub.s32 0, %v4222_v9  ;;  %v5743_v11 = vsub.s32 2, %v4222_v9  ;;  %v126_v12 = vld [vmem:[%s5736_s3] sm:$0xf]  ;;  %v5744_v13 = vsub.s32 3, %v4222_v9 }
  0x66   :  { %v4233_v14 = vsub.s32 1, %v4222_v9  ;;  %v4328_v9 = vld [vmem:[#allocation8 + $0xa8] ss:$16 sps:$4 sm:$0xff]   ;;  %s3909_s30 = scalar_lea.vmem %s3063_s29, 64 }
  0x67   :  { %6068 = vst [vmem:[#allocation17_spill] sm:$0xff] %v4225_v10  ;;  %v131_v15 = vrot.slane %v126_v12, %v4225_v10  ;;  %v139_v16 = vrot.slane %v126_v12, %v5743_v11  ;;  %v143_v19 = vrot.slane %v126_v12, %v5744_v13  ;;  %6080 = vst [vmem:[#allocation29_spill] sm:$0xff] %v4328_v9  ;;  %v4334_v10 = vld [vmem:[#allocation8 + $0xcc] ss:$16 sps:$4 sm:$0xff]   ;;  %p3910_p4 = scmp.ne.s32.totalorder %s3063_s29, %s3909_s30  ;;  %p3915_p6 = scmp.lt.s32.totalorder %s3909_s30, %s3909_s30 }
  0x68   :  { %321 = vmatpush1.bf16.msra.mxu0 %v3273_v28  ;;  %364 = vmatpush1.bf16.msra.mxu1 %v3274_v29  ;;  %6069 = vst [vmem:[#allocation18_spill] sm:$0xff] %v4233_v14  ;;  %v135_v22 = vrot.slane %v126_v12, %v4233_v14  ;;  %v4332_v14 = vld [vmem:[#allocation8 + $0xc4] ss:$16 sps:$4 sm:$0xff]   ;;  %6082 = vst [vmem:[#allocation31_spill] sm:$0xff] %v4334_v10 }
  0x69   :  { %322 = vmatprep.subr.bf16.mxu0 %v3275_v30  ;;  %365 = vmatprep.subr.bf16.mxu1 %v3277_v31  ;;  %6081 = vst [vmem:[#allocation30_spill] sm:$0xff] %v4332_v14  ;;  %p3916_p7 = por %p3915_p6, %p3914_p5 }
  0x6b   :  { %p3917_p8 = pnand %p3916_p7, %p3910_p4 }
  0x6c   :  { %323 = vmatpush1.bf16.msra.mxu0 %v3279_v32  ;;  %366 = vmatpush1.bf16.msra.mxu1 %v3280_v33 }
  0x6d   :  { %586 = vmatprep.subr.bf16.mxu0 %v4082_v36  ;;  %627 = vmatprep.subr.bf16.mxu1 %v4084_v37 }
  0x6f   :  { %341 = vmatmul.mubr.bf16.vlgmr.msra.gmra.mrb[0].mxu0 %v93_v38  ;;  %384 = vmatmul.mubr.bf16.vlgmr.msra.gmra.mrb[0].mxu1 %v93_v38 }
  0x70   :  { %587 = vmatpush1.bf16.msra.mxu0 %v4086_v39  ;;  %628 = vmatpush1.bf16.msra.mxu1 %v4088_v40 }
  0x71   :  { %588 = vmatprep.subr.bf16.mxu0 %v4090_v41  ;;  %629 = vmatprep.subr.bf16.mxu1 %v4094_v42 }
  0x72   :  { %618 = vmatprep.mubr.bf16.mxu0 %v5745_v1  ;;  %659 = vmatprep.mubr.bf16.mxu1 %v5745_v1 }
  0x74   :  { %589 = vmatpush1.bf16.msra.mxu0 %v4096_v43  ;;  %630 = vmatpush1.bf16.msra.mxu1 %v4100_v44 }
  0x75   :  { %590 = vmatprep.subr.bf16.mxu0 %v4104_v45  ;;  %631 = vmatprep.subr.bf16.mxu1 %v4106_v46 }
  0x78   :  { %591 = vmatpush1.bf16.msra.mxu0 %v4110_v47  ;;  %632 = vmatpush1.bf16.msra.mxu1 %v4114_v48 }
  0x79   :  { %592 = vmatprep.subr.bf16.mxu0 %v4116_v49  ;;  %633 = vmatprep.subr.bf16.mxu1 %v4120_v50 }
  0x7c   :  { %593 = vmatpush1.bf16.msra.mxu0 %v4122_v51  ;;  %634 = vmatpush1.bf16.msra.mxu1 %v4124_v52 }
  0x7d   :  { %594 = vmatprep.subr.bf16.mxu0 %v4126_v53  ;;  %635 = vmatprep.subr.bf16.mxu1 %v4128_v54 }
  0x80   :  { %595 = vmatpush1.bf16.msra.mxu0 %v4134_v55  ;;  %636 = vmatpush1.bf16.msra.mxu1 %v4136_v56 }
  0x81   :  { %596 = vmatprep.subr.bf16.mxu0 %v4138_v57  ;;  %637 = vmatprep.subr.bf16.mxu1 %v4140_v58 }
  0x84   :  { %597 = vmatpush1.bf16.msra.mxu0 %v4146_v59  ;;  %638 = vmatpush1.bf16.msra.mxu1 %v4148_v60 }
  0x85   :  { %598 = vmatprep.subr.bf16.mxu0 %v4150_v61  ;;  %639 = vmatprep.subr.bf16.mxu1 %v4152_v62 }
  0x88   :  { %599 = vmatpush1.bf16.msra.mxu0 %v4158_v63  ;;  %640 = vmatpush1.bf16.msra.mxu1 %v4160_v0 }
  0x89   :  { %600 = vmatprep.subr.bf16.mxu0 %v4162_v2  ;;  %641 = vmatprep.subr.bf16.mxu1 %v4164_v3 }
  0x8c   :  { %601 = vmatpush1.bf16.msra.mxu0 %v4170_v4  ;;  %642 = vmatpush1.bf16.msra.mxu1 %v4172_v5 }
  0x8d   :  { %691 = vmatprep.subr.bf16.mxu0 %v4082_v36  ;;  %732 = vmatprep.subr.bf16.mxu1 %v4084_v37 }
  0x8f   :  { %619 = vmatmul.mubr.bf16.vlgmr.msra.gmra.mrb[4].mxu0 %v5745_v1  ;;  %660 = vmatmul.mubr.bf16.vlgmr.msra.gmra.mrb[4].mxu1 %v5745_v1 }
  0x90   :  { %692 = vmatpush1.bf16.msra.mxu0 %v4086_v39  ;;  %733 = vmatpush1.bf16.msra.mxu1 %v4088_v40 }
  0x91   :  { %693 = vmatprep.subr.bf16.mxu0 %v4090_v41  ;;  %734 = vmatprep.subr.bf16.mxu1 %v4094_v42 }
  0x92   :  { %723 = vmatprep.mubr.bf16.mxu0 %v5745_v1  ;;  %764 = vmatprep.mubr.bf16.mxu1 %v5745_v1 }
  0x94   :  { %694 = vmatpush1.bf16.msra.mxu0 %v4096_v43  ;;  %735 = vmatpush1.bf16.msra.mxu1 %v4100_v44 }
  0x95   :  { %695 = vmatprep.subr.bf16.mxu0 %v4104_v45  ;;  %736 = vmatprep.subr.bf16.mxu1 %v4106_v46 }
  0x98   :  { %696 = vmatpush1.bf16.msra.mxu0 %v4110_v47  ;;  %737 = vmatpush1.bf16.msra.mxu1 %v4114_v48 }
  0x99   :  { %697 = vmatprep.subr.bf16.mxu0 %v4116_v49  ;;  %738 = vmatprep.subr.bf16.mxu1 %v4120_v50 }
  0x9c   :  { %698 = vmatpush1.bf16.msra.mxu0 %v4122_v51  ;;  %739 = vmatpush1.bf16.msra.mxu1 %v4124_v52 }
  0x9d   :  { %699 = vmatprep.subr.bf16.mxu0 %v4126_v53  ;;  %740 = vmatprep.subr.bf16.mxu1 %v4128_v54 }
  0xa0   :  { %700 = vmatpush1.bf16.msra.mxu0 %v4134_v55  ;;  %741 = vmatpush1.bf16.msra.mxu1 %v4136_v56 }
  0xa1   :  { %701 = vmatprep.subr.bf16.mxu0 %v4138_v57  ;;  %742 = vmatprep.subr.bf16.mxu1 %v4140_v58 }
  0xa4   :  { %702 = vmatpush1.bf16.msra.mxu0 %v4146_v59  ;;  %743 = vmatpush1.bf16.msra.mxu1 %v4148_v60 }
  0xa5   :  { %703 = vmatprep.subr.bf16.mxu0 %v4150_v61  ;;  %744 = vmatprep.subr.bf16.mxu1 %v4152_v62 }
  0xa8   :  { %704 = vmatpush1.bf16.msra.mxu0 %v4158_v63  ;;  %745 = vmatpush1.bf16.msra.mxu1 %v4160_v0 }
  0xa9   :  { %705 = vmatprep.subr.bf16.mxu0 %v4162_v2  ;;  %746 = vmatprep.subr.bf16.mxu1 %v4164_v3 }
  0xac   :  { %706 = vmatpush1.bf16.msra.mxu0 %v4170_v4  ;;  %747 = vmatpush1.bf16.msra.mxu1 %v4172_v5 }
  0xad   :  { %1218 = vmatprep.subr.bf16.mxu0 %v4216_v6  ;;  %1259 = vmatprep.subr.bf16.mxu1 %v4218_v7 }
 0x142   :  { %v342_v17 = vpop.f32.mrb[0].mxu0  ;;  %v385_v18 = vpop.f32.mrb[0].mxu1 }
 0x143   :  { %v344_v20 = vpop.f32.mrb[1].mxu0  ;;  %v387_v21 = vpop.f32.mrb[1].mxu1  ;;  %v4249_v31 = vadd.f32 %v342_v17, %v131_v15  ;;  %v4258_v17 = vadd.f32 %v385_v18, %v139_v16 }
 0x144   :  { %v346_v23 = vpop.f32.mrb[2].mxu0  ;;  %v389_v24 = vpop.f32.mrb[2].mxu1  ;;  %v4251_v32 = vadd.f32 %v344_v20, %v135_v22  ;;  %v4255_v11 = vadd.f32 %v387_v21, %v143_v19 }
 0x145   :  { %v4241_v25 = vadd.f32 %v346_v23, %v131_v15  ;;  %v348_v26 = vpop.f32.mrb[3].mxu0  ;;  %v4243_v27 = vadd.f32 %v389_v24, %v139_v16  ;;  %v391_v28 = vpop.f32.mrb[3].mxu1 }
 0x146   :  { %v4245_v29 = vadd.f32 %v348_v26, %v135_v22  ;;  %v4247_v30 = vadd.f32 %v391_v28, %v143_v19 }
 0x147   :  { %6070 = vst [vmem:[#allocation19_spill] sm:$0xff] %v4241_v25  ;;  %6071 = vst [vmem:[#allocation20_spill] sm:$0xff] %v4243_v27  ;;  %v4316_v27 = vld [vmem:[#allocation8 + $0x88] ss:$16 sps:$4 sm:$0xff]   ;;  %v4326_v25 = vld [vmem:[#allocation8 + $0xa0] ss:$16 sps:$4 sm:$0xff]  }
 0x148   :  { %6072 = vst [vmem:[#allocation21_spill] sm:$0xff] %v4245_v29  ;;  %6073 = vst [vmem:[#allocation22_spill] sm:$0xff] %v4247_v30  ;;  %v4320_v30 = vld [vmem:[#allocation8 + $0xa4] ss:$16 sps:$4 sm:$0xff]   ;;  %v4322_v29 = vld [vmem:[#allocation8 + $0xac] ss:$16 sps:$4 sm:$0xff]  }
 0x149   :  { %6076 = vst [vmem:[#allocation25_spill] sm:$0xff] %v4316_v27  ;;  %6077 = vst [vmem:[#allocation26_spill] sm:$0xff] %v4320_v30 }
 0x14a   :  { %6078 = vst [vmem:[#allocation27_spill] sm:$0xff] %v4322_v29  ;;  %6079 = vst [vmem:[#allocation28_spill] sm:$0xff] %v4326_v25 }
 0x162   :  { %v620_v33 = vpop.f32.mrb[4].mxu0  ;;  %v661_v34 = vpop.f32.mrb[4].mxu1 }
 0x163   :  { %v668_v35 = vadd.f32 %v620_v33, %v4249_v31  ;;  %v622_v38 = vpop.f32.mrb[5].mxu0  ;;  %v663_v8 = vpop.f32.mrb[5].mxu1  ;;  %v670_v20 = vadd.f32 %v661_v34, %v4258_v17 }
 0x164   :  { %v669_v12 = vadd.f32 %v622_v38, %v4251_v32  ;;  %v624_v23 = vpop.f32.mrb[6].mxu0  ;;  %v665_v24 = vpop.f32.mrb[6].mxu1  ;;  %v671_v15 = vadd.f32 %v663_v8, %v4255_v11 }
 0x165   :  { %v672_v26 = vmul.f32 0.5, %v668_v35  ;;  %v625_v13 = vpop.f32.mrb[7].mxu0  ;;  %v666_v28 = vpop.f32.mrb[7].mxu1  ;;  %v674_v22 = vmul.f32 0.5, %v670_v20 }
 0x166   :  { %v673_v1 = vmul.f32 0.5, %v669_v12  ;;  %v4264_v28 = vld [vmem:[#allocation8] ss:$16 sps:$4 sm:$0xff]  }
 0x167   :  { %3449 = vtanh.f32 %v672_v26 }
 0x168   :  { %3451 = vtanh.f32 %v673_v1 }
 0x169   :  { %3453 = vtanh.f32 %v671_v15  ;;  %v4266_v15 = vld [vmem:[#allocation8 + $0x8] ss:$16 sps:$4 sm:$0xff]  }
 0x16a   :  { %3455 = vtanh.f32 %v674_v22  ;;  %v4270_v22 = vld [vmem:[#allocation8 + $0x24] ss:$16 sps:$4 sm:$0xff]  }
 0x171   :  { %v3450_v33 = vpop.eup %3449 }
 0x172   :  { %v678_v38 = vmul.f32 0.5, %v3450_v33  ;;  %v3452_v23 = vpop.eup %3451  ;;  %v4272_v33 = vld [vmem:[#allocation8 + $0x2c] ss:$16 sps:$4 sm:$0xff]  }
 0x173   :  { %v679_v19 = vmul.f32 0.5, %v3452_v23  ;;  %v3454_v21 = vpop.eup %3453  ;;  %v4280_v23 = vld [vmem:[#allocation8 + $0x28] ss:$16 sps:$4 sm:$0xff]  }
 0x174   :  { %v681_v24 = vadd.f32 0.5, %v678_v38  ;;  %v3456_v1 = vpop.eup %3455  ;;  %v4278_v38 = vld [vmem:[#allocation8 + $0x20] ss:$16 sps:$4 sm:$0xff]  }
 0x175   :  { %v682_v13 = vadd.f32 0.5, %v679_v19  ;;  %v680_v16 = vmul.f32 0.5, %v3456_v1  ;;  %v4286_v19 = vld [vmem:[#allocation8 + $0x4c] ss:$16 sps:$4 sm:$0xff]  }
 0x176   :  { %v686_v35 = vmul.f32 %v3454_v21, %v681_v24  ;;  %v4284_v24 = vld [vmem:[#allocation8 + $0x44] ss:$16 sps:$4 sm:$0xff]   ;;  %v3948_v21 = vmov 0.0|0.0   ;;  %v4298_v1 = vld [vmem:[#allocation8 + $0x6c] ss:$16 sps:$4 sm:$0xff]  }
 0x177   :  { %v685_v12 = vmul.f32 0.0, %v682_v13  ;;  %v683_v18 = vadd.f32 0.5, %v680_v16  ;;  %v4290_v13 = vld [vmem:[#allocation8 + $0x40] ss:$16 sps:$4 sm:$0xff]  }
 0x178   :  { %v4302_v16 = vld [vmem:[#allocation8 + $0x60] ss:$16 sps:$4 sm:$0xff]  }
 0x179   :  { %v4261_v26 = vadd.f32 %v686_v35, %v685_v12  ;;  %v4292_v35 = vld [vmem:[#allocation8 + $0x48] ss:$16 sps:$4 sm:$0xff]   ;;  %v4296_v12 = vld [vmem:[#allocation8 + $0x64] ss:$16 sps:$4 sm:$0xff]  }
 0x17b   :  { %3457 = vtanh.f32 %v4261_v26 }
 0x185   :  { %v3458_v8 = vpop.eup %3457 }
 0x186   :  { %v689_v34 = vmul.f32 %v3458_v8, %v683_v18  ;;  %v4304_v18 = vld [vmem:[#allocation8 + $0x68] ss:$16 sps:$4 sm:$0xff]   ;;  %v4308_v8 = vld [vmem:[#allocation8 + $0x84] ss:$16 sps:$4 sm:$0xff]  }
 0x188   :  { %v4268_v20 = vpack.c.bf16 %v689_v34, %v689_v34  ;;  %v4310_v34 = vld [vmem:[#allocation8 + $0x8c] ss:$16 sps:$4 sm:$0xff]  }
 0x189   :  { %6074 = vst [vmem:[#allocation23_spill] sm:$0xff] %v4310_v34 }
 0x18a   :  { %724 = vmatmul.mubr.bf16.vlgmr.msra.gmra.mrb[8].mxu0 %v4268_v20  ;;  %765 = vmatmul.mubr.bf16.vlgmr.msra.gmra.mrb[8].mxu1 %v4268_v20 }
 0x18b   :  { %1219 = vmatpush1.bf16.msra.mxu0 %v4264_v28  ;;  %1260 = vmatpush1.bf16.msra.mxu1 %v4266_v15 }
 0x18c   :  { %1220 = vmatprep.subr.bf16.mxu0 %v4270_v22  ;;  %1261 = vmatprep.subr.bf16.mxu1 %v4272_v33 }
 0x18d   :  { %1250 = vmatprep.mubr.bf16.mxu0 %v3948_v21  ;;  %1291 = vmatprep.mubr.bf16.mxu1 %v3948_v21  ;;  %v4314_v21 = vld [vmem:[#allocation8 + $0x80] ss:$16 sps:$4 sm:$0xff]  }
 0x18e   :  { %6075 = vst [vmem:[#allocation24_spill] sm:$0xff] %v4314_v21 }
 0x18f   :  { %1221 = vmatpush1.bf16.msra.mxu0 %v4278_v38  ;;  %1262 = vmatpush1.bf16.msra.mxu1 %v4280_v23 }
 0x190   :  { %1222 = vmatprep.subr.bf16.mxu0 %v4284_v24  ;;  %1263 = vmatprep.subr.bf16.mxu1 %v4286_v19 }
 0x193   :  { %1223 = vmatpush1.bf16.msra.mxu0 %v4290_v13  ;;  %1264 = vmatpush1.bf16.msra.mxu1 %v4292_v35 }
 0x194   :  { %1224 = vmatprep.subr.bf16.mxu0 %v4296_v12  ;;  %1265 = vmatprep.subr.bf16.mxu1 %v4298_v1 }
 0x197   :  { %1225 = vmatpush1.bf16.msra.mxu0 %v4302_v16  ;;  %1266 = vmatpush1.bf16.msra.mxu1 %v4304_v18 }
 0x198   :  { %1226 = vmatprep.subr.bf16.mxu0 %v4308_v8  ;;  %1267 = vmatprep.subr.bf16.mxu1 %v4310_v34  ;;  %v4338_v34 = vld [vmem:[#allocation8 + $0xc0] ss:$16 sps:$4 sm:$0xff]  }
 0x199   :  { %6083 = vst [vmem:[#allocation32_spill] sm:$0xff] %v4338_v34 }
 0x19b   :  { %1227 = vmatpush1.bf16.msra.mxu0 %v4314_v21  ;;  %1268 = vmatpush1.bf16.msra.mxu1 %v4316_v27  ;;  %v4340_v21 = vld [vmem:[#allocation8 + $0xc8] ss:$16 sps:$4 sm:$0xff]   ;;  %v4344_v27 = vld [vmem:[#allocation8 + $0xe4] ss:$16 sps:$4 sm:$0xff]  }
 0x19c   :  { %1228 = vmatprep.subr.bf16.mxu0 %v4320_v30  ;;  %1269 = vmatprep.subr.bf16.mxu1 %v4322_v29  ;;  %6084 = vst [vmem:[#allocation33_spill] sm:$0xff] %v4340_v21  ;;  %6085 = vst [vmem:[#allocation34_spill] sm:$0xff] %v4344_v27  ;;  %v4346_v30 = vld [vmem:[#allocation8 + $0xec] ss:$16 sps:$4 sm:$0xff]   ;;  %v4350_v29 = vld [vmem:[#allocation8 + $0xe0] ss:$16 sps:$4 sm:$0xff]  }
 0x19d   :  { %6086 = vst [vmem:[#allocation35_spill] sm:$0xff] %v4346_v30  ;;  %6087 = vst [vmem:[#allocation36_spill] sm:$0xff] %v4350_v29 }
 0x19f   :  { %1229 = vmatpush1.bf16.msra.mxu0 %v4326_v25  ;;  %1270 = vmatpush1.bf16.msra.mxu1 %v4328_v9  ;;  %v4352_v25 = vld [vmem:[#allocation8 + $0xe8] ss:$16 sps:$4 sm:$0xff]   ;;  %v4356_v9 = vld [vmem:[#allocation8 + $0x104] ss:$16 sps:$4 sm:$0xff]  }
 0x1a0   :  { %1230 = vmatprep.subr.bf16.mxu0 %v4332_v14  ;;  %1271 = vmatprep.subr.bf16.mxu1 %v4334_v10  ;;  %6088 = vst [vmem:[#allocation37_spill] sm:$0xff] %v4352_v25  ;;  %6089 = vst [vmem:[#allocation38_spill] sm:$0xff] %v4356_v9  ;;  %v4358_v14 = vld [vmem:[#allocation8 + $0x10c] ss:$16 sps:$4 sm:$0xff]   ;;  %v4362_v10 = vld [vmem:[#allocation8 + $0x100] ss:$16 sps:$4 sm:$0xff]  }
 0x1a1   :  { %6090 = vst [vmem:[#allocation39_spill] sm:$0xff] %v4358_v14  ;;  %6091 = vst [vmem:[#allocation40_spill] sm:$0xff] %v4362_v10 }
 0x1a3   :  { %1231 = vmatpush1.bf16.msra.mxu0 %v4338_v34  ;;  %1272 = vmatpush1.bf16.msra.mxu1 %v4340_v21  ;;  %v4364_v34 = vld [vmem:[#allocation8 + $0x108] ss:$16 sps:$4 sm:$0xff]   ;;  %v4368_v21 = vld [vmem:[#allocation8 + $0x124] ss:$16 sps:$4 sm:$0xff]  }
 0x1a4   :  { %1232 = vmatprep.subr.bf16.mxu0 %v4344_v27  ;;  %1273 = vmatprep.subr.bf16.mxu1 %v4346_v30  ;;  %6092 = vst [vmem:[#allocation41_spill] sm:$0xff] %v4364_v34  ;;  %6093 = vst [vmem:[#allocation42_spill] sm:$0xff] %v4368_v21  ;;  %v4370_v27 = vld [vmem:[#allocation8 + $0x12c] ss:$16 sps:$4 sm:$0xff]   ;;  %v4374_v30 = vld [vmem:[#allocation8 + $0x120] ss:$16 sps:$4 sm:$0xff]  }
 0x1a5   :  { %6094 = vst [vmem:[#allocation43_spill] sm:$0xff] %v4370_v27  ;;  %6095 = vst [vmem:[#allocation44_spill] sm:$0xff] %v4374_v30 }
 0x1a7   :  { %1233 = vmatpush1.bf16.msra.mxu0 %v4350_v29  ;;  %1274 = vmatpush1.bf16.msra.mxu1 %v4352_v25  ;;  %v4376_v29 = vld [vmem:[#allocation8 + $0x128] ss:$16 sps:$4 sm:$0xff]   ;;  %v4380_v25 = vld [vmem:[#allocation8 + $0x144] ss:$16 sps:$4 sm:$0xff]  }
 0x1a8   :  { %1234 = vmatprep.subr.bf16.mxu0 %v4356_v9  ;;  %1275 = vmatprep.subr.bf16.mxu1 %v4358_v14  ;;  %6096 = vst [vmem:[#allocation45_spill] sm:$0xff] %v4376_v29  ;;  %6097 = vst [vmem:[#allocation46_spill] sm:$0xff] %v4380_v25  ;;  %v4382_v9 = vld [vmem:[#allocation8 + $0x14c] ss:$16 sps:$4 sm:$0xff]   ;;  %v4386_v14 = vld [vmem:[#allocation8 + $0x140] ss:$16 sps:$4 sm:$0xff]  }
 0x1a9   :  { %6098 = vst [vmem:[#allocation47_spill] sm:$0xff] %v4382_v9  ;;  %6099 = vst [vmem:[#allocation48_spill] sm:$0xff] %v4386_v14 }
 0x1ab   :  { %1235 = vmatpush1.bf16.msra.mxu0 %v4362_v10  ;;  %1276 = vmatpush1.bf16.msra.mxu1 %v4364_v34  ;;  %v4388_v10 = vld [vmem:[#allocation8 + $0x148] ss:$16 sps:$4 sm:$0xff]   ;;  %v4392_v34 = vld [vmem:[#allocation8 + $0x164] ss:$16 sps:$4 sm:$0xff]  }
 0x1ac   :  { %1236 = vmatprep.subr.bf16.mxu0 %v4368_v21  ;;  %1277 = vmatprep.subr.bf16.mxu1 %v4370_v27  ;;  %6100 = vst [vmem:[#allocation49_spill] sm:$0xff] %v4388_v10  ;;  %6101 = vst [vmem:[#allocation50_spill] sm:$0xff] %v4392_v34  ;;  %v4394_v21 = vld [vmem:[#allocation8 + $0x16c] ss:$16 sps:$4 sm:$0xff]   ;;  %v4398_v27 = vld [vmem:[#allocation8 + $0x160] ss:$16 sps:$4 sm:$0xff]  }
 0x1ad   :  { %6102 = vst [vmem:[#allocation51_spill] sm:$0xff] %v4394_v21  ;;  %6103 = vst [vmem:[#allocation52_spill] sm:$0xff] %v4398_v27 }
 0x1af   :  { %1237 = vmatpush1.bf16.msra.mxu0 %v4374_v30  ;;  %1278 = vmatpush1.bf16.msra.mxu1 %v4376_v29  ;;  %v4400_v30 = vld [vmem:[#allocation8 + $0x168] ss:$16 sps:$4 sm:$0xff]   ;;  %v4404_v29 = vld [vmem:[#allocation8 + $0x184] ss:$16 sps:$4 sm:$0xff]  }
 0x1b0   :  { %1238 = vmatprep.subr.bf16.mxu0 %v4380_v25  ;;  %1279 = vmatprep.subr.bf16.mxu1 %v4382_v9  ;;  %6104 = vst [vmem:[#allocation53_spill] sm:$0xff] %v4400_v30  ;;  %6105 = vst [vmem:[#allocation54_spill] sm:$0xff] %v4404_v29  ;;  %v4406_v25 = vld [vmem:[#allocation8 + $0x18c] ss:$16 sps:$4 sm:$0xff]   ;;  %v4410_v9 = vld [vmem:[#allocation8 + $0x180] ss:$16 sps:$4 sm:$0xff]  }
 0x1b1   :  { %6106 = vst [vmem:[#allocation55_spill] sm:$0xff] %v4406_v25  ;;  %6107 = vst [vmem:[#allocation56_spill] sm:$0xff] %v4410_v9 }
 0x1b3   :  { %1239 = vmatpush1.bf16.msra.mxu0 %v4386_v14  ;;  %1280 = vmatpush1.bf16.msra.mxu1 %v4388_v10  ;;  %v4412_v14 = vld [vmem:[#allocation8 + $0x188] ss:$16 sps:$4 sm:$0xff]   ;;  %v4416_v10 = vld [vmem:[#allocation8 + $0x1a4] ss:$16 sps:$4 sm:$0xff]  }
 0x1b4   :  { %1240 = vmatprep.subr.bf16.mxu0 %v4392_v34  ;;  %1281 = vmatprep.subr.bf16.mxu1 %v4394_v21  ;;  %6108 = vst [vmem:[#allocation57_spill] sm:$0xff] %v4412_v14  ;;  %6109 = vst [vmem:[#allocation58_spill] sm:$0xff] %v4416_v10  ;;  %v4418_v34 = vld [vmem:[#allocation8 + $0x1ac] ss:$16 sps:$4 sm:$0xff]   ;;  %v4422_v21 = vld [vmem:[#allocation8 + $0x1a0] ss:$16 sps:$4 sm:$0xff]  }
 0x1b5   :  { %6110 = vst [vmem:[#allocation59_spill] sm:$0xff] %v4418_v34  ;;  %6111 = vst [vmem:[#allocation60_spill] sm:$0xff] %v4422_v21 }
 0x1b7   :  { %1241 = vmatpush1.bf16.msra.mxu0 %v4398_v27  ;;  %1282 = vmatpush1.bf16.msra.mxu1 %v4400_v30  ;;  %v4424_v27 = vld [vmem:[#allocation8 + $0x1a8] ss:$16 sps:$4 sm:$0xff]   ;;  %v4428_v30 = vld [vmem:[#allocation8 + $0x1c4] ss:$16 sps:$4 sm:$0xff]  }
 0x1b8   :  { %1242 = vmatprep.subr.bf16.mxu0 %v4404_v29  ;;  %1283 = vmatprep.subr.bf16.mxu1 %v4406_v25  ;;  %6112 = vst [vmem:[#allocation61_spill] sm:$0xff] %v4424_v27  ;;  %6113 = vst [vmem:[#allocation62_spill] sm:$0xff] %v4428_v30  ;;  %v4430_v29 = vld [vmem:[#allocation8 + $0x1cc] ss:$16 sps:$4 sm:$0xff]   ;;  %v4434_v25 = vld [vmem:[#allocation8 + $0x1c0] ss:$16 sps:$4 sm:$0xff]  }
 0x1b9   :  { %6114 = vst [vmem:[#allocation63_spill] sm:$0xff] %v4430_v29 }
 0x1bb   :  { %1243 = vmatpush1.bf16.msra.mxu0 %v4410_v9  ;;  %1284 = vmatpush1.bf16.msra.mxu1 %v4412_v14  ;;  %v4436_v9 = vld [vmem:[#allocation8 + $0x1c8] ss:$16 sps:$4 sm:$0xff]   ;;  %v4440_v14 = vld [vmem:[#allocation8 + $0x1e4] ss:$16 sps:$4 sm:$0xff]  }
 0x1bc   :  { %1244 = vmatprep.subr.bf16.mxu0 %v4416_v10  ;;  %1285 = vmatprep.subr.bf16.mxu1 %v4418_v34  ;;  %6115 = vst [vmem:[#allocation64_spill] sm:$0xff] %v4440_v14  ;;  %v4442_v10 = vld [vmem:[#allocation8 + $0x1ec] ss:$16 sps:$4 sm:$0xff]   ;;  %v4446_v34 = vld [vmem:[#allocation8 + $0x1e0] ss:$16 sps:$4 sm:$0xff]  }
 0x1bd   :  { %6116 = vst [vmem:[#allocation65_spill] sm:$0xff] %v4442_v10  ;;  %6117 = vst [vmem:[#allocation66_spill] sm:$0xff] %v4446_v34 }
 0x1bf   :  { %1245 = vmatpush1.bf16.msra.mxu0 %v4422_v21  ;;  %1286 = vmatpush1.bf16.msra.mxu1 %v4424_v27  ;;  %v4448_v21 = vld [vmem:[#allocation8 + $0x1e8] ss:$16 sps:$4 sm:$0xff]  }
 0x1c0   :  { %1246 = vmatprep.subr.bf16.mxu0 %v4428_v30  ;;  %1287 = vmatprep.subr.bf16.mxu1 %v4430_v29  ;;  %6118 = vst [vmem:[#allocation67_spill] sm:$0xff] %v4448_v21 }
 0x1c3   :  { %1247 = vmatpush1.bf16.msra.mxu0 %v4434_v25  ;;  %1288 = vmatpush1.bf16.msra.mxu1 %v4436_v9 }
 0x1c4   :  { %1248 = vmatprep.subr.bf16.mxu0 %v4440_v14  ;;  %1289 = vmatprep.subr.bf16.mxu1 %v4442_v10  ;;  %v6119_v10 = vmov 0  }
 0x1c7   :  { %1249 = vmatpush1.bf16.msra.mxu0 %v4446_v34  ;;  %1290 = vmatpush1.bf16.msra.mxu1 %v4448_v21 }
 0x1c8   :  { %1322 = vmatprep.subr.bf16.mxu0 %v4082_v36  ;;  %1363 = vmatprep.subr.bf16.mxu1 %v4084_v37  ;;  %v2789_v36 = vld [vmem:[#allocation2] sm:$0x1] }
 0x1c9   :  { %3220 = vpush %v2789_v36 }
 0x1ca   :  { %1251 = vmatmul.mubr.bf16.vlgmr.msra.gmra.mrb[12].mxu0 %v4268_v20  ;;  %1292 = vmatmul.mubr.bf16.vlgmr.msra.gmra.mrb[12].mxu1 %v4268_v20 }
 0x1cb   :  { %1323 = vmatpush1.bf16.msra.mxu0 %v4086_v39  ;;  %1364 = vmatpush1.bf16.msra.mxu1 %v4088_v40 }
 0x1cc   :  { %1324 = vmatprep.subr.bf16.mxu0 %v4090_v41  ;;  %1365 = vmatprep.subr.bf16.mxu1 %v4094_v42 }
 0x1cd   :  { %1354 = vmatprep.mubr.bf16.mxu0 %v6119_v10  ;;  %1395 = vmatprep.mubr.bf16.mxu1 %v6119_v10 }
 0x1cf   :  { %1325 = vmatpush1.bf16.msra.mxu0 %v4096_v43  ;;  %1366 = vmatpush1.bf16.msra.mxu1 %v4100_v44 }
 0x1d0   :  { %1326 = vmatprep.subr.bf16.mxu0 %v4104_v45  ;;  %1367 = vmatprep.subr.bf16.mxu1 %v4106_v46 }
 0x1d3   :  { %1327 = vmatpush1.bf16.msra.mxu0 %v4110_v47  ;;  %1368 = vmatpush1.bf16.msra.mxu1 %v4114_v48 }
 0x1d4   :  { %1328 = vmatprep.subr.bf16.mxu0 %v4116_v49  ;;  %1369 = vmatprep.subr.bf16.mxu1 %v4120_v50 }
 0x1d7   :  { %1329 = vmatpush1.bf16.msra.mxu0 %v4122_v51  ;;  %1370 = vmatpush1.bf16.msra.mxu1 %v4124_v52 }
 0x1d8   :  { %1330 = vmatprep.subr.bf16.mxu0 %v4126_v53  ;;  %1371 = vmatprep.subr.bf16.mxu1 %v4128_v54 }
 0x1db   :  { %1331 = vmatpush1.bf16.msra.mxu0 %v4134_v55  ;;  %1372 = vmatpush1.bf16.msra.mxu1 %v4136_v56 }
 0x1dc   :  { %1332 = vmatprep.subr.bf16.mxu0 %v4138_v57  ;;  %1373 = vmatprep.subr.bf16.mxu1 %v4140_v58 }
 0x1df   :  { %1333 = vmatpush1.bf16.msra.mxu0 %v4146_v59  ;;  %1374 = vmatpush1.bf16.msra.mxu1 %v4148_v60 }
 0x1e0   :  { %1334 = vmatprep.subr.bf16.mxu0 %v4150_v61  ;;  %1375 = vmatprep.subr.bf16.mxu1 %v4152_v62 }
 0x1e3   :  { %1335 = vmatpush1.bf16.msra.mxu0 %v4158_v63  ;;  %1376 = vmatpush1.bf16.msra.mxu1 %v4160_v0  ;;  %v803_v0 = vrot.slane %v4261_v26, 6  ;;  %v3137_v26 = vld [vmem:[%s5736_s3 + $0x4] sm:$0xf] }
 0x1e4   :  { %1336 = vmatprep.subr.bf16.mxu0 %v4162_v2  ;;  %1377 = vmatprep.subr.bf16.mxu1 %v4164_v3 }
 0x1e7   :  { %1337 = vmatpush1.bf16.msra.mxu0 %v4170_v4  ;;  %1378 = vmatpush1.bf16.msra.mxu1 %v4172_v5 }
 0x1e8   :  { %1448 = vmatprep.subr.bf16.mxu0 %v4216_v6  ;;  %1489 = vmatprep.subr.bf16.mxu1 %v4218_v7 }
 0x25d   :  { %v725_v37 = vpop.f32.mrb[8].mxu0  ;;  %v766_v39 = vpop.f32.mrb[8].mxu1 }
 0x25e   :  { %v777_v40 = vrot.slane %v725_v37, 6  ;;  %v727_v41 = vpop.f32.mrb[9].mxu0  ;;  %v768_v42 = vpop.f32.mrb[9].mxu1  ;;  %v779_v54 = vrot.slane %v766_v39, 6 }
 0x25f   :  { %v778_v43 = vrot.slane %v727_v41, 6  ;;  %v729_v44 = vpop.f32.mrb[10].mxu0  ;;  %v770_v45 = vpop.f32.mrb[10].mxu1  ;;  %v780_v47 = vrot.slane %v768_v42, 6 }
 0x260   :  { %v785_v46 = vadd.f32 %v777_v40, %v4249_v31  ;;  %v730_v48 = vpop.f32.mrb[11].mxu0  ;;  %v771_v49 = vpop.f32.mrb[11].mxu1  ;;  %v787_v55 = vadd.f32 %v779_v54, %v4258_v17  ;;  %v6120_v44 = vld [vmem:[#allocation23_spill] sm:$0xff]  ;;  %v6121_v45 = vld [vmem:[#allocation17_spill] sm:$0xff] }
 0x261   :  { %v786_v50 = vadd.f32 %v778_v43, %v4251_v32  ;;  %v788_v53 = vadd.f32 %v780_v47, %v4255_v11  ;;  %v6123_v47 = vld [vmem:[#allocation18_spill] sm:$0xff]  ;;  %v6125_v49 = vld [vmem:[#allocation24_spill] sm:$0xff] }
 0x262   :  { %v789_v51 = vmul.f32 0.5, %v785_v46  ;;  %v791_v56 = vmul.f32 0.5, %v787_v55  ;;  %v4524_v46 = vrot.slane %v3137_v26, %v6121_v45  ;;  %v4527_v48 = vrot.slane %v3137_v26, %v6123_v47  ;;  %v6129_v55 = vld [vmem:[#allocation16_spill] sm:$0xff]  ;;  %v6148_v47 = vld [vmem:[#allocation42_spill] sm:$0xff]  ;;  %v6149_v45 = vld [vmem:[#allocation43_spill] sm:$0xff] }
 0x263   :  { %v790_v52 = vmul.f32 0.5, %v786_v50  ;;  %v6126_v50 = vld [vmem:[#allocation25_spill] sm:$0xff] }
 0x264   :  { %3459 = vtanh.f32 %v789_v51  ;;  %6122 = vst [vmem:[#allocation23_spill] sm:$0xff] %v4524_v46  ;;  %6124 = vst [vmem:[#allocation68_spill] sm:$0xff] %v4527_v48  ;;  %v6127_v51 = vld [vmem:[#allocation26_spill] sm:$0xff] }
 0x265   :  { %3461 = vtanh.f32 %v790_v52  ;;  %v6128_v52 = vld [vmem:[#allocation27_spill] sm:$0xff] }
 0x266   :  { %3463 = vtanh.f32 %v788_v53 }
 0x267   :  { %3465 = vtanh.f32 %v791_v56  ;;  %v6130_v56 = vsub.s32 3, %v6129_v55 }
 0x26e   :  { %v3460_v57 = vpop.eup %3459 }
 0x26f   :  { %v795_v58 = vmul.f32 0.5, %v3460_v57  ;;  %v3462_v59 = vpop.eup %3461  ;;  %v4535_v57 = vrot.slane %v3137_v26, %v6130_v56 }
 0x270   :  { %v796_v61 = vmul.f32 0.5, %v3462_v59  ;;  %v3464_v62 = vpop.eup %3463 }
 0x271   :  { %v798_v60 = vadd.f32 0.5, %v795_v58  ;;  %v3466_v36 = vpop.eup %3465  ;;  %6131 = vst [vmem:[#allocation24_spill] sm:$0xff] %v4535_v57 }
 0x272   :  { %v799_v63 = vadd.f32 0.5, %v796_v61  ;;  %v797_v37 = vmul.f32 0.5, %v3466_v36 }
 0x273   :  { %v806_v2 = vmul.f32 %v3464_v62, %v798_v60 }
 0x274   :  { %v805_v3 = vmul.f32 %v803_v0, %v799_v63  ;;  %v800_v39 = vadd.f32 0.5, %v797_v37  ;;  %v6132_v0 = vld [vmem:[#allocation28_spill] sm:$0xff] }
 0x276   :  { %v4497_v20 = vadd.f32 %v806_v2, %v805_v3  ;;  %v6133_v2 = vld [vmem:[#allocation29_spill] sm:$0xff] }
 0x278   :  { %3467 = vtanh.f32 %v4497_v20 }
 0x282   :  { %v3468_v40 = vpop.eup %3467 }
 0x283   :  { %v809_v41 = vmul.f32 %v3468_v40, %v800_v39  ;;  %v6134_v39 = vld [vmem:[#allocation30_spill] sm:$0xff]  ;;  %v6135_v40 = vld [vmem:[#allocation31_spill] sm:$0xff] }
 0x285   :  { %v1318_v42 = vpack.c.bf16 %v809_v41, %v809_v41 }
 0x287   :  { %v4500_v43 = vrot.slane %v1318_v42, 1 }
 0x289   :  { %1355 = vmatmul.mubr.bf16.vlgmr.msra.gmra.mrb[16].mxu0 %v4500_v43  ;;  %1396 = vmatmul.mubr.bf16.vlgmr.msra.gmra.mrb[16].mxu1 %v4500_v43 }
 0x28a   :  { %1449 = vmatpush1.bf16.msra.mxu0 %v4264_v28  ;;  %1490 = vmatpush1.bf16.msra.mxu1 %v4266_v15 }
 0x28b   :  { %1450 = vmatprep.subr.bf16.mxu0 %v4270_v22  ;;  %1491 = vmatprep.subr.bf16.mxu1 %v4272_v33 }
 0x28e   :  { %1451 = vmatpush1.bf16.msra.mxu0 %v4278_v38  ;;  %1492 = vmatpush1.bf16.msra.mxu1 %v4280_v23 }
 0x28f   :  { %1452 = vmatprep.subr.bf16.mxu0 %v4284_v24  ;;  %1493 = vmatprep.subr.bf16.mxu1 %v4286_v19 }
 0x292   :  { %1453 = vmatpush1.bf16.msra.mxu0 %v4290_v13  ;;  %1494 = vmatpush1.bf16.msra.mxu1 %v4292_v35 }
 0x293   :  { %1454 = vmatprep.subr.bf16.mxu0 %v4296_v12  ;;  %1495 = vmatprep.subr.bf16.mxu1 %v4298_v1 }
 0x296   :  { %1455 = vmatpush1.bf16.msra.mxu0 %v4302_v16  ;;  %1496 = vmatpush1.bf16.msra.mxu1 %v4304_v18 }
 0x297   :  { %1456 = vmatprep.subr.bf16.mxu0 %v4308_v8  ;;  %1497 = vmatprep.subr.bf16.mxu1 %v6120_v44 }
 0x29a   :  { %1457 = vmatpush1.bf16.msra.mxu0 %v6125_v49  ;;  %1498 = vmatpush1.bf16.msra.mxu1 %v6126_v50 }
 0x29b   :  { %1458 = vmatprep.subr.bf16.mxu0 %v6127_v51  ;;  %1499 = vmatprep.subr.bf16.mxu1 %v6128_v52 }
 0x29d   :  { %v1252_v53 = vpop.f32.mrb[12].mxu0  ;;  %v1293_v54 = vpop.f32.mrb[12].mxu1 }
 0x29e   :  { %v1253_v58 = vadd.f32 %v1252_v53, %v4524_v46  ;;  %v1254_v59 = vpop.f32.mrb[13].mxu0  ;;  %v1295_v60 = vpop.f32.mrb[13].mxu1  ;;  %1459 = vmatpush1.bf16.msra.mxu0 %v6132_v0  ;;  %1500 = vmatpush1.bf16.msra.mxu1 %v6133_v2  ;;  %v6136_v53 = vsub.s32 2, %v6129_v55 }
 0x29f   :  { %v1255_v61 = vadd.f32 %v1254_v59, %v4527_v48  ;;  %v1256_v62 = vpop.f32.mrb[14].mxu0  ;;  %v1297_v63 = vpop.f32.mrb[14].mxu1  ;;  %1460 = vmatprep.subr.bf16.mxu0 %v6134_v39  ;;  %1501 = vmatprep.subr.bf16.mxu1 %v6135_v40  ;;  %v1296_v42 = vadd.f32 %v1295_v60, %v4535_v57  ;;  %v6138_v59 = vld [vmem:[#allocation32_spill] sm:$0xff]  ;;  %v6144_v60 = vld [vmem:[#allocation38_spill] sm:$0xff] }
 0x2a0   :  { %v1300_v3 = vmul.f32 0.5, %v1253_v58  ;;  %v1257_v36 = vpop.f32.mrb[15].mxu0  ;;  %v1298_v37 = vpop.f32.mrb[15].mxu1  ;;  %v4546_v56 = vrot.slane %v3137_v26, %v6136_v53  ;;  %v6139_v62 = vld [vmem:[#allocation33_spill] sm:$0xff]  ;;  %v6140_v58 = vld [vmem:[#allocation34_spill] sm:$0xff]  ;;  %v6141_v63 = vld [vmem:[#allocation35_spill] sm:$0xff] }
 0x2a1   :  { %v1301_v41 = vmul.f32 0.5, %v1255_v61  ;;  %v6142_v61 = vld [vmem:[#allocation36_spill] sm:$0xff]  ;;  %v6145_v26 = vld [vmem:[#allocation39_spill] sm:$0xff]  ;;  %v6147_v53 = vld [vmem:[#allocation41_spill] sm:$0xff] }
 0x2a2   :  { %3469 = vtanh.f32 %v1300_v3  ;;  %6137 = vst [vmem:[#allocation25_spill] sm:$0xff] %v4546_v56  ;;  %1461 = vmatpush1.bf16.msra.mxu0 %v6138_v59  ;;  %1502 = vmatpush1.bf16.msra.mxu1 %v6139_v62  ;;  %v1294_v36 = vadd.f32 %v1293_v54, %v4546_v56  ;;  %v6143_v3 = vld [vmem:[#allocation37_spill] sm:$0xff]  ;;  %v6146_v37 = vld [vmem:[#allocation40_spill] sm:$0xff] }
 0x2a3   :  { %3471 = vtanh.f32 %v1301_v41  ;;  %1462 = vmatprep.subr.bf16.mxu0 %v6140_v58  ;;  %1503 = vmatprep.subr.bf16.mxu1 %v6141_v63 }
 0x2a4   :  { %3473 = vtanh.f32 %v1296_v42  ;;  %v1302_v55 = vmul.f32 0.5, %v1294_v36  ;;  %v6152_v36 = vld [vmem:[#allocation46_spill] sm:$0xff] }
 0x2a6   :  { %1463 = vmatpush1.bf16.msra.mxu0 %v6142_v61  ;;  %1504 = vmatpush1.bf16.msra.mxu1 %v6143_v3  ;;  %3475 = vtanh.f32 %v1302_v55  ;;  %v6150_v3 = vld [vmem:[#allocation44_spill] sm:$0xff]  ;;  %v6157_v55 = vld [vmem:[#allocation51_spill] sm:$0xff] }
 0x2a7   :  { %1464 = vmatprep.subr.bf16.mxu0 %v6144_v60  ;;  %1505 = vmatprep.subr.bf16.mxu1 %v6145_v26  ;;  %v6151_v60 = vld [vmem:[#allocation45_spill] sm:$0xff] }
 0x2aa   :  { %1465 = vmatpush1.bf16.msra.mxu0 %v6146_v37  ;;  %1506 = vmatpush1.bf16.msra.mxu1 %v6147_v53  ;;  %v6153_v37 = vld [vmem:[#allocation47_spill] sm:$0xff] }
 0x2ab   :  { %1466 = vmatprep.subr.bf16.mxu0 %v6148_v47  ;;  %1507 = vmatprep.subr.bf16.mxu1 %v6149_v45  ;;  %v6154_v47 = vld [vmem:[#allocation48_spill] sm:$0xff]  ;;  %v6155_v45 = vld [vmem:[#allocation49_spill] sm:$0xff] }
 0x2ac   :  { %v3470_v41 = vpop.eup %3469 }
 0x2ad   :  { %v1306_v42 = vmul.f32 0.5, %v3470_v41  ;;  %v3472_v54 = vpop.eup %3471  ;;  %v6156_v41 = vld [vmem:[#allocation50_spill] sm:$0xff] }
 0x2ae   :  { %v1307_v61 = vmul.f32 0.5, %v3472_v54  ;;  %1467 = vmatpush1.bf16.msra.mxu0 %v6150_v3  ;;  %1508 = vmatpush1.bf16.msra.mxu1 %v6151_v60  ;;  %v3474_v26 = vpop.eup %3473  ;;  %v6158_v54 = vld [vmem:[#allocation52_spill] sm:$0xff] }
 0x2af   :  { %v1309_v56 = vadd.f32 0.5, %v1306_v42  ;;  %1468 = vmatprep.subr.bf16.mxu0 %v6152_v36  ;;  %1509 = vmatprep.subr.bf16.mxu1 %v6153_v37  ;;  %v6159_v36 = vld [vmem:[#allocation53_spill] sm:$0xff]  ;;  %v6160_v37 = vld [vmem:[#allocation54_spill] sm:$0xff] }
 0x2b0   :  { %v1310_v53 = vadd.f32 0.5, %v1307_v61  ;;  %v3476_v61 = vpop.eup %3475 }
 0x2b1   :  { %v1314_v63 = vmul.f32 %v3474_v26, %v1309_v56  ;;  %v6161_v56 = vld [vmem:[#allocation55_spill] sm:$0xff]  ;;  %v6162_v26 = vld [vmem:[#allocation56_spill] sm:$0xff] }
 0x2b2   :  { %v1313_v58 = vmul.f32 0.0, %v1310_v53  ;;  %1469 = vmatpush1.bf16.msra.mxu0 %v6154_v47  ;;  %1510 = vmatpush1.bf16.msra.mxu1 %v6155_v45  ;;  %v6163_v53 = vld [vmem:[#allocation57_spill] sm:$0xff]  ;;  %v6164_v45 = vld [vmem:[#allocation58_spill] sm:$0xff] }
 0x2b3   :  { %1470 = vmatprep.subr.bf16.mxu0 %v6156_v41  ;;  %1511 = vmatprep.subr.bf16.mxu1 %v6157_v55  ;;  %v1308_v41 = vmul.f32 0.5, %v3476_v61 }
 0x2b4   :  { %v4569_v42 = vadd.f32 %v1314_v63, %v1313_v58  ;;  %v6165_v58 = vld [vmem:[#allocation59_spill] sm:$0xff]  ;;  %v6166_v63 = vld [vmem:[#allocation60_spill] sm:$0xff] }
 0x2b6   :  { %3477 = vtanh.f32 %v4569_v42  ;;  %1471 = vmatpush1.bf16.msra.mxu0 %v6158_v54  ;;  %1512 = vmatpush1.bf16.msra.mxu1 %v6159_v36  ;;  %v1311_v54 = vadd.f32 0.5, %v1308_v41  ;;  %v6169_v41 = vld [vmem:[#allocation65_spill] sm:$0xff] }
 0x2b7   :  { %1472 = vmatprep.subr.bf16.mxu0 %v6160_v37  ;;  %1513 = vmatprep.subr.bf16.mxu1 %v6161_v56 }
 0x2ba   :  { %1473 = vmatpush1.bf16.msra.mxu0 %v6162_v26  ;;  %1514 = vmatpush1.bf16.msra.mxu1 %v6163_v53  ;;  %v4587_v26 = vld [vmem:[%s5738_s5] ss:$0 sm:$0xff] }
 0x2bb   :  { %1474 = vmatprep.subr.bf16.mxu0 %v6164_v45  ;;  %1515 = vmatprep.subr.bf16.mxu1 %v6165_v58  ;;  %6167 = vst [vmem:[#allocation26_spill] sm:$0xff] %v4587_v26 }
 0x2be   :  { %1475 = vmatpush1.bf16.msra.mxu0 %v6166_v63  ;;  %1516 = vmatpush1.bf16.msra.mxu1 %v4424_v27 }
 0x2bf   :  { %1476 = vmatprep.subr.bf16.mxu0 %v4428_v30  ;;  %1517 = vmatprep.subr.bf16.mxu1 %v4430_v29 }
 0x2c0   :  { %v3478_v56 = vpop.eup %3477 }
 0x2c1   :  { %v4589_v61 = vmul.f32 %v3478_v56, %v1311_v54  ;;  %v4601_v56 = vld [vmem:[#allocation6 + $0x4] ss:$16 sps:$4 sm:$0xff]  }
 0x2c2   :  { %1477 = vmatpush1.bf16.msra.mxu0 %v4434_v25  ;;  %1518 = vmatpush1.bf16.msra.mxu1 %v4436_v9  ;;  %6170 = vst [vmem:[#allocation16_spill] sm:$0xff] %v4601_v56 }
 0x2c3   :  { %6168 = vst [vmem:[#allocation27_spill] sm:$0xff] %v4589_v61  ;;  %1478 = vmatprep.subr.bf16.mxu0 %v4440_v14  ;;  %1519 = vmatprep.subr.bf16.mxu1 %v6169_v41  ;;  %v2797_v29 = vmul.f32 %v4587_v26, %v4589_v61  ;;  %v1442_v30 = vrot.slane %v4589_v61, 6  ;;  %v4604_v14 = vld [vmem:[#allocation6 + $0xc] ss:$16 sps:$4 sm:$0xff]   ;;  %v4629_v61 = vld [vmem:[#allocation6 + $0x44] ss:$16 sps:$4 sm:$0xff]  }
 0x2c4   :  { %6171 = vst [vmem:[#allocation28_spill] sm:$0xff] %v4604_v14  ;;  %6178 = vst [vmem:[#allocation45_spill] sm:$0xff] %v4629_v61 }
 0x2c5   :  { %v2799_v27 = vsel %vm2798_vm0, %v2797_v29, 0.0  ;;  %v1444_v63 = vpack.c.bf16 %v1442_v30, %v1442_v30  ;;  %v4612_v29 = vld [vmem:[#allocation6 + $0x8] ss:$16 sps:$4 sm:$0xff]   ;;  %v4615_v30 = vld [vmem:[#allocation6 + $0x24] ss:$16 sps:$4 sm:$0xff]  }
 0x2c6   :  { %2800 = vadd.xlane.f32.xlu0 %v2799_v27  ;;  %1479 = vmatpush1.bf16.msra.mxu0 %v4446_v34  ;;  %v4609_v27 = vld [vmem:[#allocation6] ss:$16 sps:$4 sm:$0xff]   ;;  %6173 = vst [vmem:[#allocation30_spill] sm:$0xff] %v4612_v29  ;;  %6174 = vst [vmem:[#allocation31_spill] sm:$0xff] %v4615_v30 }
 0x2c7   :  { %1520 = vmatpush1.bf16.msra.mxu1 %v4448_v21  ;;  %v1446_v54 = vrot.slane %v1444_v63, 1  ;;  %1552 = vmatprep.subr.bf16.mxu0 %v4601_v56  ;;  %6172 = vst [vmem:[#allocation29_spill] sm:$0xff] %v4609_v27  ;;  %v4618_v63 = vld [vmem:[#allocation6 + $0x2c] ss:$16 sps:$4 sm:$0xff]  }
 0x2c8   :  { %1593 = vmatprep.subr.bf16.mxu1 %v4604_v14  ;;  %6175 = vst [vmem:[#allocation32_spill] sm:$0xff] %v4618_v63 }
 0x2c9   :  { %1480 = vmatprep.mubr.bf16.mxu0 %v1446_v54  ;;  %1521 = vmatprep.mubr.bf16.mxu1 %v1446_v54  ;;  %v4626_v54 = vld [vmem:[#allocation6 + $0x28] ss:$16 sps:$4 sm:$0xff]  }
 0x2ca   :  { %1481 = vmatmul.mubr.bf16.vlgmr.msra.gmra.mrb[20].mxu0 %v4500_v43  ;;  %1522 = vmatmul.mubr.bf16.vlgmr.msra.gmra.mrb[20].mxu1 %v4500_v43  ;;  %v4623_v43 = vld [vmem:[#allocation6 + $0x20] ss:$16 sps:$4 sm:$0xff]   ;;  %6177 = vst [vmem:[#allocation44_spill] sm:$0xff] %v4626_v54 }
 0x2cb   :  { %1553 = vmatpush1.bf16.msra.mxu0 %v4609_v27  ;;  %1594 = vmatpush1.bf16.msra.mxu1 %v4612_v29  ;;  %6176 = vst [vmem:[#allocation33_spill] sm:$0xff] %v4623_v43 }
 0x2cc   :  { %1554 = vmatprep.subr.bf16.mxu0 %v4615_v30  ;;  %1595 = vmatprep.subr.bf16.mxu1 %v4618_v63  ;;  %v4632_v30 = vld [vmem:[#allocation6 + $0x4c] ss:$16 sps:$4 sm:$0xff]   ;;  %v4635_v63 = vld [vmem:[#allocation6 + $0x40] ss:$16 sps:$4 sm:$0xff]  }
 0x2cd   :  { %1584 = vmatprep.mubr.bf16.mxu0 %v6119_v10  ;;  %1625 = vmatprep.mubr.bf16.mxu1 %v6119_v10  ;;  %6179 = vst [vmem:[#allocation48_spill] sm:$0xff] %v4632_v30  ;;  %6180 = vst [vmem:[#allocation51_spill] sm:$0xff] %v4635_v63  ;;  %v4638_v10 = vld [vmem:[#allocation6 + $0x48] ss:$16 sps:$4 sm:$0xff]  }
 0x2ce   :  { %6181 = vst [vmem:[#allocation53_spill] sm:$0xff] %v4638_v10 }
 0x2cf   :  { %1555 = vmatpush1.bf16.msra.mxu0 %v4623_v43  ;;  %1596 = vmatpush1.bf16.msra.mxu1 %v4626_v54  ;;  %v4641_v43 = vld [vmem:[#allocation6 + $0x64] ss:$16 sps:$4 sm:$0xff]   ;;  %v4644_v54 = vld [vmem:[#allocation6 + $0x6c] ss:$16 sps:$4 sm:$0xff]  }
 0x2d0   :  { %1556 = vmatprep.subr.bf16.mxu0 %v4629_v61  ;;  %1597 = vmatprep.subr.bf16.mxu1 %v4632_v30  ;;  %6182 = vst [vmem:[#allocation54_spill] sm:$0xff] %v4641_v43  ;;  %6183 = vst [vmem:[#allocation57_spill] sm:$0xff] %v4644_v54  ;;  %v4647_v61 = vld [vmem:[#allocation6 + $0x60] ss:$16 sps:$4 sm:$0xff]   ;;  %v4650_v30 = vld [vmem:[#allocation6 + $0x68] ss:$16 sps:$4 sm:$0xff]  }
 0x2d1   :  { %6184 = vst [vmem:[#allocation58_spill] sm:$0xff] %v4647_v61  ;;  %6185 = vst [vmem:[#allocation59_spill] sm:$0xff] %v4650_v30 }
 0x2d3   :  { %1557 = vmatpush1.bf16.msra.mxu0 %v4635_v63  ;;  %1598 = vmatpush1.bf16.msra.mxu1 %v4638_v10  ;;  %v4653_v63 = vld [vmem:[#allocation6 + $0x84] ss:$16 sps:$4 sm:$0xff]   ;;  %v4656_v10 = vld [vmem:[#allocation6 + $0x8c] ss:$16 sps:$4 sm:$0xff]  }
 0x2d4   :  { %1558 = vmatprep.subr.bf16.mxu0 %v4641_v43  ;;  %1599 = vmatprep.subr.bf16.mxu1 %v4644_v54  ;;  %6186 = vst [vmem:[#allocation69_spill] sm:$0xff] %v4653_v63  ;;  %6187 = vst [vmem:[#allocation70_spill] sm:$0xff] %v4656_v10  ;;  %v4659_v43 = vld [vmem:[#allocation6 + $0x80] ss:$16 sps:$4 sm:$0xff]   ;;  %v4662_v54 = vld [vmem:[#allocation6 + $0x88] ss:$16 sps:$4 sm:$0xff]  }
 0x2d5   :  { %6188 = vst [vmem:[#allocation71_spill] sm:$0xff] %v4659_v43  ;;  %6189 = vst [vmem:[#allocation72_spill] sm:$0xff] %v4662_v54 }
 0x2d7   :  { %1559 = vmatpush1.bf16.msra.mxu0 %v4647_v61  ;;  %1600 = vmatpush1.bf16.msra.mxu1 %v4650_v30  ;;  %v4665_v61 = vld [vmem:[#allocation6 + $0xa4] ss:$16 sps:$4 sm:$0xff]   ;;  %v4668_v30 = vld [vmem:[#allocation6 + $0xac] ss:$16 sps:$4 sm:$0xff]  }
 0x2d8   :  { %1560 = vmatprep.subr.bf16.mxu0 %v4653_v63  ;;  %1601 = vmatprep.subr.bf16.mxu1 %v4656_v10  ;;  %6190 = vst [vmem:[#allocation73_spill] sm:$0xff] %v4665_v61  ;;  %6191 = vst [vmem:[#allocation74_spill] sm:$0xff] %v4668_v30  ;;  %v4671_v63 = vld [vmem:[#allocation6 + $0xa0] ss:$16 sps:$4 sm:$0xff]   ;;  %v4674_v10 = vld [vmem:[#allocation6 + $0xa8] ss:$16 sps:$4 sm:$0xff]  }
 0x2d9   :  { %6192 = vst [vmem:[#allocation75_spill] sm:$0xff] %v4671_v63  ;;  %6193 = vst [vmem:[#allocation76_spill] sm:$0xff] %v4674_v10 }
 0x2db   :  { %1561 = vmatpush1.bf16.msra.mxu0 %v4659_v43  ;;  %1602 = vmatpush1.bf16.msra.mxu1 %v4662_v54  ;;  %v4677_v43 = vld [vmem:[#allocation6 + $0xc4] ss:$16 sps:$4 sm:$0xff]   ;;  %v4680_v54 = vld [vmem:[#allocation6 + $0xcc] ss:$16 sps:$4 sm:$0xff]  }
 0x2dc   :  { %1562 = vmatprep.subr.bf16.mxu0 %v4665_v61  ;;  %1603 = vmatprep.subr.bf16.mxu1 %v4668_v30  ;;  %6194 = vst [vmem:[#allocation77_spill] sm:$0xff] %v4677_v43  ;;  %6195 = vst [vmem:[#allocation78_spill] sm:$0xff] %v4680_v54  ;;  %v4683_v61 = vld [vmem:[#allocation6 + $0xc0] ss:$16 sps:$4 sm:$0xff]   ;;  %v4686_v30 = vld [vmem:[#allocation6 + $0xc8] ss:$16 sps:$4 sm:$0xff]  }
 0x2dd   :  { %6196 = vst [vmem:[#allocation79_spill] sm:$0xff] %v4683_v61  ;;  %6197 = vst [vmem:[#allocation80_spill] sm:$0xff] %v4686_v30 }
 0x2df   :  { %1563 = vmatpush1.bf16.msra.mxu0 %v4671_v63  ;;  %1604 = vmatpush1.bf16.msra.mxu1 %v4674_v10  ;;  %v4689_v63 = vld [vmem:[#allocation6 + $0xe4] ss:$16 sps:$4 sm:$0xff]   ;;  %v4692_v10 = vld [vmem:[#allocation6 + $0xec] ss:$16 sps:$4 sm:$0xff]  }
 0x2e0   :  { %1564 = vmatprep.subr.bf16.mxu0 %v4677_v43  ;;  %1605 = vmatprep.subr.bf16.mxu1 %v4680_v54  ;;  %6198 = vst [vmem:[#allocation81_spill] sm:$0xff] %v4689_v63  ;;  %6199 = vst [vmem:[#allocation82_spill] sm:$0xff] %v4692_v10 }
 0x2e3   :  { %1565 = vmatpush1.bf16.msra.mxu0 %v4683_v61  ;;  %1606 = vmatpush1.bf16.msra.mxu1 %v4686_v30 }
 0x2e4   :  { %1566 = vmatprep.subr.bf16.mxu0 %v4689_v63  ;;  %1607 = vmatprep.subr.bf16.mxu1 %v4692_v10 }
 0x2e7   :  { %1567 = vmatpush1.bf16.msra.mxu0 %v4170_v4  ;;  %1608 = vmatpush1.bf16.msra.mxu1 %v4172_v5 }
 0x2e8   :  { %1678 = vmatprep.subr.bf16.mxu0 %v4216_v6  ;;  %1719 = vmatprep.subr.bf16.mxu1 %v4218_v7 }
 0x35c   :  { %v1356_v61 = vpop.f32.mrb[16].mxu0  ;;  %v1397_v54 = vpop.f32.mrb[16].mxu1 }
 0x35d   :  { %v1408_v43 = vrot.slane %v1356_v61, 4  ;;  %v1358_v30 = vpop.f32.mrb[17].mxu0  ;;  %v1399_v29 = vpop.f32.mrb[17].mxu1  ;;  %v1410_v7 = vrot.slane %v1397_v54, 4 }
 0x35e   :  { %v1409_v27 = vrot.slane %v1358_v30, 4  ;;  %v1360_v14 = vpop.f32.mrb[18].mxu0  ;;  %v1401_v63 = vpop.f32.mrb[18].mxu1  ;;  %v1411_v21 = vrot.slane %v1399_v29, 4 }
 0x35f   :  { %v1416_v56 = vadd.f32 %v1408_v43, %v4249_v31  ;;  %v1361_v10 = vpop.f32.mrb[19].mxu0  ;;  %v1402_v34 = vpop.f32.mrb[19].mxu1  ;;  %v1418_v61 = vadd.f32 %v1410_v7, %v4258_v17 }
 0x360   :  { %v1417_v4 = vadd.f32 %v1409_v27, %v4251_v32  ;;  %v1419_v6 = vadd.f32 %v1411_v21, %v4255_v11 }
 0x361   :  { %v1420_v5 = vmul.f32 0.5, %v1416_v56  ;;  %v1422_v30 = vmul.f32 0.5, %v1418_v61  ;;  %v1434_v56 = vrot.slane %v4497_v20, 6  ;;  %v6202_v20 = vld [vmem:[#allocation36_spill] sm:$0xff] }
 0x362   :  { %v1421_v26 = vmul.f32 0.5, %v1417_v4 }
 0x363   :  { %3479 = vtanh.f32 %v1420_v5 }
 0x364   :  { %3481 = vtanh.f32 %v1421_v26 }
 0x365   :  { %3483 = vtanh.f32 %v1419_v6 }
 0x366   :  { %3485 = vtanh.f32 %v1422_v30 }
 0x36d   :  { %v3480_v14 = vpop.eup %3479 }
 0x36e   :  { %v1426_v63 = vmul.f32 0.5, %v3480_v14  ;;  %v3482_v41 = vpop.eup %3481 }
 0x36f   :  { %v1427_v10 = vmul.f32 0.5, %v3482_v41  ;;  %v3484_v34 = vpop.eup %3483 }
 0x370   :  { %v1429_v43 = vadd.f32 0.5, %v1426_v63  ;;  %v3486_v21 = vpop.eup %3485 }
 0x371   :  { %v1430_v29 = vadd.f32 0.5, %v1427_v10  ;;  %v1428_v26 = vmul.f32 0.5, %v3486_v21  ;;  %v6211_v10 = vld [vmem:[#allocation46_spill] sm:$0xff] }
 0x372   :  { %v1437_v27 = vmul.f32 %v3484_v34, %v1429_v43  ;;  %v6212_v34 = vld [vmem:[#allocation47_spill] sm:$0xff] }
 0x373   :  { %v1436_v4 = vmul.f32 %v1434_v56, %v1430_v29  ;;  %v1431_v54 = vadd.f32 0.5, %v1428_v26  ;;  %v6214_v26 = vld [vmem:[#allocation50_spill] sm:$0xff] }
 0x375   :  { %v4704_v5 = vadd.f32 %v1437_v27, %v1436_v4  ;;  %v6213_v4 = vld [vmem:[#allocation49_spill] sm:$0xff] }
 0x377   :  { %3487 = vtanh.f32 %v4704_v5 }
 0x381   :  { %v3488_v6 = vpop.eup %3487 }
 0x382   :  { %v1440_v7 = vmul.f32 %v3488_v6, %v1431_v54  ;;  %v6216_v54 = vld [vmem:[#allocation55_spill] sm:$0xff]  ;;  %v6217_v6 = vld [vmem:[#allocation56_spill] sm:$0xff] }
 0x384   :  { %v1548_v61 = vpack.c.bf16 %v1440_v7, %v1440_v7  ;;  %v6219_v7 = vld [vmem:[#allocation61_spill] sm:$0xff] }
 0x386   :  { %v4707_v14 = vrot.slane %v1548_v61, 2  ;;  %v6221_v61 = vld [vmem:[#allocation63_spill] sm:$0xff] }
 0x388   :  { %1585 = vmatmul.mubr.bf16.vlgmr.msra.gmra.mrb[24].mxu0 %v4707_v14  ;;  %1626 = vmatmul.mubr.bf16.vlgmr.msra.gmra.mrb[24].mxu1 %v4707_v14 }
 0x389   :  { %1679 = vmatpush1.bf16.msra.mxu0 %v4264_v28  ;;  %1720 = vmatpush1.bf16.msra.mxu1 %v4266_v15 }
 0x38a   :  { %1680 = vmatprep.subr.bf16.mxu0 %v4270_v22  ;;  %1721 = vmatprep.subr.bf16.mxu1 %v4272_v33 }
 0x38d   :  { %1681 = vmatpush1.bf16.msra.mxu0 %v4278_v38  ;;  %1722 = vmatpush1.bf16.msra.mxu1 %v4280_v23 }
 0x38e   :  { %1682 = vmatprep.subr.bf16.mxu0 %v4284_v24  ;;  %1723 = vmatprep.subr.bf16.mxu1 %v4286_v19 }
 0x391   :  { %1683 = vmatpush1.bf16.msra.mxu0 %v4290_v13  ;;  %1724 = vmatpush1.bf16.msra.mxu1 %v4292_v35 }
 0x392   :  { %1684 = vmatprep.subr.bf16.mxu0 %v4296_v12  ;;  %1725 = vmatprep.subr.bf16.mxu1 %v4298_v1 }
 0x395   :  { %1685 = vmatpush1.bf16.msra.mxu0 %v4302_v16  ;;  %1726 = vmatpush1.bf16.msra.mxu1 %v4304_v18  ;;  %v6200_v18 = vld [vmem:[#allocation34_spill] sm:$0xff] }
 0x396   :  { %1686 = vmatprep.subr.bf16.mxu0 %v4308_v8  ;;  %1727 = vmatprep.subr.bf16.mxu1 %v6120_v44  ;;  %v6201_v8 = vld [vmem:[#allocation35_spill] sm:$0xff]  ;;  %v6203_v44 = vld [vmem:[#allocation37_spill] sm:$0xff] }
 0x399   :  { %1687 = vmatpush1.bf16.msra.mxu0 %v6125_v49  ;;  %1728 = vmatpush1.bf16.msra.mxu1 %v6126_v50  ;;  %v6204_v49 = vld [vmem:[#allocation25_spill] sm:$0xff] }
 0x39a   :  { %1688 = vmatprep.subr.bf16.mxu0 %v6127_v51  ;;  %1729 = vmatprep.subr.bf16.mxu1 %v6128_v52  ;;  %v6205_v51 = vld [vmem:[#allocation38_spill] sm:$0xff]  ;;  %v6206_v52 = vld [vmem:[#allocation39_spill] sm:$0xff] }
 0x39d   :  { %v1482_v28 = vpop.f32.mrb[20].mxu0  ;;  %v1523_v15 = vpop.f32.mrb[20].mxu1  ;;  %1689 = vmatpush1.bf16.msra.mxu0 %v6132_v0  ;;  %1730 = vmatpush1.bf16.msra.mxu1 %v6133_v2  ;;  %v6207_v0 = vld [vmem:[#allocation40_spill] sm:$0xff]  ;;  %v6208_v2 = vld [vmem:[#allocation41_spill] sm:$0xff] }
 0x39e   :  { %v1483_v22 = vadd.f32 %v1482_v28, %v4524_v46  ;;  %v1484_v33 = vpop.f32.mrb[21].mxu0  ;;  %v1525_v38 = vpop.f32.mrb[21].mxu1  ;;  %1690 = vmatprep.subr.bf16.mxu0 %v6134_v39  ;;  %1731 = vmatprep.subr.bf16.mxu1 %v6135_v40  ;;  %v1524_v50 = vadd.f32 %v1523_v15, %v6204_v49  ;;  %v6209_v40 = vld [vmem:[#allocation42_spill] sm:$0xff] }
 0x39f   :  { %v1485_v23 = vadd.f32 %v1484_v33, %v4527_v48  ;;  %v1486_v24 = vpop.f32.mrb[22].mxu0  ;;  %v1527_v19 = vpop.f32.mrb[22].mxu1  ;;  %v1526_v16 = vadd.f32 %v1525_v38, %v4535_v57  ;;  %v6225_v15 = vld [vmem:[#allocation26_spill] sm:$0xff] }
 0x3a0   :  { %v1530_v13 = vmul.f32 0.5, %v1483_v22  ;;  %v1487_v35 = vpop.f32.mrb[23].mxu0  ;;  %v1528_v12 = vpop.f32.mrb[23].mxu1  ;;  %v1532_v39 = vmul.f32 0.5, %v1524_v50  ;;  %v6227_v24 = vld [vmem:[#allocation67_spill] sm:$0xff]  ;;  %v6238_v50 = vld [vmem:[#allocation48_spill] sm:$0xff] }
 0x3a1   :  { %v1531_v1 = vmul.f32 0.5, %v1485_v23  ;;  %1691 = vmatpush1.bf16.msra.mxu0 %v6138_v59  ;;  %1732 = vmatpush1.bf16.msra.mxu1 %v6139_v62  ;;  %v6210_v59 = vld [vmem:[#allocation43_spill] sm:$0xff]  ;;  %v6226_v23 = vld [vmem:[#allocation66_spill] sm:$0xff]  ;;  %v6230_v35 = vld [vmem:[#allocation29_spill] sm:$0xff] }
 0x3a2   :  { %3489 = vtanh.f32 %v1530_v13  ;;  %1692 = vmatprep.subr.bf16.mxu0 %v6200_v18  ;;  %1733 = vmatprep.subr.bf16.mxu1 %v6201_v8  ;;  %v6229_v13 = vld [vmem:[#allocation28_spill] sm:$0xff]  ;;  %v6231_v12 = vld [vmem:[#allocation30_spill] sm:$0xff]  ;;  %v6234_v18 = vmov 0   ;;  %v6235_v8 = vld [vmem:[#allocation33_spill] sm:$0xff] }
 0x3a3   :  { %3491 = vtanh.f32 %v1531_v1  ;;  %v6232_v1 = vld [vmem:[#allocation31_spill] sm:$0xff] }
 0x3a4   :  { %3493 = vtanh.f32 %v1526_v16  ;;  %v6233_v16 = vld [vmem:[#allocation32_spill] sm:$0xff] }
 0x3a5   :  { %1693 = vmatpush1.bf16.msra.mxu0 %v6202_v20  ;;  %1734 = vmatpush1.bf16.msra.mxu1 %v6203_v44  ;;  %3495 = vtanh.f32 %v1532_v39  ;;  %v6236_v20 = vld [vmem:[#allocation44_spill] sm:$0xff]  ;;  %v6237_v44 = vld [vmem:[#allocation45_spill] sm:$0xff]  ;;  %v6244_v39 = vld [vmem:[#allocation59_spill] sm:$0xff] }
 0x3a6   :  { %1694 = vmatprep.subr.bf16.mxu0 %v6205_v51  ;;  %1735 = vmatprep.subr.bf16.mxu1 %v6206_v52  ;;  %v6240_v51 = vld [vmem:[#allocation53_spill] sm:$0xff]  ;;  %v6241_v52 = vld [vmem:[#allocation54_spill] sm:$0xff] }
 0x3a9   :  { %1695 = vmatpush1.bf16.msra.mxu0 %v6207_v0  ;;  %1736 = vmatpush1.bf16.msra.mxu1 %v6208_v2  ;;  %v6242_v0 = vld [vmem:[#allocation57_spill] sm:$0xff]  ;;  %v6243_v2 = vld [vmem:[#allocation58_spill] sm:$0xff] }
 0x3aa   :  { %1696 = vmatprep.subr.bf16.mxu0 %v6209_v40  ;;  %1737 = vmatprep.subr.bf16.mxu1 %v6210_v59  ;;  %v6245_v40 = vld [vmem:[#allocation69_spill] sm:$0xff]  ;;  %v6246_v59 = vld [vmem:[#allocation70_spill] sm:$0xff] }
 0x3ac   :  { %v3490_v62 = vpop.eup %3489 }
 0x3ad   :  { %v1536_v41 = vmul.f32 0.5, %v3490_v62  ;;  %v3492_v30 = vpop.eup %3491  ;;  %1697 = vmatpush1.bf16.msra.mxu0 %v6150_v3  ;;  %1738 = vmatpush1.bf16.msra.mxu1 %v6151_v60  ;;  %v6215_v60 = vld [vmem:[#allocation52_spill] sm:$0xff]  ;;  %v6247_v62 = vld [vmem:[#allocation71_spill] sm:$0xff] }
 0x3ae   :  { %v1537_v43 = vmul.f32 0.5, %v3492_v30  ;;  %1698 = vmatprep.subr.bf16.mxu0 %v6211_v10  ;;  %1739 = vmatprep.subr.bf16.mxu1 %v6212_v34  ;;  %v3494_v29 = vpop.eup %3493  ;;  %v6249_v30 = vld [vmem:[#allocation73_spill] sm:$0xff]  ;;  %v6252_v10 = vld [vmem:[#allocation76_spill] sm:$0xff] }
 0x3af   :  { %v1539_v63 = vadd.f32 0.5, %v1536_v41  ;;  %v6248_v41 = vld [vmem:[#allocation72_spill] sm:$0xff]  ;;  %v6253_v34 = vld [vmem:[#allocation77_spill] sm:$0xff] }
 0x3b0   :  { %v1540_v56 = vadd.f32 0.5, %v1537_v43  ;;  %v6251_v43 = vld [vmem:[#allocation75_spill] sm:$0xff] }
 0x3b1   :  { %v1544_v27 = vmul.f32 %v3494_v29, %v1539_v63  ;;  %1699 = vmatpush1.bf16.msra.mxu0 %v6154_v47  ;;  %1740 = vmatpush1.bf16.msra.mxu1 %v6213_v4  ;;  %v3496_v47 = vpop.eup %3495  ;;  %v6250_v63 = vld [vmem:[#allocation74_spill] sm:$0xff]  ;;  %v6257_v4 = vld [vmem:[#allocation81_spill] sm:$0xff] }
 0x3b2   :  { %v1543_v21 = vmul.f32 %v1540_v56, %v4569_v42  ;;  %1700 = vmatprep.subr.bf16.mxu0 %v6214_v26  ;;  %1741 = vmatprep.subr.bf16.mxu1 %v6157_v55  ;;  %v1538_v55 = vmul.f32 0.5, %v3496_v47  ;;  %v6218_v42 = vld [vmem:[#allocation60_spill] sm:$0xff]  ;;  %v6254_v29 = vld [vmem:[#allocation78_spill] sm:$0xff]  ;;  %v6255_v56 = vld [vmem:[#allocation79_spill] sm:$0xff] }
 0x3b3   :  { %v4821_v26 = vld [vmem:[#allocation6 + $0xe0] ss:$16 sps:$4 sm:$0xff]   ;;  %v4830_v47 = vld [vmem:[#allocation8 + $0xc] ss:$16 sps:$4 sm:$0xff]  }
 0x3b4   :  { %v4760_v3 = vadd.f32 %v1544_v27, %v1543_v21  ;;  %v6256_v27 = vld [vmem:[#allocation80_spill] sm:$0xff]  ;;  %v6258_v21 = vld [vmem:[#allocation82_spill] sm:$0xff] }
 0x3b5   :  { %1701 = vmatpush1.bf16.msra.mxu0 %v6215_v60  ;;  %1742 = vmatpush1.bf16.msra.mxu1 %v6159_v36  ;;  %v6220_v36 = vld [vmem:[#allocation62_spill] sm:$0xff] }
 0x3b6   :  { %3497 = vtanh.f32 %v4760_v3  ;;  %1702 = vmatprep.subr.bf16.mxu0 %v6160_v37  ;;  %1743 = vmatprep.subr.bf16.mxu1 %v6216_v54  ;;  %v1541_v37 = vadd.f32 0.5, %v1538_v55  ;;  %v4824_v60 = vld [vmem:[#allocation6 + $0xe8] ss:$16 sps:$4 sm:$0xff]   ;;  %v4827_v54 = vld [vmem:[#allocation8 + $0x4] ss:$16 sps:$4 sm:$0xff]  }
 0x3b9   :  { %1703 = vmatpush1.bf16.msra.mxu0 %v6217_v6  ;;  %1744 = vmatpush1.bf16.msra.mxu1 %v6163_v53 }
 0x3ba   :  { %1704 = vmatprep.subr.bf16.mxu0 %v6164_v45  ;;  %1745 = vmatprep.subr.bf16.mxu1 %v6165_v58  ;;  %v6223_v45 = vld [vmem:[#allocation64_spill] sm:$0xff]  ;;  %v6224_v58 = vld [vmem:[#allocation65_spill] sm:$0xff] }
 0x3bd   :  { %1705 = vmatpush1.bf16.msra.mxu0 %v6218_v42  ;;  %1746 = vmatpush1.bf16.msra.mxu1 %v6219_v7 }
 0x3be   :  { %1706 = vmatprep.subr.bf16.mxu0 %v6220_v36  ;;  %1747 = vmatprep.subr.bf16.mxu1 %v6221_v61 }
 0x3c0   :  { %v3498_v28 = vpop.eup %3497 }
 0x3c1   :  { %1707 = vmatpush1.bf16.msra.mxu0 %v4434_v25  ;;  %1748 = vmatpush1.bf16.msra.mxu1 %v4436_v9  ;;  %v4777_v53 = vmul.f32 %v3498_v28, %v1541_v37  ;;  %v6228_v9 = vld [vmem:[#allocation16_spill] sm:$0xff] }
 0x3c2   :  { %1708 = vmatprep.subr.bf16.mxu0 %v6223_v45  ;;  %1749 = vmatprep.subr.bf16.mxu1 %v6224_v58 }
 0x3c3   :  { %6222 = vst [vmem:[#allocation34_spill] sm:$0xff] %v4777_v53  ;;  %v2804_v22 = vmul.f32 %v6225_v15, %v4777_v53  ;;  %v1672_v33 = vrot.slane %v4777_v53, 4 }
 0x3c5   :  { %v2805_v38 = vsel %vm2798_vm0, %v2804_v22, 0.0  ;;  %1709 = vmatpush1.bf16.msra.mxu0 %v6226_v23  ;;  %1750 = vmatpush1.bf16.msra.mxu1 %v6227_v24  ;;  %v1674_v25 = vpack.c.bf16 %v1672_v33, %v1672_v33 }
 0x3c6   :  { %2806 = vadd.xlane.f32.xlu0 %v2805_v38  ;;  %1782 = vmatprep.subr.bf16.mxu0 %v6228_v9 }
 0x3c7   :  { %v1676_v19 = vrot.slane %v1674_v25, 2  ;;  %1823 = vmatprep.subr.bf16.mxu1 %v6229_v13 }
 0x3c9   :  { %1710 = vmatprep.mubr.bf16.mxu0 %v1676_v19  ;;  %1751 = vmatprep.mubr.bf16.mxu1 %v1676_v19 }
 0x3ca   :  { %1711 = vmatmul.mubr.bf16.vlgmr.msra.gmra.mrb[28].mxu0 %v4707_v14  ;;  %1752 = vmatmul.mubr.bf16.vlgmr.msra.gmra.mrb[28].mxu1 %v4707_v14  ;;  %v6239_v14 = vld [vmem:[#allocation51_spill] sm:$0xff] }
 0x3cb   :  { %1783 = vmatpush1.bf16.msra.mxu0 %v6230_v35  ;;  %1824 = vmatpush1.bf16.msra.mxu1 %v6231_v12 }
 0x3cc   :  { %1784 = vmatprep.subr.bf16.mxu0 %v6232_v1  ;;  %1825 = vmatprep.subr.bf16.mxu1 %v6233_v16 }
 0x3cd   :  { %1814 = vmatprep.mubr.bf16.mxu0 %v6234_v18  ;;  %1855 = vmatprep.mubr.bf16.mxu1 %v6234_v18 }
 0x3cf   :  { %1785 = vmatpush1.bf16.msra.mxu0 %v6235_v8  ;;  %1826 = vmatpush1.bf16.msra.mxu1 %v6236_v20 }
 0x3d0   :  { %1786 = vmatprep.subr.bf16.mxu0 %v6237_v44  ;;  %1827 = vmatprep.subr.bf16.mxu1 %v6238_v50 }
 0x3d3   :  { %1787 = vmatpush1.bf16.msra.mxu0 %v6239_v14  ;;  %1828 = vmatpush1.bf16.msra.mxu1 %v6240_v51 }
 0x3d4   :  { %1788 = vmatprep.subr.bf16.mxu0 %v6241_v52  ;;  %1829 = vmatprep.subr.bf16.mxu1 %v6242_v0 }
 0x3d7   :  { %1789 = vmatpush1.bf16.msra.mxu0 %v6243_v2  ;;  %1830 = vmatpush1.bf16.msra.mxu1 %v6244_v39 }
 0x3d8   :  { %1790 = vmatprep.subr.bf16.mxu0 %v6245_v40  ;;  %1831 = vmatprep.subr.bf16.mxu1 %v6246_v59 }
 0x3db   :  { %1791 = vmatpush1.bf16.msra.mxu0 %v6247_v62  ;;  %1832 = vmatpush1.bf16.msra.mxu1 %v6248_v41 }
 0x3dc   :  { %1792 = vmatprep.subr.bf16.mxu0 %v6249_v30  ;;  %1833 = vmatprep.subr.bf16.mxu1 %v6250_v63 }
 0x3df   :  { %1793 = vmatpush1.bf16.msra.mxu0 %v6251_v43  ;;  %1834 = vmatpush1.bf16.msra.mxu1 %v6252_v10 }
 0x3e0   :  { %1794 = vmatprep.subr.bf16.mxu0 %v6253_v34  ;;  %1835 = vmatprep.subr.bf16.mxu1 %v6254_v29 }
 0x3e3   :  { %1795 = vmatpush1.bf16.msra.mxu0 %v6255_v56  ;;  %1836 = vmatpush1.bf16.msra.mxu1 %v6256_v27 }
 0x3e4   :  { %1796 = vmatprep.subr.bf16.mxu0 %v6257_v4  ;;  %1837 = vmatprep.subr.bf16.mxu1 %v6258_v21 }
 0x3e7   :  { %1797 = vmatpush1.bf16.msra.mxu0 %v4821_v26  ;;  %1838 = vmatpush1.bf16.msra.mxu1 %v4824_v60 }
 0x3e8   :  { %1896 = vmatprep.subr.bf16.mxu0 %v4827_v54  ;;  %1937 = vmatprep.subr.bf16.mxu1 %v4830_v47 }
 0x45b   :  { %v1586_v6 = vpop.f32.mrb[24].mxu0  ;;  %v1627_v55 = vpop.f32.mrb[24].mxu1 }
 0x45c   :  { %v1638_v42 = vrot.slane %v1586_v6, 2  ;;  %v1588_v7 = vpop.f32.mrb[25].mxu0  ;;  %v1629_v36 = vpop.f32.mrb[25].mxu1  ;;  %v1640_v19 = vrot.slane %v1627_v55, 2 }
 0x45d   :  { %v1639_v61 = vrot.slane %v1588_v7, 2  ;;  %v1590_v37 = vpop.f32.mrb[26].mxu0  ;;  %v1631_v28 = vpop.f32.mrb[26].mxu1  ;;  %v1641_v58 = vrot.slane %v1629_v36, 2 }
 0x45e   :  { %v1646_v45 = vadd.f32 %v1638_v42, %v4249_v31  ;;  %v1591_v22 = vpop.f32.mrb[27].mxu0  ;;  %v1632_v33 = vpop.f32.mrb[27].mxu1  ;;  %v1648_v6 = vadd.f32 %v1640_v19, %v4258_v17  ;;  %v4854_v19 = vld [vmem:[#allocation8 + $0x2c] ss:$16 sps:$4 sm:$0xff]  }
 0x45f   :  { %v1647_v38 = vadd.f32 %v1639_v61, %v4251_v32  ;;  %v1649_v25 = vadd.f32 %v1641_v58, %v4255_v11  ;;  %v1664_v32 = vrot.slane %v4704_v5, 6  ;;  %v4848_v5 = vld [vmem:[#allocation8 + $0x8] ss:$16 sps:$4 sm:$0xff]  }
 0x460   :  { %v1650_v23 = vmul.f32 0.5, %v1646_v45  ;;  %v1652_v7 = vmul.f32 0.5, %v1648_v6  ;;  %v4857_v6 = vld [vmem:[#allocation8 + $0x20] ss:$16 sps:$4 sm:$0xff]  }
 0x461   :  { %v1651_v24 = vmul.f32 0.5, %v1647_v38 }
 0x462   :  { %3499 = vtanh.f32 %v1650_v23 }
 0x463   :  { %3501 = vtanh.f32 %v1651_v24 }
 0x464   :  { %3503 = vtanh.f32 %v1649_v25  ;;  %v4851_v25 = vld [vmem:[#allocation8 + $0x24] ss:$16 sps:$4 sm:$0xff]  }
 0x465   :  { %3505 = vtanh.f32 %v1652_v7  ;;  %v4860_v7 = vld [vmem:[#allocation8 + $0x28] ss:$16 sps:$4 sm:$0xff]  }
 0x46c   :  { %v3500_v37 = vpop.eup %3499 }
 0x46d   :  { %v1656_v28 = vmul.f32 0.5, %v3500_v37  ;;  %v3502_v53 = vpop.eup %3501  ;;  %v4863_v37 = vld [vmem:[#allocation8 + $0x44] ss:$16 sps:$4 sm:$0xff]  }
 0x46e   :  { %v1657_v42 = vmul.f32 0.5, %v3502_v53  ;;  %v3504_v36 = vpop.eup %3503  ;;  %v4845_v53 = vld [vmem:[#allocation8] ss:$16 sps:$4 sm:$0xff]   ;;  %6259 = vst [vmem:[#allocation35_spill] sm:$0xff] %v4863_v37 }
 0x46f   :  { %v1659_v31 = vadd.f32 0.5, %v1656_v28  ;;  %v3506_v11 = vpop.eup %3505  ;;  %v4866_v28 = vld [vmem:[#allocation8 + $0x4c] ss:$16 sps:$4 sm:$0xff]  }
 0x470   :  { %v1660_v22 = vadd.f32 0.5, %v1657_v42  ;;  %v1658_v55 = vmul.f32 0.5, %v3506_v11  ;;  %6260 = vst [vmem:[#allocation36_spill] sm:$0xff] %v4866_v28  ;;  %v4872_v42 = vld [vmem:[#allocation8 + $0x48] ss:$16 sps:$4 sm:$0xff]  }
 0x471   :  { %v1667_v61 = vmul.f32 %v3504_v36, %v1659_v31  ;;  %v4869_v31 = vld [vmem:[#allocation8 + $0x40] ss:$16 sps:$4 sm:$0xff]   ;;  %6262 = vst [vmem:[#allocation38_spill] sm:$0xff] %v4872_v42  ;;  %v4875_v36 = vld [vmem:[#allocation8 + $0x64] ss:$16 sps:$4 sm:$0xff]  }
 0x472   :  { %v1666_v45 = vmul.f32 %v1664_v32, %v1660_v22  ;;  %v1661_v17 = vadd.f32 0.5, %v1658_v55  ;;  %6261 = vst [vmem:[#allocation37_spill] sm:$0xff] %v4869_v31  ;;  %6263 = vst [vmem:[#allocation39_spill] sm:$0xff] %v4875_v36  ;;  %v4878_v22 = vld [vmem:[#allocation8 + $0x6c] ss:$16 sps:$4 sm:$0xff]  }
 0x473   :  { %6264 = vst [vmem:[#allocation40_spill] sm:$0xff] %v4878_v22  ;;  %v4881_v32 = vld [vmem:[#allocation8 + $0x60] ss:$16 sps:$4 sm:$0xff]   ;;  %v4890_v11 = vld [vmem:[#allocation8 + $0x8c] ss:$16 sps:$4 sm:$0xff]  }
 0x474   :  { %v4838_v33 = vadd.f32 %v1667_v61, %v1666_v45  ;;  %6265 = vst [vmem:[#allocation41_spill] sm:$0xff] %v4881_v32  ;;  %v4884_v61 = vld [vmem:[#allocation8 + $0x68] ss:$16 sps:$4 sm:$0xff]   ;;  %v4887_v45 = vld [vmem:[#allocation8 + $0x84] ss:$16 sps:$4 sm:$0xff]   ;;  %6268 = vst [vmem:[#allocation46_spill] sm:$0xff] %v4890_v11 }
 0x475   :  { %6266 = vst [vmem:[#allocation42_spill] sm:$0xff] %v4884_v61  ;;  %6267 = vst [vmem:[#allocation43_spill] sm:$0xff] %v4887_v45  ;;  %v4893_v55 = vld [vmem:[#allocation8 + $0x80] ss:$16 sps:$4 sm:$0xff]  }
 0x476   :  { %3507 = vtanh.f32 %v4838_v33  ;;  %6269 = vst [vmem:[#allocation47_spill] sm:$0xff] %v4893_v55 }
 0x480   :  { %v3508_v58 = vpop.eup %3507 }
 0x481   :  { %v1670_v38 = vmul.f32 %v3508_v58, %v1661_v17  ;;  %v4896_v17 = vld [vmem:[#allocation8 + $0x88] ss:$16 sps:$4 sm:$0xff]   ;;  %v4899_v58 = vld [vmem:[#allocation8 + $0xa4] ss:$16 sps:$4 sm:$0xff]  }
 0x482   :  { %6270 = vst [vmem:[#allocation49_spill] sm:$0xff] %v4896_v17  ;;  %6271 = vst [vmem:[#allocation50_spill] sm:$0xff] %v4899_v58 }
 0x483   :  { %v1778_v23 = vpack.c.bf16 %v1670_v38, %v1670_v38  ;;  %v4902_v38 = vld [vmem:[#allocation8 + $0xac] ss:$16 sps:$4 sm:$0xff]  }
 0x484   :  { %6272 = vst [vmem:[#allocation52_spill] sm:$0xff] %v4902_v38 }
 0x485   :  { %v4841_v24 = vrot.slane %v1778_v23, 3 }
 0x487   :  { %1815 = vmatmul.mubr.bf16.vlgmr.msra.gmra.mrb[32].mxu0 %v4841_v24  ;;  %1856 = vmatmul.mubr.bf16.vlgmr.msra.gmra.mrb[32].mxu1 %v4841_v24 }
 0x488   :  { %1897 = vmatpush1.bf16.msra.mxu0 %v4845_v53  ;;  %1938 = vmatpush1.bf16.msra.mxu1 %v4848_v5 }
 0x489   :  { %1898 = vmatprep.subr.bf16.mxu0 %v4851_v25  ;;  %1939 = vmatprep.subr.bf16.mxu1 %v4854_v19 }
 0x48c   :  { %1899 = vmatpush1.bf16.msra.mxu0 %v4857_v6  ;;  %1940 = vmatpush1.bf16.msra.mxu1 %v4860_v7 }
 0x48d   :  { %1900 = vmatprep.subr.bf16.mxu0 %v4863_v37  ;;  %1941 = vmatprep.subr.bf16.mxu1 %v4866_v28  ;;  %v4919_v37 = vld [vmem:[#allocation8 + $0xc0] ss:$16 sps:$4 sm:$0xff]  }
 0x490   :  { %1901 = vmatpush1.bf16.msra.mxu0 %v4869_v31  ;;  %1942 = vmatpush1.bf16.msra.mxu1 %v4872_v42 }
 0x491   :  { %1902 = vmatprep.subr.bf16.mxu0 %v4875_v36  ;;  %1943 = vmatprep.subr.bf16.mxu1 %v4878_v22  ;;  %v4912_v22 = vld [vmem:[#allocation8 + $0xc4] ss:$16 sps:$4 sm:$0xff]  }
 0x494   :  { %1903 = vmatpush1.bf16.msra.mxu0 %v4881_v32  ;;  %1944 = vmatpush1.bf16.msra.mxu1 %v4884_v61  ;;  %v4905_v61 = vld [vmem:[#allocation8 + $0xa0] ss:$16 sps:$4 sm:$0xff]  }
 0x495   :  { %1904 = vmatprep.subr.bf16.mxu0 %v4887_v45  ;;  %1945 = vmatprep.subr.bf16.mxu1 %v4890_v11  ;;  %6273 = vst [vmem:[#allocation55_spill] sm:$0xff] %v4905_v61  ;;  %v4908_v11 = vld [vmem:[#allocation8 + $0xa8] ss:$16 sps:$4 sm:$0xff]  }
 0x496   :  { %6274 = vst [vmem:[#allocation56_spill] sm:$0xff] %v4908_v11 }
 0x498   :  { %1905 = vmatpush1.bf16.msra.mxu0 %v4893_v55  ;;  %1946 = vmatpush1.bf16.msra.mxu1 %v4896_v17 }
 0x499   :  { %1906 = vmatprep.subr.bf16.mxu0 %v4899_v58  ;;  %1947 = vmatprep.subr.bf16.mxu1 %v4902_v38  ;;  %v4915_v58 = vld [vmem:[#allocation8 + $0xcc] ss:$16 sps:$4 sm:$0xff]  }
 0x49a   :  { %6275 = vst [vmem:[#allocation60_spill] sm:$0xff] %v4915_v58 }
 0x49c   :  { %1907 = vmatpush1.bf16.msra.mxu0 %v4905_v61  ;;  %1948 = vmatpush1.bf16.msra.mxu1 %v4908_v11 }
 0x49d   :  { %v1712_v23 = vpop.f32.mrb[28].mxu0  ;;  %v1753_v45 = vpop.f32.mrb[28].mxu1  ;;  %1908 = vmatprep.subr.bf16.mxu0 %v4912_v22  ;;  %1949 = vmatprep.subr.bf16.mxu1 %v4915_v58  ;;  %v4926_v58 = vld [vmem:[#allocation8 + $0xe4] ss:$16 sps:$4 sm:$0xff]  }
 0x49e   :  { %v1713_v17 = vadd.f32 %v1712_v23, %v4524_v46  ;;  %v1714_v55 = vpop.f32.mrb[29].mxu0  ;;  %v1755_v32 = vpop.f32.mrb[29].mxu1  ;;  %v4922_v23 = vld [vmem:[#allocation8 + $0xc8] ss:$16 sps:$4 sm:$0xff]   ;;  %6276 = vst [vmem:[#allocation61_spill] sm:$0xff] %v4926_v58 }
 0x49f   :  { %v1715_v38 = vadd.f32 %v1714_v55, %v4527_v48  ;;  %v1716_v36 = vpop.f32.mrb[30].mxu0  ;;  %v1757_v61 = vpop.f32.mrb[30].mxu1  ;;  %v1756_v46 = vadd.f32 %v1755_v32, %v4535_v57  ;;  %v4941_v32 = vld [vmem:[#allocation8 + $0x10c] ss:$16 sps:$4 sm:$0xff]   ;;  %v4948_v55 = vld [vmem:[#allocation8 + $0x108] ss:$16 sps:$4 sm:$0xff]  }
 0x4a0   :  { %v1760_v42 = vmul.f32 0.5, %v1713_v17  ;;  %v1717_v31 = vpop.f32.mrb[31].mxu0  ;;  %v1758_v28 = vpop.f32.mrb[31].mxu1  ;;  %1909 = vmatpush1.bf16.msra.mxu0 %v4919_v37  ;;  %1950 = vmatpush1.bf16.msra.mxu1 %v4922_v23  ;;  %v4929_v36 = vld [vmem:[#allocation8 + $0xec] ss:$16 sps:$4 sm:$0xff]   ;;  %6281 = vst [vmem:[#allocation26_spill] sm:$0xff] %v4941_v32  ;;  %v1754_v61 = vadd.f32 %v1753_v45, %v6204_v49 }
 0x4a1   :  { %v1761_v11 = vmul.f32 0.5, %v1715_v38  ;;  %1910 = vmatprep.subr.bf16.mxu0 %v4926_v58  ;;  %6277 = vst [vmem:[#allocation62_spill] sm:$0xff] %v4929_v36  ;;  %1951 = vmatprep.subr.bf16.mxu1 %v4929_v36  ;;  %v4932_v28 = vld [vmem:[#allocation8 + $0xe0] ss:$16 sps:$4 sm:$0xff]   ;;  %v4935_v31 = vld [vmem:[#allocation8 + $0xe8] ss:$16 sps:$4 sm:$0xff]  }
 0x4a2   :  { %3509 = vtanh.f32 %v1760_v42  ;;  %6278 = vst [vmem:[#allocation63_spill] sm:$0xff] %v4932_v28  ;;  %6279 = vst [vmem:[#allocation64_spill] sm:$0xff] %v4935_v31  ;;  %v4938_v42 = vld [vmem:[#allocation8 + $0x104] ss:$16 sps:$4 sm:$0xff]   ;;  %v1762_v38 = vmul.f32 0.5, %v1754_v61 }
 0x4a3   :  { %3511 = vtanh.f32 %v1761_v11  ;;  %6280 = vst [vmem:[#allocation65_spill] sm:$0xff] %v4938_v42  ;;  %v4945_v11 = vld [vmem:[#allocation8 + $0x100] ss:$16 sps:$4 sm:$0xff]   ;;  %6283 = vst [vmem:[#allocation67_spill] sm:$0xff] %v4948_v55  ;;  %v4951_v17 = vld [vmem:[#allocation8 + $0x124] ss:$16 sps:$4 sm:$0xff]  }
 0x4a4   :  { %1911 = vmatpush1.bf16.msra.mxu0 %v4932_v28  ;;  %1952 = vmatpush1.bf16.msra.mxu1 %v4935_v31  ;;  %3513 = vtanh.f32 %v1756_v46  ;;  %6282 = vst [vmem:[#allocation66_spill] sm:$0xff] %v4945_v11  ;;  %6284 = vst [vmem:[#allocation16_spill] sm:$0xff] %v4951_v17  ;;  %v4954_v46 = vld [vmem:[#allocation8 + $0x12c] ss:$16 sps:$4 sm:$0xff]   ;;  %v4957_v45 = vld [vmem:[#allocation8 + $0x120] ss:$16 sps:$4 sm:$0xff]  }
 0x4a5   :  { %1912 = vmatprep.subr.bf16.mxu0 %v4938_v42  ;;  %1953 = vmatprep.subr.bf16.mxu1 %v4941_v32  ;;  %6285 = vst [vmem:[#allocation28_spill] sm:$0xff] %v4954_v46  ;;  %6286 = vst [vmem:[#allocation29_spill] sm:$0xff] %v4957_v45  ;;  %v4960_v49 = vld [vmem:[#allocation8 + $0x128] ss:$16 sps:$4 sm:$0xff]   ;;  %3515 = vtanh.f32 %v1762_v38  ;;  %v4975_v28 = vld [vmem:[#allocation8 + $0x164] ss:$16 sps:$4 sm:$0xff]  }
 0x4a6   :  { %6287 = vst [vmem:[#allocation30_spill] sm:$0xff] %v4960_v49  ;;  %6292 = vst [vmem:[#allocation45_spill] sm:$0xff] %v4975_v28  ;;  %v4987_v38 = vld [vmem:[#allocation8 + $0x168] ss:$16 sps:$4 sm:$0xff]  }
 0x4a7   :  { %6296 = vst [vmem:[#allocation54_spill] sm:$0xff] %v4987_v38 }
 0x4a8   :  { %1913 = vmatpush1.bf16.msra.mxu0 %v4945_v11  ;;  %1954 = vmatpush1.bf16.msra.mxu1 %v4948_v55  ;;  %v4963_v11 = vld [vmem:[#allocation8 + $0x144] ss:$16 sps:$4 sm:$0xff]  }
 0x4a9   :  { %1914 = vmatprep.subr.bf16.mxu0 %v4951_v17  ;;  %1955 = vmatprep.subr.bf16.mxu1 %v4954_v46  ;;  %6288 = vst [vmem:[#allocation31_spill] sm:$0xff] %v4963_v11  ;;  %v4966_v17 = vld [vmem:[#allocation8 + $0x14c] ss:$16 sps:$4 sm:$0xff]  }
 0x4aa   :  { %6289 = vst [vmem:[#allocation32_spill] sm:$0xff] %v4966_v17 }
 0x4ac   :  { %v3510_v57 = vpop.eup %3509  ;;  %1915 = vmatpush1.bf16.msra.mxu0 %v4957_v45  ;;  %1956 = vmatpush1.bf16.msra.mxu1 %v4960_v49  ;;  %v4969_v45 = vld [vmem:[#allocation8 + $0x140] ss:$16 sps:$4 sm:$0xff]   ;;  %v4972_v49 = vld [vmem:[#allocation8 + $0x148] ss:$16 sps:$4 sm:$0xff]  }
 0x4ad   :  { %v1766_v32 = vmul.f32 0.5, %v3510_v57  ;;  %v3512_v55 = vpop.eup %3511  ;;  %1916 = vmatprep.subr.bf16.mxu0 %v4963_v11  ;;  %1957 = vmatprep.subr.bf16.mxu1 %v4966_v17  ;;  %6290 = vst [vmem:[#allocation33_spill] sm:$0xff] %v4969_v45  ;;  %6291 = vst [vmem:[#allocation44_spill] sm:$0xff] %v4972_v49  ;;  %v4978_v11 = vld [vmem:[#allocation8 + $0x16c] ss:$16 sps:$4 sm:$0xff]  }
 0x4ae   :  { %v1767_v57 = vmul.f32 0.5, %v3512_v55  ;;  %v3514_v46 = vpop.eup %3513  ;;  %6293 = vst [vmem:[#allocation48_spill] sm:$0xff] %v4978_v11 }
 0x4af   :  { %v1769_v61 = vadd.f32 0.5, %v1766_v32 }
 0x4b0   :  { %v1770_v42 = vadd.f32 0.5, %v1767_v57  ;;  %1917 = vmatpush1.bf16.msra.mxu0 %v4969_v45  ;;  %1958 = vmatpush1.bf16.msra.mxu1 %v4972_v49  ;;  %v4993_v57 = vld [vmem:[#allocation8 + $0x18c] ss:$16 sps:$4 sm:$0xff]  }
 0x4b1   :  { %v1774_v31 = vmul.f32 %v3514_v46, %v1769_v61  ;;  %1918 = vmatprep.subr.bf16.mxu0 %v4975_v28  ;;  %1959 = vmatprep.subr.bf16.mxu1 %v4978_v11  ;;  %v4984_v46 = vld [vmem:[#allocation8 + $0x160] ss:$16 sps:$4 sm:$0xff]   ;;  %v4990_v61 = vld [vmem:[#allocation8 + $0x184] ss:$16 sps:$4 sm:$0xff]   ;;  %6298 = vst [vmem:[#allocation58_spill] sm:$0xff] %v4993_v57 }
 0x4b2   :  { %v1773_v32 = vmul.f32 %v1770_v42, %v4760_v3  ;;  %6295 = vst [vmem:[#allocation53_spill] sm:$0xff] %v4984_v46  ;;  %6297 = vst [vmem:[#allocation57_spill] sm:$0xff] %v4990_v61  ;;  %v3516_v3 = vpop.eup %3515  ;;  %v5000_v42 = vld [vmem:[#allocation8 + $0x188] ss:$16 sps:$4 sm:$0xff]  }
 0x4b3   :  { %6300 = vst [vmem:[#allocation69_spill] sm:$0xff] %v5000_v42 }
 0x4b4   :  { %v4982_v55 = vadd.f32 %v1774_v31, %v1773_v32  ;;  %1919 = vmatpush1.bf16.msra.mxu0 %v4984_v46  ;;  %1960 = vmatpush1.bf16.msra.mxu1 %v4987_v38  ;;  %v4997_v31 = vld [vmem:[#allocation8 + $0x180] ss:$16 sps:$4 sm:$0xff]   ;;  %v5003_v32 = vld [vmem:[#allocation8 + $0x1a4] ss:$16 sps:$4 sm:$0xff]  }
 0x4b5   :  { %1920 = vmatprep.subr.bf16.mxu0 %v4990_v61  ;;  %1961 = vmatprep.subr.bf16.mxu1 %v4993_v57  ;;  %6299 = vst [vmem:[#allocation59_spill] sm:$0xff] %v4997_v31  ;;  %6301 = vst [vmem:[#allocation70_spill] sm:$0xff] %v5003_v32  ;;  %v5006_v61 = vld [vmem:[#allocation8 + $0x1ac] ss:$16 sps:$4 sm:$0xff]   ;;  %v1768_v57 = vmul.f32 0.5, %v3516_v3 }
 0x4b6   :  { %6294 = vst [vmem:[#allocation51_spill] sm:$0xff] %v4982_v55  ;;  %3517 = vtanh.f32 %v4982_v55  ;;  %6302 = vst [vmem:[#allocation71_spill] sm:$0xff] %v5006_v61  ;;  %v5009_v38 = vld [vmem:[#allocation8 + $0x1a0] ss:$16 sps:$4 sm:$0xff]   ;;  %v5012_v55 = vld [vmem:[#allocation8 + $0x1a8] ss:$16 sps:$4 sm:$0xff]  }
 0x4b7   :  { %6303 = vst [vmem:[#allocation72_spill] sm:$0xff] %v5009_v38  ;;  %6304 = vst [vmem:[#allocation73_spill] sm:$0xff] %v5012_v55  ;;  %v5024_v3 = vld [vmem:[#allocation8 + $0x1c8] ss:$16 sps:$4 sm:$0xff]  }
 0x4b8   :  { %1921 = vmatpush1.bf16.msra.mxu0 %v4997_v31  ;;  %1962 = vmatpush1.bf16.msra.mxu1 %v5000_v42  ;;  %v5015_v31 = vld [vmem:[#allocation8 + $0x1c4] ss:$16 sps:$4 sm:$0xff]   ;;  %v5018_v42 = vld [vmem:[#allocation8 + $0x1cc] ss:$16 sps:$4 sm:$0xff]   ;;  %6308 = vst [vmem:[#allocation77_spill] sm:$0xff] %v5024_v3 }
 0x4b9   :  { %1922 = vmatprep.subr.bf16.mxu0 %v5003_v32  ;;  %1963 = vmatprep.subr.bf16.mxu1 %v5006_v61  ;;  %6305 = vst [vmem:[#allocation74_spill] sm:$0xff] %v5015_v31  ;;  %6306 = vst [vmem:[#allocation75_spill] sm:$0xff] %v5018_v42  ;;  %v1771_v32 = vadd.f32 0.5, %v1768_v57  ;;  %v5021_v61 = vld [vmem:[#allocation8 + $0x1c0] ss:$16 sps:$4 sm:$0xff]  }
 0x4ba   :  { %6307 = vst [vmem:[#allocation76_spill] sm:$0xff] %v5021_v61 }
 0x4bc   :  { %1923 = vmatpush1.bf16.msra.mxu0 %v5009_v38  ;;  %1964 = vmatpush1.bf16.msra.mxu1 %v5012_v55  ;;  %v5027_v38 = vld [vmem:[#allocation8 + $0x1e4] ss:$16 sps:$4 sm:$0xff]   ;;  %v5030_v55 = vld [vmem:[#allocation8 + $0x1ec] ss:$16 sps:$4 sm:$0xff]  }
 0x4bd   :  { %1924 = vmatprep.subr.bf16.mxu0 %v5015_v31  ;;  %1965 = vmatprep.subr.bf16.mxu1 %v5018_v42  ;;  %6309 = vst [vmem:[#allocation78_spill] sm:$0xff] %v5027_v38  ;;  %6310 = vst [vmem:[#allocation79_spill] sm:$0xff] %v5030_v55 }
 0x4c0   :  { %v3518_v46 = vpop.eup %3517  ;;  %1925 = vmatpush1.bf16.msra.mxu0 %v5021_v61  ;;  %1966 = vmatpush1.bf16.msra.mxu1 %v5024_v3  ;;  %v5038_v61 = vld [vmem:[#allocation8 + $0x1e0] ss:$16 sps:$4 sm:$0xff]   ;;  %v5041_v3 = vld [vmem:[#allocation8 + $0x1e8] ss:$16 sps:$4 sm:$0xff]  }
 0x4c1   :  { %1926 = vmatprep.subr.bf16.mxu0 %v5027_v38  ;;  %1967 = vmatprep.subr.bf16.mxu1 %v5030_v55  ;;  %v5033_v31 = vmul.f32 %v3518_v46, %v1771_v32  ;;  %6312 = vst [vmem:[#allocation81_spill] sm:$0xff] %v5038_v61  ;;  %6313 = vst [vmem:[#allocation82_spill] sm:$0xff] %v5041_v3 }
 0x4c3   :  { %6311 = vst [vmem:[#allocation80_spill] sm:$0xff] %v5033_v31  ;;  %v2809_v57 = vmul.f32 %v6225_v15, %v5033_v31  ;;  %v1890_v42 = vrot.slane %v5033_v31, 2  ;;  %v6339_v31 = vld [vmem:[#allocation26_spill] sm:$0xff] }
 0x4c4   :  { %1927 = vmatpush1.bf16.msra.mxu0 %v5038_v61  ;;  %1968 = vmatpush1.bf16.msra.mxu1 %v5041_v3 }
 0x4c5   :  { %v2810_v38 = vsel %vm2798_vm0, %v2809_v57, 0.0  ;;  %v1892_v11 = vpack.c.bf16 %v1890_v42, %v1890_v42  ;;  %1997 = vmatprep.subr.bf16.mxu0 %v6228_v9  ;;  %2038 = vmatprep.subr.bf16.mxu1 %v6229_v13  ;;  %v6314_v13 = vld [vmem:[#allocation19_spill] sm:$0xff]  ;;  %v6319_v57 = vld [vmem:[#allocation36_spill] sm:$0xff] }
 0x4c6   :  { %2811 = vadd.xlane.f32.xlu1 %v2810_v38 }
 0x4c7   :  { %v1894_v46 = vrot.slane %v1892_v11, 3 }
 0x4c9   :  { %1928 = vmatprep.mubr.bf16.mxu0 %v1894_v46  ;;  %1969 = vmatprep.mubr.bf16.mxu1 %v1894_v46  ;;  %v6320_v46 = vld [vmem:[#allocation37_spill] sm:$0xff] }
 0x4ca   :  { %1929 = vmatmul.mubr.bf16.vlgmr.msra.gmra.mrb[36].mxu0 %v4841_v24  ;;  %1970 = vmatmul.mubr.bf16.vlgmr.msra.gmra.mrb[36].mxu1 %v4841_v24 }
 0x4cb   :  { %1998 = vmatpush1.bf16.msra.mxu0 %v6230_v35  ;;  %2039 = vmatpush1.bf16.msra.mxu1 %v6231_v12 }
 0x4cc   :  { %1999 = vmatprep.subr.bf16.mxu0 %v6232_v1  ;;  %2040 = vmatprep.subr.bf16.mxu1 %v6233_v16  ;;  %v6315_v16 = vld [vmem:[#allocation21_spill] sm:$0xff] }
 0x4cd   :  { %2029 = vmatprep.mubr.bf16.mxu0 %v6234_v18  ;;  %2070 = vmatprep.mubr.bf16.mxu1 %v6234_v18 }
 0x4cf   :  { %2000 = vmatpush1.bf16.msra.mxu0 %v6235_v8  ;;  %2041 = vmatpush1.bf16.msra.mxu1 %v6236_v20 }
 0x4d0   :  { %2001 = vmatprep.subr.bf16.mxu0 %v6237_v44  ;;  %2042 = vmatprep.subr.bf16.mxu1 %v6238_v50 }
 0x4d3   :  { %2002 = vmatpush1.bf16.msra.mxu0 %v6239_v14  ;;  %2043 = vmatpush1.bf16.msra.mxu1 %v6240_v51 }
 0x4d4   :  { %2003 = vmatprep.subr.bf16.mxu0 %v6241_v52  ;;  %2044 = vmatprep.subr.bf16.mxu1 %v6242_v0  ;;  %v6316_v0 = vld [vmem:[#allocation22_spill] sm:$0xff] }
 0x4d7   :  { %2004 = vmatpush1.bf16.msra.mxu0 %v6243_v2  ;;  %2045 = vmatpush1.bf16.msra.mxu1 %v6244_v39  ;;  %v6317_v39 = vld [vmem:[#allocation20_spill] sm:$0xff] }
 0x4d8   :  { %2005 = vmatprep.subr.bf16.mxu0 %v6245_v40  ;;  %2046 = vmatprep.subr.bf16.mxu1 %v6246_v59 }
 0x4db   :  { %2006 = vmatpush1.bf16.msra.mxu0 %v6247_v62  ;;  %2047 = vmatpush1.bf16.msra.mxu1 %v6248_v41 }
 0x4dc   :  { %2007 = vmatprep.subr.bf16.mxu0 %v6249_v30  ;;  %2048 = vmatprep.subr.bf16.mxu1 %v6250_v63 }
 0x4df   :  { %2008 = vmatpush1.bf16.msra.mxu0 %v6251_v43  ;;  %2049 = vmatpush1.bf16.msra.mxu1 %v6252_v10 }
 0x4e0   :  { %2009 = vmatprep.subr.bf16.mxu0 %v6253_v34  ;;  %2050 = vmatprep.subr.bf16.mxu1 %v6254_v29  ;;  %v1882_v29 = vrot.slane %v4838_v33, 6  ;;  %v6318_v33 = vld [vmem:[#allocation35_spill] sm:$0xff] }
 0x4e3   :  { %2010 = vmatpush1.bf16.msra.mxu0 %v6255_v56  ;;  %2051 = vmatpush1.bf16.msra.mxu1 %v6256_v27 }
 0x4e4   :  { %2011 = vmatprep.subr.bf16.mxu0 %v6257_v4  ;;  %2052 = vmatprep.subr.bf16.mxu1 %v6258_v21 }
 0x4e7   :  { %2012 = vmatpush1.bf16.msra.mxu0 %v4821_v26  ;;  %2053 = vmatpush1.bf16.msra.mxu1 %v4824_v60 }
 0x4e8   :  { %2117 = vmatprep.subr.bf16.mxu0 %v4827_v54  ;;  %2158 = vmatprep.subr.bf16.mxu1 %v4830_v47 }
 0x55a   :  { %v1816_v15 = vpop.f32.mrb[32].mxu0  ;;  %v1857_v9 = vpop.f32.mrb[32].mxu1 }
 0x55b   :  { %v1864_v35 = vadd.f32 %v1816_v15, %v6314_v13  ;;  %v1818_v12 = vpop.f32.mrb[33].mxu0  ;;  %v1859_v1 = vpop.f32.mrb[33].mxu1  ;;  %v1866_v40 = vadd.f32 %v1857_v9, %v6317_v39  ;;  %v6321_v15 = vld [vmem:[#allocation38_spill] sm:$0xff]  ;;  %v6322_v9 = vld [vmem:[#allocation39_spill] sm:$0xff] }
 0x55c   :  { %v1865_v8 = vadd.f32 %v1818_v12, %v6315_v16  ;;  %v1820_v20 = vpop.f32.mrb[34].mxu0  ;;  %v1861_v44 = vpop.f32.mrb[34].mxu1  ;;  %v1867_v2 = vadd.f32 %v1859_v1, %v6316_v0  ;;  %v6324_v12 = vld [vmem:[#allocation41_spill] sm:$0xff]  ;;  %v6325_v1 = vld [vmem:[#allocation42_spill] sm:$0xff] }
 0x55d   :  { %v1868_v50 = vmul.f32 0.5, %v1864_v35  ;;  %v1821_v14 = vpop.f32.mrb[35].mxu0  ;;  %v1862_v51 = vpop.f32.mrb[35].mxu1  ;;  %v1870_v59 = vmul.f32 0.5, %v1866_v40  ;;  %v6323_v35 = vld [vmem:[#allocation40_spill] sm:$0xff]  ;;  %v6327_v20 = vld [vmem:[#allocation46_spill] sm:$0xff] }
 0x55e   :  { %v1869_v52 = vmul.f32 0.5, %v1865_v8  ;;  %v6326_v8 = vld [vmem:[#allocation43_spill] sm:$0xff]  ;;  %v6330_v14 = vld [vmem:[#allocation50_spill] sm:$0xff]  ;;  %v6331_v51 = vld [vmem:[#allocation52_spill] sm:$0xff] }
 0x55f   :  { %3519 = vtanh.f32 %v1868_v50  ;;  %v6328_v44 = vld [vmem:[#allocation47_spill] sm:$0xff]  ;;  %v6329_v50 = vld [vmem:[#allocation49_spill] sm:$0xff]  ;;  %v6334_v40 = vld [vmem:[#allocation60_spill] sm:$0xff] }
 0x560   :  { %3521 = vtanh.f32 %v1869_v52  ;;  %v6332_v52 = vld [vmem:[#allocation55_spill] sm:$0xff] }
 0x561   :  { %3523 = vtanh.f32 %v1867_v2  ;;  %v6333_v2 = vld [vmem:[#allocation56_spill] sm:$0xff] }
 0x562   :  { %3525 = vtanh.f32 %v1870_v59 }
 0x569   :  { %v3520_v62 = vpop.eup %3519 }
 0x56a   :  { %v1874_v41 = vmul.f32 0.5, %v3520_v62  ;;  %v3522_v30 = vpop.eup %3521 }
 0x56b   :  { %v1875_v43 = vmul.f32 0.5, %v3522_v30  ;;  %v3524_v10 = vpop.eup %3523 }
 0x56c   :  { %v1877_v63 = vadd.f32 0.5, %v1874_v41  ;;  %v3526_v21 = vpop.eup %3525  ;;  %v6335_v41 = vld [vmem:[#allocation23_spill] sm:$0xff] }
 0x56d   :  { %v1878_v34 = vadd.f32 0.5, %v1875_v43  ;;  %v1876_v24 = vmul.f32 0.5, %v3526_v21 }
 0x56e   :  { %v1885_v56 = vmul.f32 %v3524_v10, %v1877_v63 }
 0x56f   :  { %v1884_v27 = vmul.f32 %v1882_v29, %v1878_v34  ;;  %v1879_v11 = vadd.f32 0.5, %v1876_v24  ;;  %v6336_v24 = vld [vmem:[#allocation63_spill] sm:$0xff] }
 0x571   :  { %v5088_v4 = vadd.f32 %v1885_v56, %v1884_v27 }
 0x573   :  { %3527 = vtanh.f32 %v5088_v4 }
 0x57d   :  { %v3528_v38 = vpop.eup %3527 }
 0x57e   :  { %v1888_v42 = vmul.f32 %v3528_v38, %v1879_v11  ;;  %v6337_v11 = vld [vmem:[#allocation64_spill] sm:$0xff] }
 0x580   :  { %v5091_v32 = vpack.c.bf16 %v1888_v42, %v1888_v42  ;;  %v6338_v42 = vld [vmem:[#allocation65_spill] sm:$0xff] }
 0x582   :  { %2030 = vmatmul.mubr.bf16.vlgmr.msra.gmra.mrb[40].mxu0 %v5091_v32  ;;  %2071 = vmatmul.mubr.bf16.vlgmr.msra.gmra.mrb[40].mxu1 %v5091_v32 }
 0x583   :  { %2118 = vmatpush1.bf16.msra.mxu0 %v4845_v53  ;;  %2159 = vmatpush1.bf16.msra.mxu1 %v4848_v5 }
 0x584   :  { %2119 = vmatprep.subr.bf16.mxu0 %v4851_v25  ;;  %2160 = vmatprep.subr.bf16.mxu1 %v4854_v19 }
 0x587   :  { %2120 = vmatpush1.bf16.msra.mxu0 %v4857_v6  ;;  %2161 = vmatpush1.bf16.msra.mxu1 %v4860_v7 }
 0x588   :  { %2121 = vmatprep.subr.bf16.mxu0 %v6318_v33  ;;  %2162 = vmatprep.subr.bf16.mxu1 %v6319_v57 }
 0x58b   :  { %2122 = vmatpush1.bf16.msra.mxu0 %v6320_v46  ;;  %2163 = vmatpush1.bf16.msra.mxu1 %v6321_v15 }
 0x58c   :  { %2123 = vmatprep.subr.bf16.mxu0 %v6322_v9  ;;  %2164 = vmatprep.subr.bf16.mxu1 %v6323_v35 }
 0x58f   :  { %2124 = vmatpush1.bf16.msra.mxu0 %v6324_v12  ;;  %2165 = vmatpush1.bf16.msra.mxu1 %v6325_v1 }
 0x590   :  { %2125 = vmatprep.subr.bf16.mxu0 %v6326_v8  ;;  %2166 = vmatprep.subr.bf16.mxu1 %v6327_v20 }
 0x593   :  { %2126 = vmatpush1.bf16.msra.mxu0 %v6328_v44  ;;  %2167 = vmatpush1.bf16.msra.mxu1 %v6329_v50 }
 0x594   :  { %2127 = vmatprep.subr.bf16.mxu0 %v6330_v14  ;;  %2168 = vmatprep.subr.bf16.mxu1 %v6331_v51 }
 0x597   :  { %2128 = vmatpush1.bf16.msra.mxu0 %v6332_v52  ;;  %2169 = vmatpush1.bf16.msra.mxu1 %v6333_v2 }
 0x598   :  { %2129 = vmatprep.subr.bf16.mxu0 %v4912_v22  ;;  %2170 = vmatprep.subr.bf16.mxu1 %v6334_v40 }
 0x59b   :  { %2130 = vmatpush1.bf16.msra.mxu0 %v4919_v37  ;;  %2171 = vmatpush1.bf16.msra.mxu1 %v4922_v23 }
 0x59c   :  { %2131 = vmatprep.subr.bf16.mxu0 %v4926_v58  ;;  %2172 = vmatprep.subr.bf16.mxu1 %v4929_v36  ;;  %v6341_v58 = vld [vmem:[#allocation66_spill] sm:$0xff] }
 0x59d   :  { %v1930_v59 = vpop.f32.mrb[36].mxu0  ;;  %v1971_v62 = vpop.f32.mrb[36].mxu1 }
 0x59e   :  { %v1931_v30 = vadd.f32 %v1930_v59, %v6335_v41  ;;  %v1932_v63 = vpop.f32.mrb[37].mxu0  ;;  %v1973_v43 = vpop.f32.mrb[37].mxu1  ;;  %v6340_v59 = vld [vmem:[#allocation24_spill] sm:$0xff] }
 0x59f   :  { %v1933_v10 = vadd.f32 %v1932_v63, %v4527_v48  ;;  %v1934_v34 = vpop.f32.mrb[38].mxu0  ;;  %v1975_v29 = vpop.f32.mrb[38].mxu1  ;;  %2132 = vmatpush1.bf16.msra.mxu0 %v6336_v24  ;;  %2173 = vmatpush1.bf16.msra.mxu1 %v6337_v11  ;;  %v1974_v36 = vadd.f32 %v1973_v43, %v6340_v59  ;;  %v6342_v63 = vld [vmem:[#allocation67_spill] sm:$0xff] }
 0x5a0   :  { %v1978_v56 = vmul.f32 0.5, %v1931_v30  ;;  %v1935_v27 = vpop.f32.mrb[39].mxu0  ;;  %v1976_v21 = vpop.f32.mrb[39].mxu1  ;;  %2133 = vmatprep.subr.bf16.mxu0 %v6338_v42  ;;  %2174 = vmatprep.subr.bf16.mxu1 %v6339_v31  ;;  %v6343_v30 = vld [vmem:[#allocation16_spill] sm:$0xff]  ;;  %v6345_v29 = vld [vmem:[#allocation25_spill] sm:$0xff]  ;;  %v6348_v31 = vld [vmem:[#allocation31_spill] sm:$0xff] }
 0x5a1   :  { %v1979_v38 = vmul.f32 0.5, %v1933_v10  ;;  %v6344_v34 = vld [vmem:[#allocation28_spill] sm:$0xff]  ;;  %v1972_v27 = vadd.f32 %v1971_v62, %v6345_v29  ;;  %v6346_v10 = vld [vmem:[#allocation29_spill] sm:$0xff]  ;;  %v6347_v21 = vld [vmem:[#allocation30_spill] sm:$0xff] }
 0x5a2   :  { %3529 = vtanh.f32 %v1978_v56 }
 0x5a3   :  { %3531 = vtanh.f32 %v1979_v38  ;;  %2134 = vmatpush1.bf16.msra.mxu0 %v6341_v58  ;;  %2175 = vmatpush1.bf16.msra.mxu1 %v6342_v63  ;;  %v1980_v43 = vmul.f32 0.5, %v1972_v27  ;;  %v6352_v63 = vld [vmem:[#allocation57_spill] sm:$0xff] }
 0x5a4   :  { %2135 = vmatprep.subr.bf16.mxu0 %v6343_v30  ;;  %2176 = vmatprep.subr.bf16.mxu1 %v6344_v34  ;;  %3533 = vtanh.f32 %v1974_v36  ;;  %v6349_v36 = vld [vmem:[#allocation48_spill] sm:$0xff]  ;;  %v6350_v30 = vld [vmem:[#allocation53_spill] sm:$0xff] }
 0x5a5   :  { %3535 = vtanh.f32 %v1980_v43  ;;  %v6357_v43 = vld [vmem:[#allocation70_spill] sm:$0xff] }
 0x5a7   :  { %2136 = vmatpush1.bf16.msra.mxu0 %v6346_v10  ;;  %2177 = vmatpush1.bf16.msra.mxu1 %v6347_v21 }
 0x5a8   :  { %2137 = vmatprep.subr.bf16.mxu0 %v6348_v31  ;;  %2178 = vmatprep.subr.bf16.mxu1 %v4966_v17  ;;  %v6351_v31 = vld [vmem:[#allocation54_spill] sm:$0xff] }
 0x5ab   :  { %2138 = vmatpush1.bf16.msra.mxu0 %v4969_v45  ;;  %2179 = vmatpush1.bf16.msra.mxu1 %v4972_v49  ;;  %v6353_v45 = vld [vmem:[#allocation58_spill] sm:$0xff] }
 0x5ac   :  { %v3530_v56 = vpop.eup %3529  ;;  %2139 = vmatprep.subr.bf16.mxu0 %v4975_v28  ;;  %2180 = vmatprep.subr.bf16.mxu1 %v6349_v36  ;;  %v6355_v28 = vld [vmem:[#allocation59_spill] sm:$0xff]  ;;  %v6356_v36 = vld [vmem:[#allocation69_spill] sm:$0xff] }
 0x5ad   :  { %v1984_v38 = vmul.f32 0.5, %v3530_v56  ;;  %v3532_v62 = vpop.eup %3531  ;;  %v6354_v56 = vld [vmem:[#allocation51_spill] sm:$0xff] }
 0x5ae   :  { %v1985_v10 = vmul.f32 0.5, %v3532_v62  ;;  %v3534_v21 = vpop.eup %3533  ;;  %v6358_v62 = vld [vmem:[#allocation71_spill] sm:$0xff] }
 0x5af   :  { %v1987_v34 = vadd.f32 0.5, %v1984_v38  ;;  %2140 = vmatpush1.bf16.msra.mxu0 %v6350_v30  ;;  %2181 = vmatpush1.bf16.msra.mxu1 %v6351_v31 }
 0x5b0   :  { %v1988_v27 = vadd.f32 0.5, %v1985_v10  ;;  %2141 = vmatprep.subr.bf16.mxu0 %v6352_v63  ;;  %2182 = vmatprep.subr.bf16.mxu1 %v6353_v45  ;;  %v6359_v10 = vld [vmem:[#allocation72_spill] sm:$0xff]  ;;  %v6361_v45 = vld [vmem:[#allocation74_spill] sm:$0xff] }
 0x5b1   :  { %v1992_v17 = vmul.f32 %v3534_v21, %v1987_v34  ;;  %v6360_v34 = vld [vmem:[#allocation73_spill] sm:$0xff]  ;;  %v3536_v21 = vpop.eup %3535 }
 0x5b2   :  { %v1991_v49 = vmul.f32 %v1988_v27, %v6354_v56  ;;  %v6362_v27 = vld [vmem:[#allocation75_spill] sm:$0xff]  ;;  %v1986_v56 = vmul.f32 0.5, %v3536_v21 }
 0x5b3   :  { %2142 = vmatpush1.bf16.msra.mxu0 %v6355_v28  ;;  %2183 = vmatpush1.bf16.msra.mxu1 %v6356_v36  ;;  %v6363_v28 = vld [vmem:[#allocation76_spill] sm:$0xff] }
 0x5b4   :  { %v5150_v38 = vadd.f32 %v1992_v17, %v1991_v49  ;;  %2143 = vmatprep.subr.bf16.mxu0 %v6357_v43  ;;  %2184 = vmatprep.subr.bf16.mxu1 %v6358_v62  ;;  %v6364_v49 = vld [vmem:[#allocation77_spill] sm:$0xff]  ;;  %v6365_v17 = vld [vmem:[#allocation78_spill] sm:$0xff]  ;;  %v1989_v62 = vadd.f32 0.5, %v1986_v56  ;;  %v5178_v56 = vld [vmem:[%s5738_s5] ss:$0 sm:$0xff] }
 0x5b5   :  { %6369 = vst [vmem:[#allocation38_spill] sm:$0xff] %v5178_v56 }
 0x5b6   :  { %3537 = vtanh.f32 %v5150_v38 }
 0x5b7   :  { %2144 = vmatpush1.bf16.msra.mxu0 %v6359_v10  ;;  %2185 = vmatpush1.bf16.msra.mxu1 %v6360_v34  ;;  %v5165_v10 = vld [vmem:[#allocation6 + $0x4] ss:$16 sps:$4 sm:$0xff]  }
 0x5b8   :  { %2145 = vmatprep.subr.bf16.mxu0 %v6361_v45  ;;  %2186 = vmatprep.subr.bf16.mxu1 %v6362_v27  ;;  %6366 = vst [vmem:[#allocation35_spill] sm:$0xff] %v5165_v10  ;;  %v5168_v27 = vld [vmem:[#allocation6 + $0xc] ss:$16 sps:$4 sm:$0xff]  }
 0x5b9   :  { %6367 = vst [vmem:[#allocation36_spill] sm:$0xff] %v5168_v27 }
 0x5bb   :  { %2146 = vmatpush1.bf16.msra.mxu0 %v6363_v28  ;;  %2187 = vmatpush1.bf16.msra.mxu1 %v6364_v49 }
 0x5bc   :  { %2147 = vmatprep.subr.bf16.mxu0 %v6365_v17  ;;  %2188 = vmatprep.subr.bf16.mxu1 %v5030_v55 }
 0x5bf   :  { %2148 = vmatpush1.bf16.msra.mxu0 %v5038_v61  ;;  %2189 = vmatpush1.bf16.msra.mxu1 %v5041_v3 }
 0x5c0   :  { %v3538_v34 = vpop.eup %3537  ;;  %2221 = vmatprep.subr.bf16.mxu0 %v5165_v10  ;;  %2262 = vmatprep.subr.bf16.mxu1 %v5168_v27  ;;  %v5191_v27 = vld [vmem:[#allocation6 + $0x24] ss:$16 sps:$4 sm:$0xff]  }
 0x5c1   :  { %v5171_v21 = vmul.f32 %v3538_v34, %v1989_v62  ;;  %v5185_v62 = vld [vmem:[#allocation6] ss:$16 sps:$4 sm:$0xff]   ;;  %v5188_v34 = vld [vmem:[#allocation6 + $0x8] ss:$16 sps:$4 sm:$0xff]   ;;  %6372 = vst [vmem:[#allocation41_spill] sm:$0xff] %v5191_v27 }
 0x5c2   :  { %6370 = vst [vmem:[#allocation39_spill] sm:$0xff] %v5185_v62  ;;  %6371 = vst [vmem:[#allocation40_spill] sm:$0xff] %v5188_v34 }
 0x5c3   :  { %6368 = vst [vmem:[#allocation37_spill] sm:$0xff] %v5171_v21  ;;  %v2116_v17 = vpack.c.bf16 %v5171_v21, %v5171_v21  ;;  %v2814_v3 = vmul.f32 %v5178_v56, %v5171_v21  ;;  %v5208_v21 = vld [vmem:[#allocation6 + $0x4c] ss:$16 sps:$4 sm:$0xff]  }
 0x5c4   :  { %6377 = vst [vmem:[#allocation49_spill] sm:$0xff] %v5208_v21 }
 0x5c5   :  { %2149 = vmatprep.mubr.bf16.mxu0 %v2116_v17  ;;  %2190 = vmatprep.mubr.bf16.mxu1 %v2116_v17  ;;  %v2815_v10 = vsel %vm2798_vm0, %v2814_v3, 0.0  ;;  %v5194_v17 = vld [vmem:[#allocation6 + $0x2c] ss:$16 sps:$4 sm:$0xff]   ;;  %v5199_v3 = vld [vmem:[#allocation6 + $0x20] ss:$16 sps:$4 sm:$0xff]  }
 0x5c6   :  { %2816 = vadd.xlane.f32.xlu1 %v2815_v10  ;;  %2150 = vmatmul.mubr.bf16.vlgmr.msra.gmra.mrb[44].mxu0 %v5091_v32  ;;  %6373 = vst [vmem:[#allocation42_spill] sm:$0xff] %v5194_v17  ;;  %6374 = vst [vmem:[#allocation43_spill] sm:$0xff] %v5199_v3  ;;  %v5205_v10 = vld [vmem:[#allocation6 + $0x44] ss:$16 sps:$4 sm:$0xff]  }
 0x5c7   :  { %2191 = vmatmul.mubr.bf16.vlgmr.msra.gmra.mrb[44].mxu1 %v5091_v32  ;;  %2222 = vmatpush1.bf16.msra.mxu0 %v5185_v62  ;;  %v5202_v32 = vld [vmem:[#allocation6 + $0x28] ss:$16 sps:$4 sm:$0xff]   ;;  %6376 = vst [vmem:[#allocation47_spill] sm:$0xff] %v5205_v10 }
 0x5c8   :  { %2263 = vmatpush1.bf16.msra.mxu1 %v5188_v34  ;;  %2223 = vmatprep.subr.bf16.mxu0 %v5191_v27  ;;  %6375 = vst [vmem:[#allocation46_spill] sm:$0xff] %v5202_v32 }
 0x5c9   :  { %2264 = vmatprep.subr.bf16.mxu1 %v5194_v17  ;;  %2253 = vmatprep.mubr.bf16.mxu0 %v6234_v18  ;;  %v5211_v17 = vld [vmem:[#allocation6 + $0x40] ss:$16 sps:$4 sm:$0xff]  }
 0x5ca   :  { %2294 = vmatprep.mubr.bf16.mxu1 %v6234_v18  ;;  %6378 = vst [vmem:[#allocation50_spill] sm:$0xff] %v5211_v17  ;;  %v5214_v18 = vld [vmem:[#allocation6 + $0x48] ss:$16 sps:$4 sm:$0xff]  }
 0x5cb   :  { %2224 = vmatpush1.bf16.msra.mxu0 %v5199_v3  ;;  %6379 = vst [vmem:[#allocation52_spill] sm:$0xff] %v5214_v18  ;;  %v5217_v3 = vld [vmem:[#allocation6 + $0x64] ss:$16 sps:$4 sm:$0xff]  }
 0x5cc   :  { %2265 = vmatpush1.bf16.msra.mxu1 %v5202_v32  ;;  %2225 = vmatprep.subr.bf16.mxu0 %v5205_v10  ;;  %6380 = vst [vmem:[#allocation55_spill] sm:$0xff] %v5217_v3  ;;  %v5220_v32 = vld [vmem:[#allocation6 + $0x6c] ss:$16 sps:$4 sm:$0xff]   ;;  %v5223_v10 = vld [vmem:[#allocation6 + $0x60] ss:$16 sps:$4 sm:$0xff]  }
 0x5cd   :  { %2266 = vmatprep.subr.bf16.mxu1 %v5208_v21  ;;  %6381 = vst [vmem:[#allocation56_spill] sm:$0xff] %v5220_v32  ;;  %6382 = vst [vmem:[#allocation60_spill] sm:$0xff] %v5223_v10  ;;  %v5226_v21 = vld [vmem:[#allocation6 + $0x68] ss:$16 sps:$4 sm:$0xff]  }
 0x5ce   :  { %6383 = vst [vmem:[#allocation63_spill] sm:$0xff] %v5226_v21 }
 0x5cf   :  { %2226 = vmatpush1.bf16.msra.mxu0 %v5211_v17  ;;  %v5229_v17 = vld [vmem:[#allocation6 + $0x84] ss:$16 sps:$4 sm:$0xff]  }
 0x5d0   :  { %2267 = vmatpush1.bf16.msra.mxu1 %v5214_v18  ;;  %2227 = vmatprep.subr.bf16.mxu0 %v5217_v3  ;;  %6384 = vst [vmem:[#allocation64_spill] sm:$0xff] %v5229_v17  ;;  %v5232_v18 = vld [vmem:[#allocation6 + $0x8c] ss:$16 sps:$4 sm:$0xff]   ;;  %v5235_v3 = vld [vmem:[#allocation6 + $0x80] ss:$16 sps:$4 sm:$0xff]  }
 0x5d1   :  { %2268 = vmatprep.subr.bf16.mxu1 %v5220_v32  ;;  %6385 = vst [vmem:[#allocation65_spill] sm:$0xff] %v5232_v18  ;;  %6386 = vst [vmem:[#allocation66_spill] sm:$0xff] %v5235_v3  ;;  %v5238_v32 = vld [vmem:[#allocation6 + $0x88] ss:$16 sps:$4 sm:$0xff]  }
 0x5d2   :  { %6387 = vst [vmem:[#allocation53_spill] sm:$0xff] %v5238_v32 }
 0x5d3   :  { %2228 = vmatpush1.bf16.msra.mxu0 %v5223_v10  ;;  %v5241_v10 = vld [vmem:[#allocation6 + $0xa4] ss:$16 sps:$4 sm:$0xff]  }
 0x5d4   :  { %2269 = vmatpush1.bf16.msra.mxu1 %v5226_v21  ;;  %2229 = vmatprep.subr.bf16.mxu0 %v5229_v17  ;;  %6388 = vst [vmem:[#allocation54_spill] sm:$0xff] %v5241_v10  ;;  %v5244_v21 = vld [vmem:[#allocation6 + $0xac] ss:$16 sps:$4 sm:$0xff]   ;;  %v5247_v17 = vld [vmem:[#allocation6 + $0xa0] ss:$16 sps:$4 sm:$0xff]  }
 0x5d5   :  { %2270 = vmatprep.subr.bf16.mxu1 %v5232_v18  ;;  %6389 = vst [vmem:[#allocation57_spill] sm:$0xff] %v5244_v21  ;;  %6390 = vst [vmem:[#allocation51_spill] sm:$0xff] %v5247_v17  ;;  %v5250_v18 = vld [vmem:[#allocation6 + $0xa8] ss:$16 sps:$4 sm:$0xff]  }
 0x5d6   :  { %6391 = vst [vmem:[#allocation69_spill] sm:$0xff] %v5250_v18 }
 0x5d7   :  { %2230 = vmatpush1.bf16.msra.mxu0 %v5235_v3  ;;  %v5253_v3 = vld [vmem:[#allocation6 + $0xc4] ss:$16 sps:$4 sm:$0xff]  }
 0x5d8   :  { %2271 = vmatpush1.bf16.msra.mxu1 %v5238_v32  ;;  %2231 = vmatprep.subr.bf16.mxu0 %v5241_v10  ;;  %6392 = vst [vmem:[#allocation70_spill] sm:$0xff] %v5253_v3  ;;  %v5256_v32 = vld [vmem:[#allocation6 + $0xcc] ss:$16 sps:$4 sm:$0xff]   ;;  %v5259_v10 = vld [vmem:[#allocation6 + $0xc0] ss:$16 sps:$4 sm:$0xff]  }
 0x5d9   :  { %2272 = vmatprep.subr.bf16.mxu1 %v5244_v21  ;;  %6393 = vst [vmem:[#allocation74_spill] sm:$0xff] %v5256_v32  ;;  %6394 = vst [vmem:[#allocation83_spill] sm:$0xff] %v5259_v10  ;;  %v5262_v21 = vld [vmem:[#allocation6 + $0xc8] ss:$16 sps:$4 sm:$0xff]  }
 0x5da   :  { %6395 = vst [vmem:[#allocation84_spill] sm:$0xff] %v5262_v21 }
 0x5db   :  { %2232 = vmatpush1.bf16.msra.mxu0 %v5247_v17  ;;  %v5265_v17 = vld [vmem:[#allocation6 + $0xe4] ss:$16 sps:$4 sm:$0xff]  }
 0x5dc   :  { %2273 = vmatpush1.bf16.msra.mxu1 %v5250_v18  ;;  %2233 = vmatprep.subr.bf16.mxu0 %v5253_v3  ;;  %6396 = vst [vmem:[#allocation85_spill] sm:$0xff] %v5265_v17  ;;  %v5268_v18 = vld [vmem:[#allocation6 + $0xec] ss:$16 sps:$4 sm:$0xff]  }
 0x5dd   :  { %2274 = vmatprep.subr.bf16.mxu1 %v5256_v32  ;;  %6397 = vst [vmem:[#allocation86_spill] sm:$0xff] %v5268_v18 }
 0x5df   :  { %2234 = vmatpush1.bf16.msra.mxu0 %v5259_v10 }
 0x5e0   :  { %2275 = vmatpush1.bf16.msra.mxu1 %v5262_v21  ;;  %2235 = vmatprep.subr.bf16.mxu0 %v5265_v17 }
 0x5e1   :  { %2276 = vmatprep.subr.bf16.mxu1 %v5268_v18 }
 0x5e3   :  { %2236 = vmatpush1.bf16.msra.mxu0 %v4821_v26 }
 0x5e4   :  { %2277 = vmatpush1.bf16.msra.mxu1 %v4824_v60  ;;  %2347 = vmatprep.subr.bf16.mxu0 %v4827_v54 }
 0x5e5   :  { %2388 = vmatprep.subr.bf16.mxu1 %v4830_v47 }
 0x655   :  { %v2031_v10 = vpop.f32.mrb[40].mxu0  ;;  %v2072_v32 = vpop.f32.mrb[40].mxu1 }
 0x656   :  { %v2083_v3 = vrot.slane %v2031_v10, 6  ;;  %v2033_v21 = vpop.f32.mrb[41].mxu0  ;;  %v2074_v27 = vpop.f32.mrb[41].mxu1  ;;  %v2085_v47 = vrot.slane %v2072_v32, 6 }
 0x657   :  { %v2084_v34 = vrot.slane %v2033_v21, 6  ;;  %v2035_v62 = vpop.f32.mrb[42].mxu0  ;;  %v2076_v17 = vpop.f32.mrb[42].mxu1  ;;  %v2086_v61 = vrot.slane %v2074_v27, 6 }
 0x658   :  { %v2091_v56 = vadd.f32 %v2083_v3, %v6314_v13  ;;  %v2036_v18 = vpop.f32.mrb[43].mxu0  ;;  %v2077_v55 = vpop.f32.mrb[43].mxu1  ;;  %v2093_v10 = vadd.f32 %v2085_v47, %v6317_v39 }
 0x659   :  { %v2092_v26 = vadd.f32 %v2084_v34, %v6315_v16  ;;  %v2094_v54 = vadd.f32 %v2086_v61, %v6316_v0 }
 0x65a   :  { %v2095_v60 = vmul.f32 0.5, %v2091_v56  ;;  %v2097_v21 = vmul.f32 0.5, %v2093_v10  ;;  %v2109_v56 = vrot.slane %v5088_v4, 6 }
 0x65b   :  { %v2096_v49 = vmul.f32 0.5, %v2092_v26 }
 0x65c   :  { %3539 = vtanh.f32 %v2095_v60 }
 0x65d   :  { %3541 = vtanh.f32 %v2096_v49 }
 0x65e   :  { %3543 = vtanh.f32 %v2094_v54 }
 0x65f   :  { %3545 = vtanh.f32 %v2097_v21 }
 0x666   :  { %v3540_v62 = vpop.eup %3539 }
 0x667   :  { %v2101_v17 = vmul.f32 0.5, %v3540_v62  ;;  %v3542_v28 = vpop.eup %3541 }
 0x668   :  { %v2102_v18 = vmul.f32 0.5, %v3542_v28  ;;  %v3544_v55 = vpop.eup %3543 }
 0x669   :  { %v2104_v3 = vadd.f32 0.5, %v2101_v17  ;;  %v3546_v61 = vpop.eup %3545  ;;  %v6410_v17 = vld [vmem:[#allocation45_spill] sm:$0xff] }
 0x66a   :  { %v2105_v27 = vadd.f32 0.5, %v2102_v18  ;;  %v2103_v49 = vmul.f32 0.5, %v3546_v61  ;;  %v6414_v61 = vld [vmem:[#allocation71_spill] sm:$0xff] }
 0x66b   :  { %v2112_v34 = vmul.f32 %v3544_v55, %v2104_v3  ;;  %v6411_v3 = vld [vmem:[#allocation48_spill] sm:$0xff] }
 0x66c   :  { %v2111_v26 = vmul.f32 %v2109_v56, %v2105_v27  ;;  %v2106_v32 = vadd.f32 0.5, %v2103_v49  ;;  %v6412_v56 = vld [vmem:[#allocation58_spill] sm:$0xff]  ;;  %v6417_v49 = vld [vmem:[#allocation75_spill] sm:$0xff] }
 0x66e   :  { %v5280_v60 = vadd.f32 %v2112_v34, %v2111_v26  ;;  %v6413_v26 = vld [vmem:[#allocation59_spill] sm:$0xff] }
 0x670   :  { %3547 = vtanh.f32 %v5280_v60 }
 0x67a   :  { %v3548_v54 = vpop.eup %3547 }
 0x67b   :  { %v2115_v47 = vmul.f32 %v3548_v54, %v2106_v32  ;;  %v6418_v32 = vld [vmem:[#allocation76_spill] sm:$0xff]  ;;  %v6419_v54 = vld [vmem:[#allocation77_spill] sm:$0xff] }
 0x67d   :  { %v2217_v10 = vpack.c.bf16 %v2115_v47, %v2115_v47 }
 0x67f   :  { %v5283_v62 = vrot.slane %v2217_v10, 1 }
 0x681   :  { %2254 = vmatmul.mubr.bf16.vlgmr.msra.gmra.mrb[48].mxu0 %v5283_v62  ;;  %2295 = vmatmul.mubr.bf16.vlgmr.msra.gmra.mrb[48].mxu1 %v5283_v62 }
 0x682   :  { %2348 = vmatpush1.bf16.msra.mxu0 %v4845_v53  ;;  %2389 = vmatpush1.bf16.msra.mxu1 %v4848_v5 }
 0x683   :  { %2349 = vmatprep.subr.bf16.mxu0 %v4851_v25  ;;  %2390 = vmatprep.subr.bf16.mxu1 %v4854_v19 }
 0x686   :  { %2350 = vmatpush1.bf16.msra.mxu0 %v4857_v6  ;;  %2391 = vmatpush1.bf16.msra.mxu1 %v4860_v7 }
 0x687   :  { %2351 = vmatprep.subr.bf16.mxu0 %v6318_v33  ;;  %2392 = vmatprep.subr.bf16.mxu1 %v6319_v57 }
 0x68a   :  { %2352 = vmatpush1.bf16.msra.mxu0 %v6320_v46  ;;  %2393 = vmatpush1.bf16.msra.mxu1 %v6321_v15  ;;  %v6398_v46 = vld [vmem:[#allocation61_spill] sm:$0xff] }
 0x68b   :  { %2353 = vmatprep.subr.bf16.mxu0 %v6322_v9  ;;  %2394 = vmatprep.subr.bf16.mxu1 %v6323_v35 }
 0x68e   :  { %2354 = vmatpush1.bf16.msra.mxu0 %v6324_v12  ;;  %2395 = vmatpush1.bf16.msra.mxu1 %v6325_v1  ;;  %v6401_v12 = vld [vmem:[#allocation67_spill] sm:$0xff]  ;;  %v6402_v1 = vld [vmem:[#allocation16_spill] sm:$0xff] }
 0x68f   :  { %2355 = vmatprep.subr.bf16.mxu0 %v6326_v8  ;;  %2396 = vmatprep.subr.bf16.mxu1 %v6327_v20  ;;  %v6403_v8 = vld [vmem:[#allocation28_spill] sm:$0xff] }
 0x692   :  { %2356 = vmatpush1.bf16.msra.mxu0 %v6328_v44  ;;  %2397 = vmatpush1.bf16.msra.mxu1 %v6329_v50  ;;  %v6404_v44 = vld [vmem:[#allocation29_spill] sm:$0xff]  ;;  %v6405_v50 = vld [vmem:[#allocation30_spill] sm:$0xff] }
 0x693   :  { %2357 = vmatprep.subr.bf16.mxu0 %v6330_v14  ;;  %2398 = vmatprep.subr.bf16.mxu1 %v6331_v51  ;;  %v6406_v51 = vld [vmem:[#allocation31_spill] sm:$0xff] }
 0x696   :  { %2358 = vmatpush1.bf16.msra.mxu0 %v6332_v52  ;;  %2399 = vmatpush1.bf16.msra.mxu1 %v6333_v2  ;;  %v6407_v52 = vld [vmem:[#allocation32_spill] sm:$0xff] }
 0x697   :  { %2359 = vmatprep.subr.bf16.mxu0 %v4912_v22  ;;  %2400 = vmatprep.subr.bf16.mxu1 %v6334_v40  ;;  %v6399_v22 = vld [vmem:[#allocation62_spill] sm:$0xff] }
 0x699   :  { %v2151_v53 = vpop.f32.mrb[44].mxu0 }
 0x69a   :  { %v2152_v5 = vadd.f32 %v2151_v53, %v6335_v41  ;;  %v2192_v25 = vpop.f32.mrb[44].mxu1  ;;  %v2153_v19 = vpop.f32.mrb[45].mxu0  ;;  %2360 = vmatpush1.bf16.msra.mxu0 %v4919_v37  ;;  %2401 = vmatpush1.bf16.msra.mxu1 %v4922_v23  ;;  %v6400_v37 = vld [vmem:[#allocation26_spill] sm:$0xff] }
 0x69b   :  { %v2154_v6 = vadd.f32 %v2153_v19, %v4527_v48  ;;  %v2194_v7 = vpop.f32.mrb[45].mxu1  ;;  %v2155_v28 = vpop.f32.mrb[46].mxu0  ;;  %2361 = vmatprep.subr.bf16.mxu0 %v6398_v46  ;;  %2402 = vmatprep.subr.bf16.mxu1 %v6399_v22  ;;  %v2193_v23 = vadd.f32 %v2192_v25, %v6345_v29  ;;  %v6424_v25 = vld [vmem:[#allocation82_spill] sm:$0xff]  ;;  %v6428_v46 = vld [vmem:[#allocation39_spill] sm:$0xff]  ;;  %v6429_v22 = vld [vmem:[#allocation40_spill] sm:$0xff] }
 0x69c   :  { %v2199_v4 = vmul.f32 0.5, %v2152_v5  ;;  %v2196_v33 = vpop.f32.mrb[46].mxu1  ;;  %v2156_v57 = vpop.f32.mrb[47].mxu0  ;;  %v2195_v35 = vadd.f32 %v2194_v7, %v6340_v59  ;;  %v6423_v5 = vld [vmem:[#allocation81_spill] sm:$0xff]  ;;  %v6426_v7 = vld [vmem:[#allocation35_spill] sm:$0xff]  ;;  %v6427_v28 = vld [vmem:[#allocation36_spill] sm:$0xff] }
 0x69d   :  { %v2200_v15 = vmul.f32 0.5, %v2154_v6  ;;  %v2197_v9 = vpop.f32.mrb[47].mxu1  ;;  %v2201_v20 = vmul.f32 0.5, %v2193_v23  ;;  %v6434_v23 = vld [vmem:[#allocation46_spill] sm:$0xff] }
 0x69e   :  { %3549 = vtanh.f32 %v2199_v4  ;;  %2362 = vmatpush1.bf16.msra.mxu0 %v6336_v24  ;;  %2403 = vmatpush1.bf16.msra.mxu1 %v6337_v11  ;;  %v6408_v11 = vld [vmem:[#allocation33_spill] sm:$0xff]  ;;  %v6431_v9 = vld [vmem:[#allocation42_spill] sm:$0xff] }
 0x69f   :  { %3551 = vtanh.f32 %v2200_v15  ;;  %2363 = vmatprep.subr.bf16.mxu0 %v6338_v42  ;;  %2404 = vmatprep.subr.bf16.mxu1 %v6400_v37  ;;  %v6409_v42 = vld [vmem:[#allocation44_spill] sm:$0xff]  ;;  %v6430_v15 = vld [vmem:[#allocation41_spill] sm:$0xff]  ;;  %v6433_v37 = vld [vmem:[#allocation43_spill] sm:$0xff] }
 0x6a0   :  { %3553 = vtanh.f32 %v2195_v35  ;;  %v6432_v35 = vmov 0  }
 0x6a1   :  { %3555 = vtanh.f32 %v2201_v20  ;;  %v6439_v20 = vld [vmem:[#allocation55_spill] sm:$0xff] }
 0x6a2   :  { %2364 = vmatpush1.bf16.msra.mxu0 %v6341_v58  ;;  %2405 = vmatpush1.bf16.msra.mxu1 %v6401_v12  ;;  %v6435_v12 = vld [vmem:[#allocation47_spill] sm:$0xff] }
 0x6a3   :  { %2365 = vmatprep.subr.bf16.mxu0 %v6402_v1  ;;  %2406 = vmatprep.subr.bf16.mxu1 %v6403_v8  ;;  %v6436_v1 = vld [vmem:[#allocation49_spill] sm:$0xff]  ;;  %v6438_v8 = vld [vmem:[#allocation52_spill] sm:$0xff] }
 0x6a6   :  { %2366 = vmatpush1.bf16.msra.mxu0 %v6404_v44  ;;  %2407 = vmatpush1.bf16.msra.mxu1 %v6405_v50  ;;  %v6440_v44 = vld [vmem:[#allocation56_spill] sm:$0xff] }
 0x6a7   :  { %2367 = vmatprep.subr.bf16.mxu0 %v6406_v51  ;;  %2408 = vmatprep.subr.bf16.mxu1 %v6407_v52  ;;  %v6441_v50 = vld [vmem:[#allocation60_spill] sm:$0xff]  ;;  %v6444_v52 = vld [vmem:[#allocation65_spill] sm:$0xff] }
 0x6a8   :  { %v3550_v14 = vpop.eup %3549  ;;  %v6443_v51 = vld [vmem:[#allocation64_spill] sm:$0xff] }
 0x6a9   :  { %v2205_v2 = vmul.f32 0.5, %v3550_v14  ;;  %v3552_v40 = vpop.eup %3551  ;;  %v6442_v14 = vld [vmem:[#allocation63_spill] sm:$0xff] }
 0x6aa   :  { %v2206_v58 = vmul.f32 0.5, %v3552_v40  ;;  %2368 = vmatpush1.bf16.msra.mxu0 %v6408_v11  ;;  %2409 = vmatpush1.bf16.msra.mxu1 %v6409_v42  ;;  %v3554_v21 = vpop.eup %3553  ;;  %v6446_v40 = vld [vmem:[#allocation53_spill] sm:$0xff]  ;;  %v6449_v11 = vld [vmem:[#allocation51_spill] sm:$0xff] }
 0x6ab   :  { %v2208_v24 = vadd.f32 0.5, %v2205_v2  ;;  %2369 = vmatprep.subr.bf16.mxu0 %v6410_v17  ;;  %2410 = vmatprep.subr.bf16.mxu1 %v6411_v3  ;;  %v6445_v2 = vld [vmem:[#allocation66_spill] sm:$0xff]  ;;  %v6450_v42 = vld [vmem:[#allocation69_spill] sm:$0xff]  ;;  %v6453_v3 = vld [vmem:[#allocation83_spill] sm:$0xff] }
 0x6ac   :  { %v2209_v18 = vadd.f32 0.5, %v2206_v58  ;;  %v6448_v58 = vld [vmem:[#allocation57_spill] sm:$0xff]  ;;  %v6452_v17 = vld [vmem:[#allocation74_spill] sm:$0xff] }
 0x6ad   :  { %v2213_v55 = vmul.f32 %v3554_v21, %v2208_v24  ;;  %v6447_v24 = vld [vmem:[#allocation54_spill] sm:$0xff] }
 0x6ae   :  { %v2212_v27 = vmul.f32 %v2209_v18, %v5150_v38  ;;  %2370 = vmatpush1.bf16.msra.mxu0 %v6350_v30  ;;  %2411 = vmatpush1.bf16.msra.mxu1 %v6351_v31  ;;  %v3556_v38 = vpop.eup %3555  ;;  %v6415_v30 = vld [vmem:[#allocation72_spill] sm:$0xff]  ;;  %v6416_v31 = vld [vmem:[#allocation73_spill] sm:$0xff]  ;;  %v6451_v21 = vld [vmem:[#allocation70_spill] sm:$0xff] }
 0x6af   :  { %2371 = vmatprep.subr.bf16.mxu0 %v6352_v63  ;;  %2412 = vmatprep.subr.bf16.mxu1 %v6412_v56  ;;  %v2207_v63 = vmul.f32 0.5, %v3556_v38  ;;  %v6454_v18 = vld [vmem:[#allocation84_spill] sm:$0xff]  ;;  %v3754_v56 = vld [vmem:[#allocation6 + $0xe0] ss:$16 sps:$4 sm:$0xff]   ;;  %v5400_v38 = vld [vmem:[#allocation8 + $0xc] ss:$16 sps:$4 sm:$0xff]  }
 0x6b0   :  { %v5340_v34 = vadd.f32 %v2213_v55, %v2212_v27  ;;  %v6455_v55 = vld [vmem:[#allocation85_spill] sm:$0xff]  ;;  %v6456_v27 = vld [vmem:[#allocation86_spill] sm:$0xff] }
 0x6b1   :  { %v2210_v47 = vadd.f32 0.5, %v2207_v63 }
 0x6b2   :  { %3557 = vtanh.f32 %v5340_v34  ;;  %2372 = vmatpush1.bf16.msra.mxu0 %v6413_v26  ;;  %2413 = vmatpush1.bf16.msra.mxu1 %v6356_v36  ;;  %v6420_v36 = vld [vmem:[#allocation78_spill] sm:$0xff] }
 0x6b3   :  { %2373 = vmatprep.subr.bf16.mxu0 %v6357_v43  ;;  %2414 = vmatprep.subr.bf16.mxu1 %v6414_v61  ;;  %v6421_v43 = vld [vmem:[#allocation79_spill] sm:$0xff]  ;;  %v3755_v26 = vld [vmem:[#allocation6 + $0xe8] ss:$16 sps:$4 sm:$0xff]   ;;  %v5397_v61 = vld [vmem:[#allocation8 + $0x4] ss:$16 sps:$4 sm:$0xff]  }
 0x6b6   :  { %2374 = vmatpush1.bf16.msra.mxu0 %v6415_v30  ;;  %2415 = vmatpush1.bf16.msra.mxu1 %v6416_v31 }
 0x6b7   :  { %2375 = vmatprep.subr.bf16.mxu0 %v6361_v45  ;;  %2416 = vmatprep.subr.bf16.mxu1 %v6417_v49  ;;  %v6425_v45 = vld [vmem:[#allocation38_spill] sm:$0xff] }
 0x6ba   :  { %2376 = vmatpush1.bf16.msra.mxu0 %v6418_v32  ;;  %2417 = vmatpush1.bf16.msra.mxu1 %v6419_v54 }
 0x6bb   :  { %2377 = vmatprep.subr.bf16.mxu0 %v6420_v36  ;;  %2418 = vmatprep.subr.bf16.mxu1 %v6421_v43 }
 0x6bc   :  { %v3558_v10 = vpop.eup %3557 }
 0x6bd   :  { %v5355_v53 = vmul.f32 %v3558_v10, %v2210_v47 }
 0x6be   :  { %2378 = vmatpush1.bf16.msra.mxu0 %v6423_v5  ;;  %2419 = vmatpush1.bf16.msra.mxu1 %v6424_v25 }
 0x6bf   :  { %6422 = vst [vmem:[#allocation61_spill] sm:$0xff] %v5355_v53  ;;  %v2819_v19 = vmul.f32 %v6425_v45, %v5355_v53  ;;  %v2341_v6 = vrot.slane %v5355_v53, 6  ;;  %2451 = vmatprep.subr.bf16.mxu0 %v6426_v7  ;;  %2492 = vmatprep.subr.bf16.mxu1 %v6427_v28  ;;  %v5545_v53 = vld [vmem:[#allocation8 + $0x164] ss:$16 sps:$4 sm:$0xff]  }
 0x6c1   :  { %v2820_v4 = vsel %vm2798_vm0, %v2819_v19, 0.0  ;;  %v2343_v33 = vpack.c.bf16 %v2341_v6, %v2341_v6 }
 0x6c2   :  { %2821 = vadd.xlane.f32.xlu0 %v2820_v4 }
 0x6c3   :  { %v2345_v57 = vrot.slane %v2343_v33, 1 }
 0x6c5   :  { %2379 = vmatprep.mubr.bf16.mxu0 %v2345_v57  ;;  %2420 = vmatprep.mubr.bf16.mxu1 %v2345_v57 }
 0x6c6   :  { %2380 = vmatmul.mubr.bf16.vlgmr.msra.gmra.mrb[52].mxu0 %v5283_v62  ;;  %2421 = vmatmul.mubr.bf16.vlgmr.msra.gmra.mrb[52].mxu1 %v5283_v62  ;;  %v6437_v62 = vld [vmem:[#allocation50_spill] sm:$0xff] }
 0x6c7   :  { %2452 = vmatpush1.bf16.msra.mxu0 %v6428_v46  ;;  %2493 = vmatpush1.bf16.msra.mxu1 %v6429_v22 }
 0x6c8   :  { %2453 = vmatprep.subr.bf16.mxu0 %v6430_v15  ;;  %2494 = vmatprep.subr.bf16.mxu1 %v6431_v9 }
 0x6c9   :  { %2483 = vmatprep.mubr.bf16.mxu0 %v6432_v35  ;;  %2524 = vmatprep.mubr.bf16.mxu1 %v6432_v35  ;;  %v5548_v35 = vld [vmem:[#allocation8 + $0x16c] ss:$16 sps:$4 sm:$0xff]  }
 0x6cb   :  { %2454 = vmatpush1.bf16.msra.mxu0 %v6433_v37  ;;  %2495 = vmatpush1.bf16.msra.mxu1 %v6434_v23 }
 0x6cc   :  { %2455 = vmatprep.subr.bf16.mxu0 %v6435_v12  ;;  %2496 = vmatprep.subr.bf16.mxu1 %v6436_v1  ;;  %v2333_v1 = vrot.slane %v5280_v60, 6  ;;  %v5418_v60 = vld [vmem:[#allocation8 + $0x8] ss:$16 sps:$4 sm:$0xff]  }
 0x6cf   :  { %2456 = vmatpush1.bf16.msra.mxu0 %v6437_v62  ;;  %2497 = vmatpush1.bf16.msra.mxu1 %v6438_v8 }
 0x6d0   :  { %2457 = vmatprep.subr.bf16.mxu0 %v6439_v20  ;;  %2498 = vmatprep.subr.bf16.mxu1 %v6440_v44 }
 0x6d3   :  { %2458 = vmatpush1.bf16.msra.mxu0 %v6441_v50  ;;  %2499 = vmatpush1.bf16.msra.mxu1 %v6442_v14 }
 0x6d4   :  { %2459 = vmatprep.subr.bf16.mxu0 %v6443_v51  ;;  %2500 = vmatprep.subr.bf16.mxu1 %v6444_v52 }
 0x6d7   :  { %2460 = vmatpush1.bf16.msra.mxu0 %v6445_v2  ;;  %2501 = vmatpush1.bf16.msra.mxu1 %v6446_v40 }
 0x6d8   :  { %2461 = vmatprep.subr.bf16.mxu0 %v6447_v24  ;;  %2502 = vmatprep.subr.bf16.mxu1 %v6448_v58  ;;  %v5415_v24 = vld [vmem:[#allocation8] ss:$16 sps:$4 sm:$0xff]   ;;  %v5421_v58 = vld [vmem:[#allocation8 + $0x24] ss:$16 sps:$4 sm:$0xff]  }
 0x6db   :  { %2462 = vmatpush1.bf16.msra.mxu0 %v6449_v11  ;;  %2503 = vmatpush1.bf16.msra.mxu1 %v6450_v42  ;;  %v5424_v11 = vld [vmem:[#allocation8 + $0x2c] ss:$16 sps:$4 sm:$0xff]   ;;  %v5427_v42 = vld [vmem:[#allocation8 + $0x20] ss:$16 sps:$4 sm:$0xff]  }
 0x6dc   :  { %2463 = vmatprep.subr.bf16.mxu0 %v6451_v21  ;;  %2504 = vmatprep.subr.bf16.mxu1 %v6452_v17  ;;  %v5430_v21 = vld [vmem:[#allocation8 + $0x28] ss:$16 sps:$4 sm:$0xff]   ;;  %v5433_v17 = vld [vmem:[#allocation8 + $0x44] ss:$16 sps:$4 sm:$0xff]  }
 0x6df   :  { %2464 = vmatpush1.bf16.msra.mxu0 %v6453_v3  ;;  %2505 = vmatpush1.bf16.msra.mxu1 %v6454_v18  ;;  %v5436_v3 = vld [vmem:[#allocation8 + $0x4c] ss:$16 sps:$4 sm:$0xff]   ;;  %v5439_v18 = vld [vmem:[#allocation8 + $0x40] ss:$16 sps:$4 sm:$0xff]  }
 0x6e0   :  { %2465 = vmatprep.subr.bf16.mxu0 %v6455_v55  ;;  %2506 = vmatprep.subr.bf16.mxu1 %v6456_v27  ;;  %v5442_v55 = vld [vmem:[#allocation8 + $0x48] ss:$16 sps:$4 sm:$0xff]   ;;  %v5445_v27 = vld [vmem:[#allocation8 + $0x64] ss:$16 sps:$4 sm:$0xff]  }
 0x6e3   :  { %2466 = vmatpush1.bf16.msra.mxu0 %v3754_v56  ;;  %2507 = vmatpush1.bf16.msra.mxu1 %v3755_v26  ;;  %v5448_v56 = vld [vmem:[#allocation8 + $0x6c] ss:$16 sps:$4 sm:$0xff]   ;;  %v5451_v26 = vld [vmem:[#allocation8 + $0x60] ss:$16 sps:$4 sm:$0xff]  }
 0x6e4   :  { %2577 = vmatprep.subr.bf16.mxu0 %v5397_v61  ;;  %2618 = vmatprep.subr.bf16.mxu1 %v5400_v38 }
 0x754   :  { %v2255_v30 = vpop.f32.mrb[48].mxu0  ;;  %v2296_v31 = vpop.f32.mrb[48].mxu1 }
 0x755   :  { %v2307_v63 = vrot.slane %v2255_v30, 4  ;;  %v2257_v49 = vpop.f32.mrb[49].mxu0  ;;  %v2298_v32 = vpop.f32.mrb[49].mxu1  ;;  %v2309_v4 = vrot.slane %v2296_v31, 4  ;;  %v5454_v30 = vld [vmem:[#allocation8 + $0x68] ss:$16 sps:$4 sm:$0xff]  }
 0x756   :  { %v2308_v54 = vrot.slane %v2257_v49, 4  ;;  %v2259_v47 = vpop.f32.mrb[50].mxu0  ;;  %v2300_v36 = vpop.f32.mrb[50].mxu1  ;;  %v2310_v10 = vrot.slane %v2298_v32, 4  ;;  %v5457_v31 = vld [vmem:[#allocation8 + $0x84] ss:$16 sps:$4 sm:$0xff]  }
 0x757   :  { %v2315_v43 = vadd.f32 %v2307_v63, %v6314_v13  ;;  %v2260_v5 = vpop.f32.mrb[51].mxu0  ;;  %v2301_v25 = vpop.f32.mrb[51].mxu1  ;;  %v2317_v33 = vadd.f32 %v2309_v4, %v6317_v39  ;;  %v5460_v63 = vld [vmem:[#allocation8 + $0x8c] ss:$16 sps:$4 sm:$0xff]   ;;  %v5463_v49 = vld [vmem:[#allocation8 + $0x80] ss:$16 sps:$4 sm:$0xff]  }
 0x758   :  { %v2316_v19 = vadd.f32 %v2308_v54, %v6315_v16  ;;  %v2318_v28 = vadd.f32 %v2310_v10, %v6316_v0  ;;  %v5466_v32 = vld [vmem:[#allocation8 + $0x88] ss:$16 sps:$4 sm:$0xff]   ;;  %v5469_v54 = vld [vmem:[#allocation8 + $0xa4] ss:$16 sps:$4 sm:$0xff]   ;;  %v5472_v47 = vld [vmem:[#allocation8 + $0xac] ss:$16 sps:$4 sm:$0xff]  }
 0x759   :  { %v2319_v6 = vmul.f32 0.5, %v2315_v43  ;;  %v2321_v57 = vmul.f32 0.5, %v2317_v33  ;;  %v5475_v36 = vld [vmem:[#allocation8 + $0xa0] ss:$16 sps:$4 sm:$0xff]   ;;  %v5478_v43 = vld [vmem:[#allocation8 + $0xa8] ss:$16 sps:$4 sm:$0xff]  }
 0x75a   :  { %v2320_v7 = vmul.f32 0.5, %v2316_v19  ;;  %v5481_v10 = vld [vmem:[#allocation8 + $0xc4] ss:$16 sps:$4 sm:$0xff]   ;;  %v5484_v5 = vld [vmem:[#allocation8 + $0xcc] ss:$16 sps:$4 sm:$0xff]  }
 0x75b   :  { %3559 = vtanh.f32 %v2319_v6  ;;  %v5488_v4 = vld [vmem:[#allocation8 + $0xc0] ss:$16 sps:$4 sm:$0xff]   ;;  %v5491_v33 = vld [vmem:[#allocation8 + $0xc8] ss:$16 sps:$4 sm:$0xff]   ;;  %v5585_v39 = vld [vmem:[#allocation8 + $0x1c4] ss:$16 sps:$4 sm:$0xff]  }
 0x75c   :  { %3561 = vtanh.f32 %v2320_v7  ;;  %6462 = vst [vmem:[#allocation29_spill] sm:$0xff] %v5585_v39  ;;  %v5591_v16 = vld [vmem:[#allocation8 + $0x1c0] ss:$16 sps:$4 sm:$0xff]   ;;  %v5594_v13 = vld [vmem:[#allocation8 + $0x1c8] ss:$16 sps:$4 sm:$0xff]  }
 0x75d   :  { %3563 = vtanh.f32 %v2318_v28  ;;  %6464 = vst [vmem:[#allocation31_spill] sm:$0xff] %v5591_v16 }
 0x75e   :  { %3565 = vtanh.f32 %v2321_v57 }
 0x765   :  { %v3560_v46 = vpop.eup %3559 }
 0x766   :  { %v2325_v22 = vmul.f32 0.5, %v3560_v46  ;;  %v3562_v15 = vpop.eup %3561 }
 0x767   :  { %v2326_v37 = vmul.f32 0.5, %v3562_v15  ;;  %v3564_v23 = vpop.eup %3563  ;;  %v5495_v15 = vld [vmem:[#allocation8 + $0xe4] ss:$16 sps:$4 sm:$0xff]  }
 0x768   :  { %v2328_v9 = vadd.f32 0.5, %v2325_v22  ;;  %v3566_v44 = vpop.eup %3565 }
 0x769   :  { %v2329_v12 = vadd.f32 0.5, %v2326_v37  ;;  %v2327_v50 = vmul.f32 0.5, %v3566_v44  ;;  %v5505_v44 = vld [vmem:[#allocation8 + $0xe8] ss:$16 sps:$4 sm:$0xff]  }
 0x76a   :  { %v2336_v62 = vmul.f32 %v3564_v23, %v2328_v9  ;;  %v5498_v9 = vld [vmem:[#allocation8 + $0xec] ss:$16 sps:$4 sm:$0xff]  }
 0x76b   :  { %v2335_v8 = vmul.f32 %v2333_v1, %v2329_v12  ;;  %v2330_v14 = vadd.f32 0.5, %v2327_v50  ;;  %v5508_v50 = vld [vmem:[#allocation8 + $0x104] ss:$16 sps:$4 sm:$0xff]  }
 0x76d   :  { %v5408_v20 = vadd.f32 %v2336_v62, %v2335_v8  ;;  %v5502_v8 = vld [vmem:[#allocation8 + $0xe0] ss:$16 sps:$4 sm:$0xff]  }
 0x76f   :  { %6457 = vst [vmem:[#allocation62_spill] sm:$0xff] %v5408_v20  ;;  %3567 = vtanh.f32 %v5408_v20  ;;  %v5582_v20 = vld [vmem:[#allocation8 + $0x1a8] ss:$16 sps:$4 sm:$0xff]  }
 0x770   :  { %6461 = vst [vmem:[#allocation28_spill] sm:$0xff] %v5582_v20 }
 0x779   :  { %v3568_v51 = vpop.eup %3567 }
 0x77a   :  { %v2339_v52 = vmul.f32 %v3568_v51, %v2330_v14  ;;  %v5511_v14 = vld [vmem:[#allocation8 + $0x10c] ss:$16 sps:$4 sm:$0xff]   ;;  %v5514_v51 = vld [vmem:[#allocation8 + $0x100] ss:$16 sps:$4 sm:$0xff]  }
 0x77c   :  { %v2447_v2 = vpack.c.bf16 %v2339_v52, %v2339_v52  ;;  %v5517_v52 = vld [vmem:[#allocation8 + $0x108] ss:$16 sps:$4 sm:$0xff]  }
 0x77e   :  { %v5411_v40 = vrot.slane %v2447_v2, 2 }
 0x780   :  { %2484 = vmatmul.mubr.bf16.vlgmr.msra.gmra.mrb[56].mxu0 %v5411_v40  ;;  %2525 = vmatmul.mubr.bf16.vlgmr.msra.gmra.mrb[56].mxu1 %v5411_v40 }
 0x781   :  { %2578 = vmatpush1.bf16.msra.mxu0 %v5415_v24  ;;  %2619 = vmatpush1.bf16.msra.mxu1 %v5418_v60 }
 0x782   :  { %2579 = vmatprep.subr.bf16.mxu0 %v5421_v58  ;;  %2620 = vmatprep.subr.bf16.mxu1 %v5424_v11 }
 0x785   :  { %2580 = vmatpush1.bf16.msra.mxu0 %v5427_v42  ;;  %2621 = vmatpush1.bf16.msra.mxu1 %v5430_v21 }
 0x786   :  { %2581 = vmatprep.subr.bf16.mxu0 %v5433_v17  ;;  %2622 = vmatprep.subr.bf16.mxu1 %v5436_v3 }
 0x789   :  { %2582 = vmatpush1.bf16.msra.mxu0 %v5439_v18  ;;  %2623 = vmatpush1.bf16.msra.mxu1 %v5442_v55 }
 0x78a   :  { %2583 = vmatprep.subr.bf16.mxu0 %v5445_v27  ;;  %2624 = vmatprep.subr.bf16.mxu1 %v5448_v56 }
 0x78d   :  { %2584 = vmatpush1.bf16.msra.mxu0 %v5451_v26  ;;  %2625 = vmatpush1.bf16.msra.mxu1 %v5454_v30 }
 0x78e   :  { %2585 = vmatprep.subr.bf16.mxu0 %v5457_v31  ;;  %2626 = vmatprep.subr.bf16.mxu1 %v5460_v63 }
 0x791   :  { %2586 = vmatpush1.bf16.msra.mxu0 %v5463_v49  ;;  %2627 = vmatpush1.bf16.msra.mxu1 %v5466_v32 }
 0x792   :  { %2587 = vmatprep.subr.bf16.mxu0 %v5469_v54  ;;  %2628 = vmatprep.subr.bf16.mxu1 %v5472_v47 }
 0x795   :  { %2588 = vmatpush1.bf16.msra.mxu0 %v5475_v36  ;;  %2629 = vmatpush1.bf16.msra.mxu1 %v5478_v43 }
 0x796   :  { %2589 = vmatprep.subr.bf16.mxu0 %v5481_v10  ;;  %2630 = vmatprep.subr.bf16.mxu1 %v5484_v5 }
 0x799   :  { %v2381_v25 = vpop.f32.mrb[52].mxu0  ;;  %v2422_v19 = vpop.f32.mrb[52].mxu1  ;;  %2590 = vmatpush1.bf16.msra.mxu0 %v5488_v4  ;;  %2631 = vmatpush1.bf16.msra.mxu1 %v5491_v33 }
 0x79a   :  { %v2382_v6 = vadd.f32 %v2381_v25, %v6335_v41  ;;  %v2383_v7 = vpop.f32.mrb[53].mxu0  ;;  %v2424_v28 = vpop.f32.mrb[53].mxu1  ;;  %2591 = vmatprep.subr.bf16.mxu0 %v5495_v15  ;;  %2632 = vmatprep.subr.bf16.mxu1 %v5498_v9  ;;  %v2423_v2 = vadd.f32 %v2422_v19, %v6345_v29  ;;  %v5521_v25 = vld [vmem:[#allocation8 + $0x124] ss:$16 sps:$4 sm:$0xff]   ;;  %v5536_v19 = vld [vmem:[#allocation8 + $0x14c] ss:$16 sps:$4 sm:$0xff]  }
 0x79b   :  { %v2384_v57 = vadd.f32 %v2383_v7, %v4527_v48  ;;  %v2385_v46 = vpop.f32.mrb[54].mxu0  ;;  %v2426_v22 = vpop.f32.mrb[54].mxu1  ;;  %v2425_v62 = vadd.f32 %v2424_v28, %v6340_v59  ;;  %v5527_v7 = vld [vmem:[#allocation8 + $0x120] ss:$16 sps:$4 sm:$0xff]   ;;  %v5530_v28 = vld [vmem:[#allocation8 + $0x128] ss:$16 sps:$4 sm:$0xff]  }
 0x79c   :  { %v2429_v37 = vmul.f32 0.5, %v2382_v6  ;;  %v2386_v23 = vpop.f32.mrb[55].mxu0  ;;  %v2427_v12 = vpop.f32.mrb[55].mxu1  ;;  %v5524_v6 = vld [vmem:[#allocation8 + $0x12c] ss:$16 sps:$4 sm:$0xff]  }
 0x79d   :  { %v2430_v1 = vmul.f32 0.5, %v2384_v57  ;;  %2592 = vmatpush1.bf16.msra.mxu0 %v5502_v8  ;;  %2633 = vmatpush1.bf16.msra.mxu1 %v5505_v44  ;;  %v2431_v57 = vmul.f32 0.5, %v2423_v2  ;;  %v5533_v46 = vld [vmem:[#allocation8 + $0x144] ss:$16 sps:$4 sm:$0xff]   ;;  %v5539_v12 = vld [vmem:[#allocation8 + $0x140] ss:$16 sps:$4 sm:$0xff]  }
 0x79e   :  { %3569 = vtanh.f32 %v2429_v37  ;;  %2593 = vmatprep.subr.bf16.mxu0 %v5508_v50  ;;  %2634 = vmatprep.subr.bf16.mxu1 %v5511_v14  ;;  %v5551_v48 = vld [vmem:[#allocation8 + $0x160] ss:$16 sps:$4 sm:$0xff]   ;;  %v5554_v41 = vld [vmem:[#allocation8 + $0x168] ss:$16 sps:$4 sm:$0xff]  }
 0x79f   :  { %3571 = vtanh.f32 %v2430_v1  ;;  %v5542_v1 = vld [vmem:[#allocation8 + $0x148] ss:$16 sps:$4 sm:$0xff]  }
 0x7a0   :  { %3573 = vtanh.f32 %v2425_v62 }
 0x7a1   :  { %2594 = vmatpush1.bf16.msra.mxu0 %v5514_v51  ;;  %2635 = vmatpush1.bf16.msra.mxu1 %v5517_v52  ;;  %3575 = vtanh.f32 %v2431_v57 }
 0x7a2   :  { %2595 = vmatprep.subr.bf16.mxu0 %v5521_v25  ;;  %2636 = vmatprep.subr.bf16.mxu1 %v5524_v6 }
 0x7a5   :  { %2596 = vmatpush1.bf16.msra.mxu0 %v5527_v7  ;;  %2637 = vmatpush1.bf16.msra.mxu1 %v5530_v28 }
 0x7a6   :  { %2597 = vmatprep.subr.bf16.mxu0 %v5533_v46  ;;  %2638 = vmatprep.subr.bf16.mxu1 %v5536_v19 }
 0x7a8   :  { %v3570_v22 = vpop.eup %3569 }
 0x7a9   :  { %v2435_v37 = vmul.f32 0.5, %v3570_v22  ;;  %v3572_v23 = vpop.eup %3571  ;;  %2598 = vmatpush1.bf16.msra.mxu0 %v5539_v12  ;;  %2639 = vmatpush1.bf16.msra.mxu1 %v5542_v1 }
 0x7aa   :  { %v2436_v2 = vmul.f32 0.5, %v3572_v23  ;;  %2599 = vmatprep.subr.bf16.mxu0 %v5545_v53  ;;  %2640 = vmatprep.subr.bf16.mxu1 %v5548_v35  ;;  %v3574_v22 = vpop.eup %3573  ;;  %v5561_v23 = vld [vmem:[#allocation8 + $0x18c] ss:$16 sps:$4 sm:$0xff]  }
 0x7ab   :  { %v2438_v62 = vadd.f32 0.5, %v2435_v37  ;;  %v5558_v37 = vld [vmem:[#allocation8 + $0x184] ss:$16 sps:$4 sm:$0xff]  }
 0x7ac   :  { %v2439_v29 = vadd.f32 0.5, %v2436_v2 }
 0x7ad   :  { %v2443_v59 = vmul.f32 %v3574_v22, %v2438_v62  ;;  %2600 = vmatpush1.bf16.msra.mxu0 %v5551_v48  ;;  %2641 = vmatpush1.bf16.msra.mxu1 %v5554_v41  ;;  %v5566_v62 = vld [vmem:[#allocation8 + $0x180] ss:$16 sps:$4 sm:$0xff]   ;;  %v5569_v22 = vld [vmem:[#allocation8 + $0x188] ss:$16 sps:$4 sm:$0xff]  }
 0x7ae   :  { %v2442_v57 = vmul.f32 %v2439_v29, %v5340_v34  ;;  %2601 = vmatprep.subr.bf16.mxu0 %v5558_v37  ;;  %2642 = vmatprep.subr.bf16.mxu1 %v5561_v23  ;;  %v5573_v29 = vld [vmem:[#allocation8 + $0x1a4] ss:$16 sps:$4 sm:$0xff]   ;;  %v5576_v34 = vld [vmem:[#allocation8 + $0x1ac] ss:$16 sps:$4 sm:$0xff]  }
 0x7af   :  { %6459 = vst [vmem:[#allocation67_spill] sm:$0xff] %v5576_v34 }
 0x7b0   :  { %v5564_v2 = vadd.f32 %v2443_v59, %v2442_v57  ;;  %v3576_v59 = vpop.eup %3575  ;;  %v5579_v57 = vld [vmem:[#allocation8 + $0x1a0] ss:$16 sps:$4 sm:$0xff]  }
 0x7b1   :  { %2602 = vmatpush1.bf16.msra.mxu0 %v5566_v62  ;;  %2643 = vmatpush1.bf16.msra.mxu1 %v5569_v22  ;;  %6460 = vst [vmem:[#allocation16_spill] sm:$0xff] %v5579_v57  ;;  %v2437_v0 = vmul.f32 0.5, %v3576_v59  ;;  %v5605_v59 = vld [vmem:[#allocation8 + $0x1e0] ss:$16 sps:$4 sm:$0xff]  }
 0x7b2   :  { %6458 = vst [vmem:[#allocation26_spill] sm:$0xff] %v5564_v2  ;;  %3577 = vtanh.f32 %v5564_v2  ;;  %2603 = vmatprep.subr.bf16.mxu0 %v5573_v29  ;;  %2644 = vmatprep.subr.bf16.mxu1 %v5576_v34  ;;  %v5588_v2 = vld [vmem:[#allocation8 + $0x1cc] ss:$16 sps:$4 sm:$0xff]  }
 0x7b3   :  { %6463 = vst [vmem:[#allocation30_spill] sm:$0xff] %v5588_v2 }
 0x7b5   :  { %2604 = vmatpush1.bf16.msra.mxu0 %v5579_v57  ;;  %2645 = vmatpush1.bf16.msra.mxu1 %v5582_v20  ;;  %v5597_v57 = vld [vmem:[#allocation8 + $0x1e4] ss:$16 sps:$4 sm:$0xff]   ;;  %v5600_v20 = vld [vmem:[#allocation8 + $0x1ec] ss:$16 sps:$4 sm:$0xff]  }
 0x7b6   :  { %2605 = vmatprep.subr.bf16.mxu0 %v5585_v39  ;;  %2646 = vmatprep.subr.bf16.mxu1 %v5588_v2  ;;  %6465 = vst [vmem:[#allocation32_spill] sm:$0xff] %v5597_v57  ;;  %6466 = vst [vmem:[#allocation33_spill] sm:$0xff] %v5600_v20  ;;  %v2440_v39 = vadd.f32 0.5, %v2437_v0 }
 0x7b9   :  { %2606 = vmatpush1.bf16.msra.mxu0 %v5591_v16  ;;  %2647 = vmatpush1.bf16.msra.mxu1 %v5594_v13  ;;  %v5608_v16 = vld [vmem:[#allocation8 + $0x1e8] ss:$16 sps:$4 sm:$0xff]  }
 0x7ba   :  { %2607 = vmatprep.subr.bf16.mxu0 %v5597_v57  ;;  %2648 = vmatprep.subr.bf16.mxu1 %v5600_v20 }
 0x7bc   :  { %v3578_v34 = vpop.eup %3577 }
 0x7bd   :  { %v5603_v2 = vmul.f32 %v3578_v34, %v2440_v39  ;;  %2608 = vmatpush1.bf16.msra.mxu0 %v5605_v59  ;;  %2649 = vmatpush1.bf16.msra.mxu1 %v5608_v16 }
 0x7be   :  { %2688 = vmatprep.subr.bf16.mxu0 %v5397_v61  ;;  %2729 = vmatprep.subr.bf16.mxu1 %v5400_v38  ;;  %v6468_v61 = vld [vmem:[#allocation16_spill] sm:$0xff] }
 0x7bf   :  { %v2824_v57 = vmul.f32 %v6425_v45, %v5603_v2  ;;  %v2571_v0 = vrot.slane %v5603_v2, 4  ;;  %v6467_v45 = vld [vmem:[#allocation67_spill] sm:$0xff]  ;;  %v6473_v38 = vld [vmem:[#allocation32_spill] sm:$0xff] }
 0x7c1   :  { %v2825_v39 = vsel %vm2798_vm0, %v2824_v57, 0.0  ;;  %v2573_v34 = vpack.c.bf16 %v2571_v0, %v2571_v0 }
 0x7c2   :  { %2826 = vadd.xlane.f32.xlu1 %v2825_v39 }
 0x7c3   :  { %v2575_v20 = vrot.slane %v2573_v34, 2  ;;  %v6482_v34 = vld [vmem:[#allocation24_spill] sm:$0xff] }
 0x7c5   :  { %2609 = vmatprep.mubr.bf16.mxu0 %v2575_v20  ;;  %2650 = vmatprep.mubr.bf16.mxu1 %v2575_v20  ;;  %v6474_v20 = vld [vmem:[#allocation33_spill] sm:$0xff] }
 0x7c6   :  { %2610 = vmatmul.mubr.bf16.vlgmr.msra.gmra.mrb[60].mxu0 %v5411_v40  ;;  %2651 = vmatmul.mubr.bf16.vlgmr.msra.gmra.mrb[60].mxu1 %v5411_v40 }
 0x7c7   :  { %2689 = vmatpush1.bf16.msra.mxu0 %v5415_v24  ;;  %2730 = vmatpush1.bf16.msra.mxu1 %v5418_v60 }
 0x7c8   :  { %2690 = vmatprep.subr.bf16.mxu0 %v5421_v58  ;;  %2731 = vmatprep.subr.bf16.mxu1 %v5424_v11 }
 0x7cb   :  { %2691 = vmatpush1.bf16.msra.mxu0 %v5427_v42  ;;  %2732 = vmatpush1.bf16.msra.mxu1 %v5430_v21 }
 0x7cc   :  { %2692 = vmatprep.subr.bf16.mxu0 %v5433_v17  ;;  %2733 = vmatprep.subr.bf16.mxu1 %v5436_v3  ;;  %v6475_v3 = vld [vmem:[#allocation19_spill] sm:$0xff] }
 0x7cf   :  { %2693 = vmatpush1.bf16.msra.mxu0 %v5439_v18  ;;  %2734 = vmatpush1.bf16.msra.mxu1 %v5442_v55 }
 0x7d0   :  { %2694 = vmatprep.subr.bf16.mxu0 %v5445_v27  ;;  %2735 = vmatprep.subr.bf16.mxu1 %v5448_v56  ;;  %v6476_v56 = vld [vmem:[#allocation21_spill] sm:$0xff] }
 0x7d3   :  { %2695 = vmatpush1.bf16.msra.mxu0 %v5451_v26  ;;  %2736 = vmatpush1.bf16.msra.mxu1 %v5454_v30 }
 0x7d4   :  { %2696 = vmatprep.subr.bf16.mxu0 %v5457_v31  ;;  %2737 = vmatprep.subr.bf16.mxu1 %v5460_v63  ;;  %v6477_v63 = vld [vmem:[#allocation22_spill] sm:$0xff] }
 0x7d7   :  { %2697 = vmatpush1.bf16.msra.mxu0 %v5463_v49  ;;  %2738 = vmatpush1.bf16.msra.mxu1 %v5466_v32  ;;  %v6478_v32 = vld [vmem:[#allocation20_spill] sm:$0xff] }
 0x7d8   :  { %2698 = vmatprep.subr.bf16.mxu0 %v5469_v54  ;;  %2739 = vmatprep.subr.bf16.mxu1 %v5472_v47 }
 0x7db   :  { %2699 = vmatpush1.bf16.msra.mxu0 %v5475_v36  ;;  %2740 = vmatpush1.bf16.msra.mxu1 %v5478_v43 }
 0x7dc   :  { %2700 = vmatprep.subr.bf16.mxu0 %v5481_v10  ;;  %2741 = vmatprep.subr.bf16.mxu1 %v5484_v5 }
 0x7df   :  { %2701 = vmatpush1.bf16.msra.mxu0 %v5488_v4  ;;  %2742 = vmatpush1.bf16.msra.mxu1 %v5491_v33 }
 0x7e0   :  { %2702 = vmatprep.subr.bf16.mxu0 %v5495_v15  ;;  %2743 = vmatprep.subr.bf16.mxu1 %v5498_v9  ;;  %v6479_v9 = vld [vmem:[#allocation62_spill] sm:$0xff] }
 0x7e3   :  { %2703 = vmatpush1.bf16.msra.mxu0 %v5502_v8  ;;  %2744 = vmatpush1.bf16.msra.mxu1 %v5505_v44  ;;  %v2563_v8 = vrot.slane %v6479_v9, 6 }
 0x7e4   :  { %2704 = vmatprep.subr.bf16.mxu0 %v5508_v50  ;;  %2745 = vmatprep.subr.bf16.mxu1 %v5511_v14 }
 0x7e7   :  { %2705 = vmatpush1.bf16.msra.mxu0 %v5514_v51  ;;  %2746 = vmatpush1.bf16.msra.mxu1 %v5517_v52 }
 0x7e8   :  { %2706 = vmatprep.subr.bf16.mxu0 %v5521_v25  ;;  %2747 = vmatprep.subr.bf16.mxu1 %v5524_v6 }
 0x7eb   :  { %2707 = vmatpush1.bf16.msra.mxu0 %v5527_v7  ;;  %2748 = vmatpush1.bf16.msra.mxu1 %v5530_v28 }
 0x7ec   :  { %2708 = vmatprep.subr.bf16.mxu0 %v5533_v46  ;;  %2749 = vmatprep.subr.bf16.mxu1 %v5536_v19  ;;  %v6480_v19 = vld [vmem:[#allocation23_spill] sm:$0xff] }
 0x7ef   :  { %2709 = vmatpush1.bf16.msra.mxu0 %v5539_v12  ;;  %2750 = vmatpush1.bf16.msra.mxu1 %v5542_v1 }
 0x7f0   :  { %2710 = vmatprep.subr.bf16.mxu0 %v5545_v53  ;;  %2751 = vmatprep.subr.bf16.mxu1 %v5548_v35  ;;  %v6469_v53 = vld [vmem:[#allocation28_spill] sm:$0xff]  ;;  %v6470_v35 = vld [vmem:[#allocation29_spill] sm:$0xff] }
 0x7f3   :  { %2711 = vmatpush1.bf16.msra.mxu0 %v5551_v48  ;;  %2752 = vmatpush1.bf16.msra.mxu1 %v5554_v41  ;;  %v6471_v48 = vld [vmem:[#allocation30_spill] sm:$0xff]  ;;  %v6472_v41 = vld [vmem:[#allocation31_spill] sm:$0xff] }
 0x7f4   :  { %2712 = vmatprep.subr.bf16.mxu0 %v5558_v37  ;;  %2753 = vmatprep.subr.bf16.mxu1 %v5561_v23  ;;  %v6481_v23 = vld [vmem:[#allocation68_spill] sm:$0xff] }
 0x7f7   :  { %2713 = vmatpush1.bf16.msra.mxu0 %v5566_v62  ;;  %2754 = vmatpush1.bf16.msra.mxu1 %v5569_v22 }
 0x7f8   :  { %2714 = vmatprep.subr.bf16.mxu0 %v5573_v29  ;;  %2755 = vmatprep.subr.bf16.mxu1 %v6467_v45 }
 0x7fb   :  { %2715 = vmatpush1.bf16.msra.mxu0 %v6468_v61  ;;  %2756 = vmatpush1.bf16.msra.mxu1 %v6469_v53  ;;  %v6483_v61 = vld [vmem:[#allocation25_spill] sm:$0xff] }
 0x7fc   :  { %2716 = vmatprep.subr.bf16.mxu0 %v6470_v35  ;;  %2757 = vmatprep.subr.bf16.mxu1 %v6471_v48 }
 0x7ff   :  { %2717 = vmatpush1.bf16.msra.mxu0 %v6472_v41  ;;  %2758 = vmatpush1.bf16.msra.mxu1 %v5594_v13 }
 0x800   :  { %2718 = vmatprep.subr.bf16.mxu0 %v6473_v38  ;;  %2759 = vmatprep.subr.bf16.mxu1 %v6474_v20 }
 0x803   :  { %2719 = vmatpush1.bf16.msra.mxu0 %v5605_v59  ;;  %2760 = vmatpush1.bf16.msra.mxu1 %v5608_v16 }
 0x853   :  { %v2485_v40 = vpop.f32.mrb[56].mxu0  ;;  %v2526_v24 = vpop.f32.mrb[56].mxu1 }
 0x854   :  { %v2537_v60 = vrot.slane %v2485_v40, 2  ;;  %v2487_v58 = vpop.f32.mrb[57].mxu0  ;;  %v2528_v11 = vpop.f32.mrb[57].mxu1  ;;  %v2539_v49 = vrot.slane %v2526_v24, 2 }
 0x855   :  { %v2538_v42 = vrot.slane %v2487_v58, 2  ;;  %v2489_v21 = vpop.f32.mrb[58].mxu0  ;;  %v2530_v17 = vpop.f32.mrb[58].mxu1  ;;  %v2540_v55 = vrot.slane %v2528_v11, 2  ;;  %v6484_v11 = vld [vmem:[#allocation26_spill] sm:$0xff] }
 0x856   :  { %v2545_v18 = vadd.f32 %v2537_v60, %v6475_v3  ;;  %v2490_v13 = vpop.f32.mrb[59].mxu0  ;;  %v2531_v27 = vpop.f32.mrb[59].mxu1  ;;  %v2547_v54 = vadd.f32 %v2539_v49, %v6478_v32  ;;  %v6485_v32 = vmov 0  }
 0x857   :  { %v2546_v26 = vadd.f32 %v2538_v42, %v6476_v56  ;;  %v2548_v16 = vadd.f32 %v2540_v55, %v6477_v63  ;;  %v3820_v27 = vld [vmem:[%s5738_s5] ss:$0 sm:$0xff]  ;;  %s3221_s5 = spop %3220 }
 0x858   :  { %v2549_v30 = vmul.f32 0.5, %v2545_v18  ;;  %v2551_v47 = vmul.f32 0.5, %v2547_v54 }
 0x859   :  { %v2550_v31 = vmul.f32 0.5, %v2546_v26 }
 0x85a   :  { %3579 = vtanh.f32 %v2549_v30 }
 0x85b   :  { %3581 = vtanh.f32 %v2550_v31 }
 0x85c   :  { %3583 = vtanh.f32 %v2548_v16 }
 0x85d   :  { %3585 = vtanh.f32 %v2551_v47 }
 0x864   :  { %v3580_v36 = vpop.eup %3579 }
 0x865   :  { %v2555_v43 = vmul.f32 0.5, %v3580_v36  ;;  %v3582_v10 = vpop.eup %3581 }
 0x866   :  { %v2556_v4 = vmul.f32 0.5, %v3582_v10  ;;  %v3584_v33 = vpop.eup %3583 }
 0x867   :  { %v2558_v5 = vadd.f32 0.5, %v2555_v43  ;;  %v3586_v51 = vpop.eup %3585 }
 0x868   :  { %v2559_v15 = vadd.f32 0.5, %v2556_v4  ;;  %v2557_v52 = vmul.f32 0.5, %v3586_v51 }
 0x869   :  { %v2566_v44 = vmul.f32 %v3584_v33, %v2558_v5 }
 0x86a   :  { %v2565_v50 = vmul.f32 %v2563_v8, %v2559_v15  ;;  %v2560_v25 = vadd.f32 0.5, %v2557_v52 }
 0x86c   :  { %v2567_v14 = vadd.f32 %v2566_v44, %v2565_v50 }
 0x86e   :  { %3587 = vtanh.f32 %v2567_v14 }
 0x878   :  { %v3588_v6 = vpop.eup %3587 }
 0x879   :  { %v2569_v7 = vmul.f32 %v3588_v6, %v2560_v25 }
 0x87b   :  { %v2680_v30 = vpack.c.bf16 %v2569_v7, %v2569_v7 }
 0x87d   :  { %v2684_v49 = vrot.slane %v2680_v30, 3 }
 0x899   :  { %v2611_v28 = vpop.f32.mrb[60].mxu0  ;;  %v2652_v46 = vpop.f32.mrb[60].mxu1 }
 0x89a   :  { %v2612_v12 = vadd.f32 %v2611_v28, %v6480_v19  ;;  %v2613_v1 = vpop.f32.mrb[61].mxu0  ;;  %v2654_v37 = vpop.f32.mrb[61].mxu1  ;;  %v2653_v53 = vadd.f32 %v2652_v46, %v6483_v61 }
 0x89b   :  { %v2614_v62 = vadd.f32 %v2613_v1, %v6481_v23  ;;  %v2615_v22 = vpop.f32.mrb[62].mxu0  ;;  %v2656_v29 = vpop.f32.mrb[62].mxu1  ;;  %v2655_v45 = vadd.f32 %v2654_v37, %v6482_v34 }
 0x89c   :  { %v2659_v57 = vmul.f32 0.5, %v2612_v12  ;;  %v2616_v59 = vpop.f32.mrb[63].mxu0  ;;  %v2657_v0 = vpop.f32.mrb[63].mxu1  ;;  %v2661_v35 = vmul.f32 0.5, %v2653_v53  ;;  %v3433_v53 = vld [vmem:[#allocation9 + $0x24] ss:$8 sps:$4 sm:$0xff]  }
 0x89d   :  { %v2660_v39 = vmul.f32 0.5, %v2614_v62 }
 0x89e   :  { %3589 = vtanh.f32 %v2659_v57 }
 0x89f   :  { %3591 = vtanh.f32 %v2660_v39  ;;  %v3427_v39 = vld [vmem:[#allocation9 + $0x4] ss:$8 sps:$4 sm:$0xff]  }
 0x8a0   :  { %3593 = vtanh.f32 %v2655_v45  ;;  %3003 = vmatprep.subr.bf16.mxu0 %v3427_v39  ;;  %v3430_v45 = vld [vmem:[#allocation9 + $0x14] ss:$8 sps:$4 sm:$0xff]  }
 0x8a1   :  { %3595 = vtanh.f32 %v2661_v35  ;;  %v3431_v35 = vld [vmem:[#allocation9 + $0x20] ss:$8 sps:$4 sm:$0xff]  }
 0x8a8   :  { %v3590_v48 = vpop.eup %3589 }
 0x8a9   :  { %v2665_v41 = vmul.f32 0.5, %v3590_v48  ;;  %v3592_v38 = vpop.eup %3591  ;;  %v3436_v48 = vld [vmem:[#allocation9 + $0x34] ss:$8 sps:$4 sm:$0xff]  }
 0x8aa   :  { %v2666_v40 = vmul.f32 0.5, %v3592_v38  ;;  %v3594_v24 = vpop.eup %3593  ;;  %v3439_v38 = vld [vmem:[#allocation9 + $0x44] ss:$8 sps:$4 sm:$0xff]  }
 0x8ab   :  { %v2668_v20 = vadd.f32 0.5, %v2665_v41  ;;  %v3596_v17 = vpop.eup %3595  ;;  %v3434_v41 = vld [vmem:[#allocation9 + $0x30] ss:$8 sps:$4 sm:$0xff]  }
 0x8ac   :  { %v2669_v60 = vadd.f32 0.5, %v2666_v40  ;;  %v2667_v3 = vmul.f32 0.5, %v3596_v17  ;;  %v3442_v40 = vld [vmem:[#allocation9 + $0x54] ss:$8 sps:$4 sm:$0xff]  }
 0x8ad   :  { %v2673_v58 = vmul.f32 %v3594_v24, %v2668_v20  ;;  %v3437_v20 = vld [vmem:[#allocation9 + $0x40] ss:$8 sps:$4 sm:$0xff]   ;;  %v3440_v24 = vld [vmem:[#allocation9 + $0x50] ss:$8 sps:$4 sm:$0xff]  }
 0x8ae   :  { %v2672_v42 = vmul.f32 %v2669_v60, %v6484_v11  ;;  %v2670_v18 = vadd.f32 0.5, %v2667_v3  ;;  %v3445_v60 = vld [vmem:[#allocation9 + $0x64] ss:$8 sps:$4 sm:$0xff]   ;;  %v3448_v11 = vld [vmem:[#allocation9 + $0x74] ss:$8 sps:$4 sm:$0xff]   ;;  %v2812_v3 = vpop.xlane.xlu1 %2811 }
 0x8b0   :  { %v2674_v21 = vadd.f32 %v2673_v58, %v2672_v42  ;;  %v3443_v58 = vld [vmem:[#allocation9 + $0x60] ss:$8 sps:$4 sm:$0xff]   ;;  %v3446_v42 = vld [vmem:[#allocation9 + $0x70] ss:$8 sps:$4 sm:$0xff]  }
 0x8b2   :  { %3597 = vtanh.f32 %v2674_v21 }
 0x8bc   :  { %v3598_v55 = vpop.eup %3597 }
 0x8bd   :  { %v5691_v13 = vmul.f32 %v3598_v55, %v2670_v18  ;;  %v2802_v18 = vstv %s3221_s5 }
 0x8bf   :  { %v2829_v56 = vmul.f32 %v3820_v27, %v5691_v13  ;;  %v2678_v26 = vrot.slane %v5691_v13, 2 }
 0x8c1   :  { %v2830_v31 = vsel %vm2798_vm0, %v2829_v56, 0.0  ;;  %v2681_v63 = vpack.c.bf16 %v2678_v26, %v2678_v26  ;;  %v2813_v26 = vadd.f32 %v2812_v3, %v2802_v18  ;;  %v6490_v3 = vld [vmem:[#allocation61_spill] sm:$0xff] }
 0x8c2   :  { %2831 = vadd.xlane.f32.xlu0 %v2830_v31 }
 0x8c3   :  { %v2685_v16 = vrot.slane %v2681_v63, 3 }
 0x8c5   :  { %2720 = vmatprep.mubr.bf16.mxu0 %v2685_v16  ;;  %2761 = vmatprep.mubr.bf16.mxu1 %v2685_v16 }
 0x8c6   :  { %2721 = vmatmul.mubr.bf16.vlgmr.msra.gmra.mrb[64].mxu0 %v2684_v49  ;;  %2762 = vmatmul.mubr.bf16.vlgmr.msra.gmra.mrb[64].mxu1 %v2684_v49 }
 0x8c7   :  { %3035 = vmatprep.mubr.bf16.mxu0 %v6485_v32 }
 0x999   :  { %v2722_v54 = vpop.f32.mrb[64].mxu0  ;;  %v2763_v47 = vpop.f32.mrb[64].mxu1 }
 0x99a   :  { %v2723_v36 = vadd.f32 %v2722_v54, %v6480_v19  ;;  %v2724_v43 = vpop.f32.mrb[65].mxu0  ;;  %v2765_v10 = vpop.f32.mrb[65].mxu1  ;;  %v2764_v14 = vadd.f32 %v2763_v47, %v6483_v61  ;;  %v3428_v61 = vld [vmem:[#allocation9 + $0x10] ss:$8 sps:$4 sm:$0xff]  }
 0x99b   :  { %v2725_v5 = vadd.f32 %v2724_v43, %v6481_v23  ;;  %v2726_v4 = vpop.f32.mrb[66].mxu0  ;;  %v2767_v33 = vpop.f32.mrb[66].mxu1  ;;  %v2766_v50 = vadd.f32 %v2765_v10, %v6482_v34  ;;  %v3425_v34 = vld [vmem:[#allocation9] ss:$8 sps:$4 sm:$0xff]  }
 0x99c   :  { %v2770_v15 = vmul.f32 0.5, %v2723_v36  ;;  %v2727_v9 = vpop.f32.mrb[67].mxu0  ;;  %v2768_v8 = vpop.f32.mrb[67].mxu1  ;;  %v2772_v51 = vmul.f32 0.5, %v2764_v14  ;;  %3004 = vmatpush1.bf16.msra.mxu0 %v3425_v34  ;;  %v6487_v34 = vld [vmem:[#allocation34_spill] sm:$0xff] }
 0x99d   :  { %v2771_v44 = vmul.f32 0.5, %v2725_v5  ;;  %3005 = vmatprep.subr.bf16.mxu0 %v3430_v45 }
 0x99e   :  { %3599 = vtanh.f32 %v2770_v15 }
 0x99f   :  { %3601 = vtanh.f32 %v2771_v44 }
 0x9a0   :  { %3603 = vtanh.f32 %v2766_v50  ;;  %3006 = vmatpush1.bf16.msra.mxu0 %v3428_v61 }
 0x9a1   :  { %3605 = vtanh.f32 %v2772_v51  ;;  %3007 = vmatprep.subr.bf16.mxu0 %v3433_v53 }
 0x9a4   :  { %3008 = vmatpush1.bf16.msra.mxu0 %v3431_v35 }
 0x9a5   :  { %3009 = vmatprep.subr.bf16.mxu0 %v3436_v48  ;;  %v6488_v48 = vld [vmem:[#allocation80_spill] sm:$0xff] }
 0x9a8   :  { %v3600_v52 = vpop.eup %3599  ;;  %3010 = vmatpush1.bf16.msra.mxu0 %v3434_v41 }
 0x9a9   :  { %v2776_v25 = vmul.f32 0.5, %v3600_v52  ;;  %v3602_v6 = vpop.eup %3601  ;;  %3011 = vmatprep.subr.bf16.mxu0 %v3439_v38 }
 0x9aa   :  { %v2777_v28 = vmul.f32 0.5, %v3602_v6  ;;  %v3604_v46 = vpop.eup %3603 }
 0x9ab   :  { %v2779_v7 = vadd.f32 0.5, %v2776_v25  ;;  %v3606_v23 = vpop.eup %3605 }
 0x9ac   :  { %v2780_v19 = vadd.f32 0.5, %v2777_v28  ;;  %v2778_v62 = vmul.f32 0.5, %v3606_v23  ;;  %3012 = vmatpush1.bf16.msra.mxu0 %v3437_v20 }
 0x9ad   :  { %v2784_v12 = vmul.f32 %v3604_v46, %v2779_v7  ;;  %3013 = vmatprep.subr.bf16.mxu0 %v3442_v40 }
 0x9ae   :  { %v2783_v1 = vmul.f32 %v2780_v19, %v2674_v21  ;;  %v2781_v22 = vadd.f32 0.5, %v2778_v62  ;;  %v2801_v21 = vpop.xlane.xlu0 %2800 }
 0x9af   :  { %v2803_v56 = vadd.f32 %v2802_v18, %v2801_v21 }
 0x9b0   :  { %v2785_v37 = vadd.f32 %v2784_v12, %v2783_v1  ;;  %3014 = vmatpush1.bf16.msra.mxu0 %v3440_v24  ;;  %v6489_v24 = vld [vmem:[#allocation37_spill] sm:$0xff] }
 0x9b1   :  { %3015 = vmatprep.subr.bf16.mxu0 %v3445_v60 }
 0x9b2   :  { %3607 = vtanh.f32 %v2785_v37  ;;  %v2807_v17 = vpop.xlane.xlu0 %2806 }
 0x9b3   :  { %v2808_v55 = vadd.f32 %v2807_v17, %v2802_v18 }
 0x9b4   :  { %3016 = vmatpush1.bf16.msra.mxu0 %v3443_v58 }
 0x9b5   :  { %3017 = vmatprep.subr.bf16.mxu0 %v3448_v11  ;;  %v2839_v31 = vmax.f32 %v2803_v56, %v2808_v55 }
 0x9b6   :  { %v2822_v30 = vpop.xlane.xlu0 %2821 }
 0x9b7   :  { %v2840_v49 = vmax.f32 %v2839_v31, %v2813_v26  ;;  %v2823_v32 = vadd.f32 %v2822_v30, %v2802_v18 }
 0x9b8   :  { %3018 = vmatpush1.bf16.msra.mxu0 %v3446_v42 }
 0x9ba   :  { %v2832_v54 = vpop.xlane.xlu0 %2831 }
 0x9bb   :  { %v2833_v10 = vadd.f32 %v2832_v54, %v2802_v18 }
 0x9bc   :  { %v3608_v29 = vpop.eup %3607 }
 0x9bd   :  { %v5704_v57 = vmul.f32 %v3608_v29, %v2781_v22  ;;  %v6486_v29 = vld [vmem:[#allocation27_spill] sm:$0xff] }
 0x9bf   :  { %v2834_v59 = vmul.f32 %v3820_v27, %v5704_v57  ;;  %v2817_v27 = vpop.xlane.xlu1 %2816 }
 0x9c0   :  { %v2818_v63 = vadd.f32 %v2817_v27, %v2802_v18 }
 0x9c1   :  { %v2835_v0 = vsel %vm2798_vm0, %v2834_v59, 0.0 }
 0x9c2   :  { %2836 = vadd.xlane.f32.xlu1 %v2835_v0  ;;  %v2841_v47 = vmax.f32 %v2840_v49, %v2818_v63 }
 0x9c3   :  { %v2827_v16 = vpop.xlane.xlu1 %2826 }
 0x9c4   :  { %v2828_v36 = vadd.f32 %v2827_v16, %v2802_v18  ;;  %v2842_v43 = vmax.f32 %v2841_v47, %v2823_v32 }
 0x9c6   :  { %v2843_v5 = vmax.f32 %v2842_v43, %v2828_v36  ;;  %v2911_v43 = vld [vmem:[%s5741_s8] sm:$0x3] }
 0x9c8   :  { %v2844_v33 = vmax.f32 %v2843_v5, %v2833_v10 }
 0xa4f   :  { %v2837_v4 = vpop.xlane.xlu1 %2836 }
 0xa50   :  { %v2838_v15 = vadd.f32 %v2837_v4, %v2802_v18  ;;  %v6492_v4 = vld [vmem:[#allocation18_spill] sm:$0xff] }
 0xa52   :  { %v2845_v9 = vmax.f32 %v2844_v33, %v2838_v15 }
 0xa54   :  { %v2846_v8 = vsub.f32 %v2803_v56, %v2845_v9  ;;  %v2849_v44 = vsub.f32 %v2808_v55, %v2845_v9  ;;  %v2852_v50 = vsub.f32 %v2813_v26, %v2845_v9  ;;  %v2855_v14 = vsub.f32 %v2818_v63, %v2845_v9 }
 0xa55   :  { %v2858_v6 = vsub.f32 %v2823_v32, %v2845_v9  ;;  %v2861_v28 = vsub.f32 %v2828_v36, %v2845_v9  ;;  %v2864_v19 = vsub.f32 %v2833_v10, %v2845_v9  ;;  %v2867_v1 = vsub.f32 %v2838_v15, %v2845_v9  ;;  %v6491_v10 = vld [vmem:[#allocation17_spill] sm:$0xff] }
 0xa56   :  { %v2847_v51 = vmul.f32 1.442695, %v2846_v8  ;;  %v2850_v52 = vmul.f32 1.442695, %v2849_v44  ;;  %v2853_v25 = vmul.f32 1.442695, %v2852_v50  ;;  %v2916_v5 = vrot.slane %v2911_v43, %v6491_v10 }
 0xa57   :  { %v2856_v7 = vmul.f32 1.442695, %v2855_v14  ;;  %v2859_v46 = vmul.f32 1.442695, %v2858_v6  ;;  %v2862_v12 = vmul.f32 1.442695, %v2861_v28 }
 0xa58   :  { %3609 = vpow2.f32 %v2847_v51  ;;  %v2865_v37 = vmul.f32 1.442695, %v2864_v19  ;;  %v2868_v23 = vmul.f32 1.442695, %v2867_v1 }
 0xa59   :  { %3611 = vpow2.f32 %v2850_v52 }
 0xa5a   :  { %3613 = vpow2.f32 %v2853_v25 }
 0xa5b   :  { %3615 = vpow2.f32 %v2856_v7 }
 0xa5c   :  { %3617 = vpow2.f32 %v2859_v46 }
 0xa5d   :  { %3619 = vpow2.f32 %v2862_v12 }
 0xa5e   :  { %3621 = vpow2.f32 %v2865_v37 }
 0xa5f   :  { %3623 = vpow2.f32 %v2868_v23 }
 0xa62   :  { %v3610_v62 = vpop.eup %3609 }
 0xa63   :  { %v3612_v22 = vpop.eup %3611  ;;  %v2870_v59 = vmul.f32 %v3610_v62, %v6486_v29 }
 0xa64   :  { %v3614_v0 = vpop.eup %3613  ;;  %v2871_v39 = vadd.f32 %v3612_v22, %v3610_v62  ;;  %v2872_v45 = vmul.f32 %v3612_v22, %v6487_v34 }
 0xa65   :  { %v3616_v61 = vpop.eup %3615  ;;  %v2875_v41 = vmul.f32 %v3614_v0, %v6488_v48 }
 0xa66   :  { %v2874_v53 = vadd.f32 %v3614_v0, %v2871_v39  ;;  %v2873_v35 = vadd.f32 %v2872_v45, %v2870_v59  ;;  %v3618_v40 = vpop.eup %3617  ;;  %v2878_v60 = vmul.f32 %v3616_v61, %v6489_v24 }
 0xa67   :  { %v3620_v11 = vpop.eup %3619  ;;  %v2881_v18 = vmul.f32 %v3618_v40, %v6490_v3 }
 0xa68   :  { %v2877_v38 = vadd.f32 %v3616_v61, %v2874_v53  ;;  %v2876_v20 = vadd.f32 %v2875_v41, %v2873_v35  ;;  %v3622_v17 = vpop.eup %3621  ;;  %v2884_v30 = vmul.f32 %v3620_v11, %v5603_v2  ;;  %v2920_v2 = vrot.slane %v2911_v43, %v6492_v4 }
 0xa69   :  { %v3624_v27 = vpop.eup %3623  ;;  %v2887_v63 = vmul.f32 %v3622_v17, %v5691_v13 }
 0xa6a   :  { %v2880_v58 = vadd.f32 %v3618_v40, %v2877_v38  ;;  %v2879_v42 = vadd.f32 %v2878_v60, %v2876_v20  ;;  %v2890_v49 = vmul.f32 %v3624_v27, %v5704_v57 }
 0xa6c   :  { %v2883_v21 = vadd.f32 %v3620_v11, %v2880_v58  ;;  %v2882_v56 = vadd.f32 %v2881_v18, %v2879_v42 }
 0xa6e   :  { %v2886_v55 = vadd.f32 %v3622_v17, %v2883_v21  ;;  %v2885_v31 = vadd.f32 %v2884_v30, %v2882_v56 }
 0xa70   :  { %v2889_v26 = vadd.f32 %v3624_v27, %v2886_v55  ;;  %v2888_v16 = vadd.f32 %v2887_v63, %v2885_v31 }
 0xa72   :  { %3625 = vrcp.f32 %v2889_v26  ;;  %v2891_v32 = vadd.f32 %v2890_v49, %v2888_v16 }
 0xa7c   :  { %v3626_v54 = vpop.eup %3625 }
 0xa7d   :  { %v2893_v47 = vmul.f32 %v3626_v54, %v2891_v32 }
 0xa7f   :  { %v2894_v36 = vpack.c.bf16 %v2893_v47, %v2893_v47 }
 0xa81   :  { %3036 = vmatmul.mubr.bf16.vlgmr.msra.gmra.mrb[68].mxu0 %v2894_v36 }
 0xb54   :  { %v3037_v33 = vpop.f32.mrb[68].mxu0 }
 0xb55   :  { %v3038_v15 = vadd.f32 %v3037_v33, %v2916_v5  ;;  %v3039_v9 = vpop.f32.mrb[69].mxu0 }
 0xb56   :  { %v3040_v13 = vadd.f32 %v3039_v9, %v2920_v2  ;;  %v3041_v57 = vpop.f32.mrb[70].mxu0 }
 0xb57   :  { %v3042_v8 = vpop.f32.mrb[71].mxu0 }
 0xb58   :  { %v3046_v44 = vcombine.low %v3038_v15, %v3040_v13 }
 0xb5a   :  { %3219 = vst.sshfl [vmem:[#allocation11] sm:$0x33 pattern:$0x76325410] %v3046_v44 }
 0xb5b   :  { %3920 = shalt.err (!%p3917_p8)
}
 0xb5c   :  { %s3921_s11 = scalar_lea.hbm %s5742_s9, 64 }
 0xb5d   :  { %p3922_p9 = scmp.ne.s32.totalorder %s5742_s9, %s3921_s11  ;;  %p3925_p10 = scmp.lt.u32.totalorder %s3921_s11, %s5742_s9 }
 0xb5f   :  { %p3927_p11 = pnand %p3925_p10, %p3922_p9 }
 0xb61   :  { %3930 = shalt.err (!%p3927_p11)
}
 0xb62   :  { %3065 = dma.vmem_to_hbm [thread:$0]  %s3063_s29, 64, %s5742_s9, [#allocation5]  }
 0xb63   :  { %3937 = dma.done.wait [#allocation5], 64  }
 0xb64   :  { %3938 = vsyncadd [#allocation5], 4294967232 }
 0xb65   :  { %3069 = vsyncpa [#allocation4], 1 }
 0xb66   :  { %3070 = vsyncpa [#allocation7], 1 }
 0xb67   :  { %3071 = vsyncpa [#allocation10], 1 }
 0xb68   :  { %3072 = vsyncpa [#allocation5], 1 }

</bundles_post_ra>
